<compile_context>
chip_gen: v7x
topology: tpu7x:2x2x1
jax: 0.10.0
libtpu: 0.0.40
codegen_flags: <defaults>
</compile_context>

<pallas_src>
import numpy as np
import jax
import jax.numpy as jnp
from jax.experimental import pallas as pl
from jax.experimental.pallas import tpu as pltpu

# ---------------- model config (small synthetic EfficientSAM) ----------------
IMG_SIZE = 32                       # self.image_size
C_IN = 3
PATCH = 8
GRID_HW = IMG_SIZE // PATCH         # 4
N_TOK = GRID_HW * GRID_HW           # 16 image tokens
KIN = PATCH * PATCH * C_IN          # 192 unfolded patch features
D = 32                              # embedding dim
N_HEADS = 2
HEAD_DIM = D // N_HEADS
MLP = 64
ENC_DEPTH = 2
NUM_MASKS = 3                       # multimask outputs
NUM_PTS = 2                         # a box == 2 corner points
TT = 1 + NUM_MASKS + NUM_PTS        # decoder tokens per query: [iou, masks, box corners]

MM_DTYPE = jnp.bfloat16             # MXU operand dtype (f32 accumulate) -- v5e/v6e/v7x native
VW = 3 * D                          # lane width of the packed small-vector slabs


# --------------------------- packed small-vector slabs ------------------------
# (name, n_rows, width) -- sliced with static row/lane offsets inside the kernel.
ENC_VEC_FIELDS = (("ln1_g", 1, D), ("ln1_b", 1, D), ("qkv_b", 1, 3 * D), ("o_b", 1, D),
                  ("ln2_g", 1, D), ("ln2_b", 1, D), ("fc1_b", 1, MLP), ("fc2_b", 1, D))
GLOB_VEC_FIELDS = (("neck_g", 1, D), ("neck_b", 1, D), ("out_tok", 1 + NUM_MASKS, D),
                   ("d_ln1_g", 1, D), ("d_ln1_b", 1, D), ("d_ln2_g", 1, D), ("d_ln2_b", 1, D),
                   ("d_ln3_g", 1, D), ("d_ln3_b", 1, D),
                   ("sqkv_b", 1, 3 * D), ("so_b", 1, D), ("cq_b", 1, D), ("ckv_b", 1, 2 * D),
                   ("co_b", 1, D), ("dfc1_b", 1, MLP), ("dfc2_b", 1, D),
                   ("hyp_b1", 1, D), ("hyp_b2", 1, D))


def _vec_index(fields):
    idx, r = {}, 0
    for name, nrows, width in fields:
        idx[name] = (r, nrows, width)
        r += nrows
    return idx, r


ENC_VEC_IDX, ENC_VEC_ROWS = _vec_index(ENC_VEC_FIELDS)
GLOB_VEC_IDX, GLOB_VEC_ROWS = _vec_index(GLOB_VEC_FIELDS)


def _pack_vecs(fields, values):
    """Stack small named vectors into one (rows, VW) f32 slab (lane-padded)."""
    rows = []
    for name, nrows, width in fields:
        a = jnp.asarray(values[name], jnp.float32).reshape(nrows, width)
        rows.append(jnp.pad(a, ((0, 0), (0, VW - width))))
    return jnp.concatenate(rows, axis=0)


def _vget(pack, idx, name):
    r, n, w = idx[name]
    return pack[r:r + n, :w]


# --------------------------- in-kernel helper math ---------------------------
def _ln(x, g, b, eps=1e-5):
    """LayerNorm over the last dim (f32 stats).  eps matches nn.LayerNorm default."""
    mu = jnp.mean(x, axis=-1, keepdims=True)
    var = jnp.mean(jnp.square(x - mu), axis=-1, keepdims=True)
    return (x - mu) * jax.lax.rsqrt(var + eps) * g + b


# contract last dims of both operands: a @ b^T without an explicit XLU transpose
_DN_T = (((1,), (1,)), ((), ()))


def _mm(a, b):
    """MXU matmul with bf16 operands, f32 accumulate (v6e/v7x bf16-native MXU)."""
    return jnp.dot(a.astype(MM_DTYPE), b.astype(MM_DTYPE),
                   preferred_element_type=jnp.float32)


def _mm_t(a, b):
    """a @ b^T with bf16 operands, transpose folded into the MXU feed."""
    return jax.lax.dot_general(a.astype(MM_DTYPE), b.astype(MM_DTYPE), _DN_T,
                               preferred_element_type=jnp.float32)


def _block_diag_mask(rows, cols, rb, cb):
    """mask[r, c] = (r // rb == c // cb), built without vector integer division."""
    nb = rows // rb
    assert nb * rb == rows and nb * cb == cols
    ri = jax.lax.broadcasted_iota(jnp.int32, (rows, cols), 0)
    ci = jax.lax.broadcasted_iota(jnp.int32, (rows, cols), 1)
    m = None
    for b in range(nb):
        blk = ((ri >= b * rb) & (ri < (b + 1) * rb) &
               (ci >= b * cb) & (ci < (b + 1) * cb))
        m = blk if m is None else (m | blk)
    return m


def _mha(q, k, v, o_w, scale, mask):
    """Multi-head attention + output projection (no output bias).

    q: [Tq, D], k/v: [Tk, D], o_w: [D, D] -> [Tq, D].  `mask` (or None) keeps attention
    per-image / per-query while the matmuls stay batched over the whole step.
    Heads are a static loop; per-head outputs are folded into the output projection by
    accumulating oh @ o_w[h*hd:(h+1)*hd, :].
    NOTE(perf review): at HEAD_DIM=16 the per-head lane slices are within a single vreg;
    head-batched dot_general / row-stacking alternatives trade them for equal-or-worse
    relayouts at this size, so the slices are kept.
    """
    acc = None
    for h in range(N_HEADS):
        lo = h * HEAD_DIM
        s = _mm_t(q[:, lo:lo + HEAD_DIM], k[:, lo:lo + HEAD_DIM]) * scale
        if mask is not None:
            s = jnp.where(mask, s, -1e30)
        s = s - jnp.max(s, axis=-1, keepdims=True)
        p = jnp.exp(s)
        p = p * pl.reciprocal(jnp.sum(p, axis=-1, keepdims=True), approx=True)
        oh = _mm(p, v[:, lo:lo + HEAD_DIM])                            # [Tq, hd]
        proj = _mm(oh, o_w[lo:lo + HEAD_DIM, :])                       # [Tq, D]
        acc = proj if acc is None else acc + proj
    return acc


# ------------------------------- fused kernel ---------------------------------
def _make_kernel(ips, q_per_img):
    """Fused encoder + decoder kernel for one grid step of `ips` images."""
    nq = ips * q_per_img            # queries handled per step
    r_img = ips * N_TOK             # encoder token rows per step
    r_tok = nq * TT                 # decoder token rows per step
    scale = 1.0 / float(np.sqrt(HEAD_DIM))

    def kernel(x_ref, sp_ref, patch_w_ref, pos_ref,
               eqkv_ref, eow_ref, ef1_ref, ef2_ref, evec_ref,
               sqkv_ref, sow_ref, cqw_ref, ckvw_ref, cow_ref,
               df1_ref, df2_ref, hw1_ref, hw2_ref, gvec_ref,
               out_ref):
        gv = gvec_ref[...]

        def gvec(name):
            return _vget(gv, GLOB_VEC_IDX, name)

        # ---------------- ViT encoder: ips images batched per grid step ----------------
        tok = _mm(x_ref[0], patch_w_ref[...])                   # (r_img, D) f32
        pos = pos_ref[...]                                      # pos_embed + patch bias (folded)
        if ips > 1:
            pos = jnp.concatenate([pos] * ips, axis=0)
        tok = tok + pos
        enc_mask = _block_diag_mask(r_img, r_img, N_TOK, N_TOK) if ips > 1 else None

        # TODO(synk): replace the static unroll with a grid axis / fori_loop if ENC_DEPTH grows.
        for i in range(ENC_DEPTH):
            ev = evec_ref[i]

            def evec(name, _ev=ev):
                return _vget(_ev, ENC_VEC_IDX, name)

            h = _ln(tok, evec("ln1_g"), evec("ln1_b"))
            qkv = _mm(h, eqkv_ref[i]) + evec("qkv_b")
            a = _mha(qkv[:, :D], qkv[:, D:2 * D], qkv[:, 2 * D:], eow_ref[i], scale, enc_mask)
            tok = tok + a + evec("o_b")
            h = _ln(tok, evec("ln2_g"), evec("ln2_b"))
            h = jax.nn.gelu(_mm(h, ef1_ref[i]) + evec("fc1_b"),
                            approximate=True)  # tanh GELU (PyTorch default is exact erf)
            tok = tok + _mm(h, ef2_ref[i]) + evec("fc2_b")
        keys = _ln(tok, gvec("neck_g"), gvec("neck_b"))         # image embeddings, stay in VMEM

        # ---------------- mask decoder: all nq queries of this step batched -------------
        sp = sp_ref[0]                                          # (nq*NUM_PTS, D)
        out_tok = gvec("out_tok")                               # (1+M, D) = [iou, mask0..2]
        t = jnp.concatenate(
            [jnp.concatenate([out_tok, sp[qi * NUM_PTS:(qi + 1) * NUM_PTS, :]], axis=0)
             for qi in range(nq)], axis=0)                      # (r_tok, D)

        # token self-attention (per-query blocks via mask; matmuls batched over queries)
        self_mask = _block_diag_mask(r_tok, r_tok, TT, TT) if nq > 1 else None
        qkv = _mm(t, sqkv_ref[...]) + gvec("sqkv_b")
        a = _mha(qkv[:, :D], qkv[:, D:2 * D], qkv[:, 2 * D:], sow_ref[...], scale, self_mask)
        t = _ln(t + a + gvec("so_b"), gvec("d_ln1_g"), gvec("d_ln1_b"))

        # token -> image cross-attention (per-image key blocks via mask)
        cross_mask = (_block_diag_mask(r_tok, r_img, q_per_img * TT, N_TOK)
                      if ips > 1 else None)
        qx = _mm(t, cqw_ref[...]) + gvec("cq_b")
        kv = _mm(keys, ckvw_ref[...]) + gvec("ckv_b")
        a = _mha(qx, kv[:, :D], kv[:, D:], cow_ref[...], scale, cross_mask)
        t = _ln(t + a + gvec("co_b"), gvec("d_ln2_g"), gvec("d_ln2_b"))
        # TODO(synk): the TwoWayTransformer's image->token attention branch is omitted.

        # MLP
        h = jax.nn.gelu(_mm(t, df1_ref[...]) + gvec("dfc1_b"), approximate=True)
        t = _ln(t + _mm(h, df2_ref[...]) + gvec("dfc2_b"), gvec("d_ln3_g"), gvec("d_ln3_b"))

        # hypernetwork + mask logits.  Computed batched over ALL decoder tokens and ALL
        # images of the step (one fat MXU push); the (mask-token rows x own-image cols)
        # blocks are then extracted and written as one flattened lane-dense slab.
        hy = jax.nn.gelu(_mm(t, hw1_ref[...]) + gvec("hyp_b1"), approximate=True)
        hy = _mm(hy, hw2_ref[...]) + gvec("hyp_b2")
        logits = _mm_t(hy, keys)                                # (r_tok, r_img)
        rows = []
        for qi in range(nq):
            r0 = qi * TT + 1                                    # skip the iou token row
            c0 = (qi // q_per_img) * N_TOK                      # own image's key columns
            rows.append(jnp.concatenate(
                [logits[r0 + m:r0 + m + 1, c0:c0 + N_TOK] for m in range(NUM_MASKS)],
                axis=1))                                        # (1, NUM_MASKS*N_TOK)
        out_ref[0] = jnp.concatenate(rows, axis=0)              # (nq, NUM_MASKS*N_TOK)

    return kernel


# ---------------------------- pallas_call wrapper ------------------------------
def _const_spec(shape):
    """Whole-array block, same block every grid step (stays VMEM-resident)."""
    nd = len(shape)
    return pl.BlockSpec(shape, lambda i, _nd=nd: (0,) * _nd)


def _images_per_step(B):
    """Fat grid steps amortize the ~0.35us/step overhead and raise MXU row utilization,
    but keep >=2 'parallel' steps so both v7x TensorCores get work."""
    for ips in (8, 4, 2):
        if B % ips == 0 and B // ips >= 2:
            return ips
    return 1


def _cost_estimate(B, Q, byte_count):
    d, m, n, t = D, MLP, N_TOK, TT
    enc_blk = (2 * n * d * 3 * d + N_HEADS * 4 * n * n * HEAD_DIM + 2 * n * d * d
               + 2 * n * d * m + 2 * n * m * d)
    enc = 2 * n * KIN * d + ENC_DEPTH * enc_blk
    dec = (2 * t * d * 3 * d + N_HEADS * 4 * t * t * HEAD_DIM + 2 * t * d * d
           + 2 * t * d * d + 2 * n * d * 2 * d + N_HEADS * 4 * t * n * HEAD_DIM + 2 * t * d * d
           + 2 * t * d * m + 2 * t * m * d
           + 4 * t * d * d + 2 * t * d * n)
    flops = B * enc + B * Q * dec
    transc = (B * ENC_DEPTH * (N_HEADS * n * n + n * m)
              + B * Q * (N_HEADS * (t * t + t * n) + t * m + t * d))
    return pl.CostEstimate(flops=flops, transcendentals=transc, bytes_accessed=byte_count)


# ------------------------------- parameters -----------------------------------
def init_params(seed=0):
    key = jax.random.PRNGKey(seed)
    kit = iter(jax.random.split(key, 64))

    def w(shape, scale=0.05):
        return scale * jax.random.normal(next(kit), shape, dtype=jnp.float32)

    def zeros(shape):
        return jnp.zeros(shape, jnp.float32)

    def ones(shape):
        return jnp.ones(shape, jnp.float32)

    p = {}
    # image encoder (per-block params stacked on a leading axis; QKV fused to (D, 3D))
    p["patch_w"] = w((KIN, D))
    p["patch_b"] = zeros((1, D))
    p["pos_embed"] = w((N_TOK, D))
    p["enc_ln1_g"] = ones((ENC_DEPTH, 1, D)); p["enc_ln1_b"] = zeros((ENC_DEPTH, 1, D))
    p["enc_ln2_g"] = ones((ENC_DEPTH, 1, D)); p["enc_ln2_b"] = zeros((ENC_DEPTH, 1, D))
    p["enc_qkv_w"] = w((ENC_DEPTH, D, 3 * D)); p["enc_qkv_b"] = zeros((ENC_DEPTH, 1, 3 * D))
    p["enc_o_w"] = w((ENC_DEPTH, D, D)); p["enc_o_b"] = zeros((ENC_DEPTH, 1, D))
    p["enc_fc1_w"] = w((ENC_DEPTH, D, MLP)); p["enc_fc1_b"] = zeros((ENC_DEPTH, 1, MLP))
    p["enc_fc2_w"] = w((ENC_DEPTH, MLP, D)); p["enc_fc2_b"] = zeros((ENC_DEPTH, 1, D))
    p["neck_ln_g"] = ones((1, D)); p["neck_ln_b"] = zeros((1, D))
    # prompt encoder
    p["pe_gauss"] = w((2, D // 2), scale=1.0)
    p["label_embed"] = w((4, D))
    # mask decoder (self-attn QKV fused; cross-attn KV fused)
    p["iou_token"] = w((1, D))
    p["mask_tokens"] = w((NUM_MASKS, D))
    p["dec_self_qkv_w"] = w((D, 3 * D)); p["dec_self_qkv_b"] = zeros((1, 3 * D))
    p["dec_self_o_w"] = w((D, D)); p["dec_self_o_b"] = zeros((1, D))
    p["dec_cross_q_w"] = w((D, D)); p["dec_cross_q_b"] = zeros((1, D))
    p["dec_cross_kv_w"] = w((D, 2 * D)); p["dec_cross_kv_b"] = zeros((1, 2 * D))
    p["dec_cross_o_w"] = w((D, D)); p["dec_cross_o_b"] = zeros((1, D))
    for j in (1, 2, 3):
        p[f"dec_ln{j}_g"] = ones((1, D)); p[f"dec_ln{j}_b"] = zeros((1, D))
    p["dec_fc1_w"] = w((D, MLP)); p["dec_fc1_b"] = zeros((1, MLP))
    p["dec_fc2_w"] = w((MLP, D)); p["dec_fc2_b"] = zeros((1, D))
    p["hyp_w1"] = w((D, D)); p["hyp_b1"] = zeros((1, D))
    p["hyp_w2"] = w((D, D)); p["hyp_b2"] = zeros((1, D))
    return p


def pack_params(p):
    """Kernel-ready params: bf16 MXU weights + two packed f32 small-vector slabs."""
    bf = lambda a: a.astype(jnp.bfloat16)
    enc_vec = jnp.stack([
        _pack_vecs(ENC_VEC_FIELDS, dict(
            ln1_g=p["enc_ln1_g"][i], ln1_b=p["enc_ln1_b"][i],
            qkv_b=p["enc_qkv_b"][i], o_b=p["enc_o_b"][i],
            ln2_g=p["enc_ln2_g"][i], ln2_b=p["enc_ln2_b"][i],
            fc1_b=p["enc_fc1_b"][i], fc2_b=p["enc_fc2_b"][i]))
        for i in range(ENC_DEPTH)])                              # (ENC_DEPTH, 8, VW)
    out_tok = jnp.concatenate([p["iou_token"], p["mask_tokens"]], axis=0)   # [iou, masks]
    glob_vec = _pack_vecs(GLOB_VEC_FIELDS, dict(
        neck_g=p["neck_ln_g"], neck_b=p["neck_ln_b"], out_tok=out_tok,
        d_ln1_g=p["dec_ln1_g"], d_ln1_b=p["dec_ln1_b"],
        d_ln2_g=p["dec_ln2_g"], d_ln2_b=p["dec_ln2_b"],
        d_ln3_g=p["dec_ln3_g"], d_ln3_b=p["dec_ln3_b"],
        sqkv_b=p["dec_self_qkv_b"], so_b=p["dec_self_o_b"],
        cq_b=p["dec_cross_q_b"], ckv_b=p["dec_cross_kv_b"], co_b=p["dec_cross_o_b"],
        dfc1_b=p["dec_fc1_b"], dfc2_b=p["dec_fc2_b"],
        hyp_b1=p["hyp_b1"], hyp_b2=p["hyp_b2"]))                 # (21, VW)
    return dict(
        patch_w=bf(p["patch_w"]),
        pos_b=p["pos_embed"] + p["patch_b"],                     # fold patch bias into pos table
        enc_qkv_w=bf(p["enc_qkv_w"]), enc_o_w=bf(p["enc_o_w"]),
        enc_fc1_w=bf(p["enc_fc1_w"]), enc_fc2_w=bf(p["enc_fc2_w"]),
        enc_vec=enc_vec,
        dec_self_qkv_w=bf(p["dec_self_qkv_w"]), dec_self_o_w=bf(p["dec_self_o_w"]),
        dec_cross_q_w=bf(p["dec_cross_q_w"]), dec_cross_kv_w=bf(p["dec_cross_kv_w"]),
        dec_cross_o_w=bf(p["dec_cross_o_w"]),
        dec_fc1_w=bf(p["dec_fc1_w"]), dec_fc2_w=bf(p["dec_fc2_w"]),
        hyp_w1=bf(p["hyp_w1"]), hyp_w2=bf(p["hyp_w2"]),
        glob_vec=glob_vec,
        pe_gauss=p["pe_gauss"], label_embed=p["label_embed"])


# --------------------------------- forward ------------------------------------
@jax.jit
def efficient_sam_forward(p, img, box_input, point_labels):
    """Mirrors EfficientSAMForwardWrapper.forward: returns predicted_logits only."""
    B = img.shape[0]
    Q = box_input.shape[1]
    ips = _images_per_step(B)
    steps = B // ips
    nq = ips * Q

    # patch unfold (conv stride=patch == unfold + matmul): NCHW -> (steps, ips*N_TOK, KIN)
    x = jnp.transpose(img, (0, 2, 3, 1))
    x = x.reshape(B, GRID_HW, PATCH, GRID_HW, PATCH, C_IN)
    x = jnp.transpose(x, (0, 1, 3, 2, 4, 5)).reshape(B, N_TOK, KIN)
    x = x.reshape(steps, ips * N_TOK, KIN)

    # prompt encoder (tiny glue, fused by XLA; the label gather stays outside the kernel)
    coords = box_input.astype(jnp.float32) / IMG_SIZE                     # [B,Q,P,2] in [0,1]
    ang = 2.0 * np.pi * jnp.einsum("bqpc,cd->bqpd", coords, p["pe_gauss"])
    pe = jnp.concatenate([jnp.sin(ang), jnp.cos(ang)], axis=-1)           # [B,Q,P,D]
    lbl = jnp.clip(point_labels.astype(jnp.int32), 0, 3)
    sparse = pe + jnp.take(p["label_embed"], lbl, axis=0)                 # [B,Q,P,D]
    sparse = sparse.reshape(steps, nq * NUM_PTS, D)

    weights = (p["patch_w"], p["pos_b"], p["enc_qkv_w"], p["enc_o_w"],
               p["enc_fc1_w"], p["enc_fc2_w"], p["enc_vec"],
               p["dec_self_qkv_w"], p["dec_self_o_w"], p["dec_cross_q_w"],
               p["dec_cross_kv_w"], p["dec_cross_o_w"], p["dec_fc1_w"], p["dec_fc2_w"],
               p["hyp_w1"], p["hyp_w2"], p["glob_vec"])

    byte_count = (x.size * 4 + sparse.size * 4 + steps * nq * NUM_MASKS * N_TOK * 4
                  + sum(int(np.prod(a.shape)) * a.dtype.itemsize for a in weights))

    in_specs = ([pl.BlockSpec((1, ips * N_TOK, KIN), lambda i: (i, 0, 0)),
                 pl.BlockSpec((1, nq * NUM_PTS, D), lambda i: (i, 0, 0))] +
                [_const_spec(a.shape) for a in weights])

    out = pl.pallas_call(
        _make_kernel(ips, Q),
        out_shape=jax.ShapeDtypeStruct((steps, nq, NUM_MASKS * N_TOK), jnp.float32),
        grid=(steps,),
        in_specs=in_specs,
        out_specs=pl.BlockSpec((1, nq, NUM_MASKS * N_TOK), lambda i: (i, 0, 0)),
        compiler_params=pltpu.CompilerParams(dimension_semantics=("parallel",)),
        cost_estimate=_cost_estimate(B, Q, byte_count),
    )(x, sparse, *weights)

    # (steps, ips*Q, M*N_TOK) rows are (image-major, query); lanes are (mask, token).
    predicted_logits = out.reshape(B, Q, NUM_MASKS, GRID_HW, GRID_HW)
    # NOTE: predicted_iou is computed by the real model but discarded by the wrapper, so
    # the IoU head is omitted (the IoU token still participates in decoder attention).
    # TODO(synk): real EfficientSAM neck (1x1 convs) + transposed-conv mask upscaling omitted;
    # masks are produced at patch resolution (GRID_HW x GRID_HW).
    return predicted_logits


if __name__ == "__main__":
    key = jax.random.PRNGKey(0)
    k_img, k_box = jax.random.split(key, 2)
    params = pack_params(init_params(seed=0))

    B, Q = 4, 2
    img = jax.random.normal(k_img, (B, C_IN, IMG_SIZE, IMG_SIZE), dtype=jnp.float32)
    box_input = jax.random.uniform(k_box, (B, Q, NUM_PTS, 2), minval=0.0,
                                   maxval=float(IMG_SIZE), dtype=jnp.float32)
    point_labels = jnp.tile(jnp.array([[[2, 3]]], dtype=jnp.int32), (B, Q, 1))  # box-corner labels

    out = efficient_sam_forward(params, img, box_input, point_labels)
    out = jax.block_until_ready(out)
    assert out.shape == (B, Q, NUM_MASKS, GRID_HW, GRID_HW)
    assert bool(jnp.all(jnp.isfinite(out)))
    print("KERNEL_OK")
</pallas_src>

<mosaic_0001>
module attributes {stable_mosaic.version = 11 : i64} {
  func.func @kernel(%arg0: i32, %arg1: memref<1x32x192xf32, #tpu.memory_space<vmem>>, %arg2: memref<1x8x32xf32, #tpu.memory_space<vmem>>, %arg3: memref<192x32xbf16, #tpu.memory_space<vmem>>, %arg4: memref<16x32xf32, #tpu.memory_space<vmem>>, %arg5: memref<2x32x96xbf16, #tpu.memory_space<vmem>>, %arg6: memref<2x32x32xbf16, #tpu.memory_space<vmem>>, %arg7: memref<2x32x64xbf16, #tpu.memory_space<vmem>>, %arg8: memref<2x64x32xbf16, #tpu.memory_space<vmem>>, %arg9: memref<2x8x96xf32, #tpu.memory_space<vmem>>, %arg10: memref<32x96xbf16, #tpu.memory_space<vmem>>, %arg11: memref<32x32xbf16, #tpu.memory_space<vmem>>, %arg12: memref<32x32xbf16, #tpu.memory_space<vmem>>, %arg13: memref<32x64xbf16, #tpu.memory_space<vmem>>, %arg14: memref<32x32xbf16, #tpu.memory_space<vmem>>, %arg15: memref<32x64xbf16, #tpu.memory_space<vmem>>, %arg16: memref<64x32xbf16, #tpu.memory_space<vmem>>, %arg17: memref<32x32xbf16, #tpu.memory_space<vmem>>, %arg18: memref<32x32xbf16, #tpu.memory_space<vmem>>, %arg19: memref<21x96xf32, #tpu.memory_space<vmem>>, %arg20: memref<1x4x48xf32, #tpu.memory_space<vmem>>) attributes {dimension_semantics = [#tpu.dimension_semantics<parallel>], iteration_bounds = array<i64: 2>, scalar_prefetch = 0 : i64, scratch_operands = 0 : i64, tpu.core_type = #tpu.core_type<tc>, window_params = [{transform_indices = @transform_0, window_bounds = array<i64: 1, 32, 192>}, {transform_indices = @transform_1, window_bounds = array<i64: 1, 8, 32>}, {pipeline_mode = #tpu.pipeline_mode<synchronous>, transform_indices = @transform_2, window_bounds = array<i64: 192, 32>}, {pipeline_mode = #tpu.pipeline_mode<synchronous>, transform_indices = @transform_3, window_bounds = array<i64: 16, 32>}, {pipeline_mode = #tpu.pipeline_mode<synchronous>, transform_indices = @transform_4, window_bounds = array<i64: 2, 32, 96>}, {pipeline_mode = #tpu.pipeline_mode<synchronous>, transform_indices = @transform_5, window_bounds = array<i64: 2, 32, 32>}, {pipeline_mode = #tpu.pipeline_mode<synchronous>, transform_indices = @transform_6, window_bounds = array<i64: 2, 32, 64>}, {pipeline_mode = #tpu.pipeline_mode<synchronous>, transform_indices = @transform_7, window_bounds = array<i64: 2, 64, 32>}, {pipeline_mode = #tpu.pipeline_mode<synchronous>, transform_indices = @transform_8, window_bounds = array<i64: 2, 8, 96>}, {pipeline_mode = #tpu.pipeline_mode<synchronous>, transform_indices = @transform_9, window_bounds = array<i64: 32, 96>}, {pipeline_mode = #tpu.pipeline_mode<synchronous>, transform_indices = @transform_10, window_bounds = array<i64: 32, 32>}, {pipeline_mode = #tpu.pipeline_mode<synchronous>, transform_indices = @transform_11, window_bounds = array<i64: 32, 32>}, {pipeline_mode = #tpu.pipeline_mode<synchronous>, transform_indices = @transform_12, window_bounds = array<i64: 32, 64>}, {pipeline_mode = #tpu.pipeline_mode<synchronous>, transform_indices = @transform_13, window_bounds = array<i64: 32, 32>}, {pipeline_mode = #tpu.pipeline_mode<synchronous>, transform_indices = @transform_14, window_bounds = array<i64: 32, 64>}, {pipeline_mode = #tpu.pipeline_mode<synchronous>, transform_indices = @transform_15, window_bounds = array<i64: 64, 32>}, {pipeline_mode = #tpu.pipeline_mode<synchronous>, transform_indices = @transform_16, window_bounds = array<i64: 32, 32>}, {pipeline_mode = #tpu.pipeline_mode<synchronous>, transform_indices = @transform_17, window_bounds = array<i64: 32, 32>}, {pipeline_mode = #tpu.pipeline_mode<synchronous>, transform_indices = @transform_18, window_bounds = array<i64: 21, 96>}, {transform_indices = @transform_19, window_bounds = array<i64: 1, 4, 48>}]} {
    %c0 = arith.constant 0 : index
    %c0_0 = arith.constant 0 : index
    %0 = vector.load %arg19[%c0, %c0_0] : memref<21x96xf32, #tpu.memory_space<vmem>>, vector<21x96xf32>
    %c0_1 = arith.constant 0 : index
    %c0_2 = arith.constant 0 : index
    %c0_3 = arith.constant 0 : index
    %1 = vector.load %arg1[%c0_1, %c0_2, %c0_3] : memref<1x32x192xf32, #tpu.memory_space<vmem>>, vector<1x32x192xf32>
    %2 = vector.shape_cast %1 : vector<1x32x192xf32> to vector<32x192xf32>
    %c0_4 = arith.constant 0 : index
    %c0_5 = arith.constant 0 : index
    %3 = vector.load %arg3[%c0_4, %c0_5] : memref<192x32xbf16, #tpu.memory_space<vmem>>, vector<192x32xbf16>
    %4 = arith.truncf %2 : vector<32x192xf32> to vector<32x192xbf16>
    %cst = arith.constant dense<0.000000e+00> : vector<32x32xf32>
    %5 = tpu.matmul %4, %3, %cst {dimension_numbers = #tpu.dot_dimension_numbers<[1], [0], [0], [1], [0, 0, 1, 1], [], []>} : vector<32x192xbf16>, vector<192x32xbf16>, vector<32x32xf32> -> vector<32x32xf32>
    %c0_6 = arith.constant 0 : index
    %c0_7 = arith.constant 0 : index
    %6 = vector.load %arg4[%c0_6, %c0_7] : memref<16x32xf32, #tpu.memory_space<vmem>>, vector<16x32xf32>
    %7 = tpu.concatenate %6, %6 in 0 : vector<16x32xf32>, vector<16x32xf32> -> vector<32x32xf32>
    %8 = arith.addf %5, %7 : vector<32x32xf32>
    %9 = tpu.iota {dimensions = array<i32: 0>} : vector<32x32xi32>
    %10 = tpu.iota {dimensions = array<i32: 1>} : vector<32x32xi32>
    %c0_i32 = arith.constant 0 : i32
    %11 = vector.broadcast %c0_i32 : i32 to vector<32x32xi32>
    %12 = arith.cmpi sge, %9, %11 : vector<32x32xi32>
    %c16_i32 = arith.constant 16 : i32
    %13 = vector.broadcast %c16_i32 : i32 to vector<32x32xi32>
    %14 = arith.cmpi slt, %9, %13 : vector<32x32xi32>
    %15 = arith.andi %12, %14 : vector<32x32xi1>
    %c0_i32_8 = arith.constant 0 : i32
    %16 = vector.broadcast %c0_i32_8 : i32 to vector<32x32xi32>
    %17 = arith.cmpi sge, %10, %16 : vector<32x32xi32>
    %18 = arith.andi %15, %17 : vector<32x32xi1>
    %c16_i32_9 = arith.constant 16 : i32
    %19 = vector.broadcast %c16_i32_9 : i32 to vector<32x32xi32>
    %20 = arith.cmpi slt, %10, %19 : vector<32x32xi32>
    %21 = arith.andi %18, %20 : vector<32x32xi1>
    %c16_i32_10 = arith.constant 16 : i32
    %22 = vector.broadcast %c16_i32_10 : i32 to vector<32x32xi32>
    %23 = arith.cmpi sge, %9, %22 : vector<32x32xi32>
    %c32_i32 = arith.constant 32 : i32
    %24 = vector.broadcast %c32_i32 : i32 to vector<32x32xi32>
    %25 = arith.cmpi slt, %9, %24 : vector<32x32xi32>
    %26 = arith.andi %23, %25 : vector<32x32xi1>
    %c16_i32_11 = arith.constant 16 : i32
    %27 = vector.broadcast %c16_i32_11 : i32 to vector<32x32xi32>
    %28 = arith.cmpi sge, %10, %27 : vector<32x32xi32>
    %29 = arith.andi %26, %28 : vector<32x32xi1>
    %c32_i32_12 = arith.constant 32 : i32
    %30 = vector.broadcast %c32_i32_12 : i32 to vector<32x32xi32>
    %31 = arith.cmpi slt, %10, %30 : vector<32x32xi32>
    %32 = arith.andi %29, %31 : vector<32x32xi1>
    %33 = arith.ori %21, %32 : vector<32x32xi1>
    %c0_13 = arith.constant 0 : index
    %c0_14 = arith.constant 0 : index
    %c0_15 = arith.constant 0 : index
    %34 = vector.load %arg9[%c0_13, %c0_14, %c0_15] : memref<2x8x96xf32, #tpu.memory_space<vmem>>, vector<1x8x96xf32>
    %35 = vector.shape_cast %34 : vector<1x8x96xf32> to vector<8x96xf32>
    %36 = vector.extract_strided_slice %35 {offsets = [0, 0], sizes = [1, 32], strides = [1, 1]} : vector<8x96xf32> to vector<1x32xf32>
    %37 = vector.extract_strided_slice %35 {offsets = [1, 0], sizes = [1, 32], strides = [1, 1]} : vector<8x96xf32> to vector<1x32xf32>
    %cst_16 = arith.constant dense<0.000000e+00> : vector<32xf32>
    %38 = vector.multi_reduction <add>, %8, %cst_16 [1] : vector<32x32xf32> to vector<32xf32>
    %39 = vector.shape_cast %38 : vector<32xf32> to vector<32x1xf32>
    %cst_17 = arith.constant 3.200000e+01 : f32
    %40 = vector.broadcast %cst_17 : f32 to vector<32x1xf32>
    %41 = arith.divf %39, %40 : vector<32x1xf32>
    %42 = vector.broadcast %41 : vector<32x1xf32> to vector<32x32xf32>
    %43 = arith.subf %8, %42 : vector<32x32xf32>
    %44 = arith.mulf %43, %43 : vector<32x32xf32>
    %cst_18 = arith.constant dense<0.000000e+00> : vector<32xf32>
    %45 = vector.multi_reduction <add>, %44, %cst_18 [1] : vector<32x32xf32> to vector<32xf32>
    %46 = vector.shape_cast %45 : vector<32xf32> to vector<32x1xf32>
    %cst_19 = arith.constant 3.200000e+01 : f32
    %47 = vector.broadcast %cst_19 : f32 to vector<32x1xf32>
    %48 = arith.divf %46, %47 : vector<32x1xf32>
    %49 = vector.broadcast %41 : vector<32x1xf32> to vector<32x32xf32>
    %50 = arith.subf %8, %49 : vector<32x32xf32>
    %cst_20 = arith.constant 9.99999974E-6 : f32
    %51 = vector.broadcast %cst_20 : f32 to vector<32x1xf32>
    %52 = arith.addf %48, %51 : vector<32x1xf32>
    %53 = math.rsqrt %52 : vector<32x1xf32>
    %54 = vector.broadcast %53 : vector<32x1xf32> to vector<32x32xf32>
    %55 = arith.mulf %50, %54 : vector<32x32xf32>
    %56 = vector.broadcast %36 : vector<1x32xf32> to vector<32x32xf32>
    %57 = arith.mulf %55, %56 : vector<32x32xf32>
    %58 = vector.broadcast %37 : vector<1x32xf32> to vector<32x32xf32>
    %59 = arith.addf %57, %58 : vector<32x32xf32>
    %c0_21 = arith.constant 0 : index
    %c0_22 = arith.constant 0 : index
    %c0_23 = arith.constant 0 : index
    %60 = vector.load %arg5[%c0_21, %c0_22, %c0_23] : memref<2x32x96xbf16, #tpu.memory_space<vmem>>, vector<1x32x96xbf16>
    %61 = vector.shape_cast %60 : vector<1x32x96xbf16> to vector<32x96xbf16>
    %62 = arith.truncf %59 : vector<32x32xf32> to vector<32x32xbf16>
    %cst_24 = arith.constant dense<0.000000e+00> : vector<32x96xf32>
    %63 = tpu.matmul %62, %61, %cst_24 {dimension_numbers = #tpu.dot_dimension_numbers<[1], [0], [0], [1], [0, 0, 1, 1], [], []>} : vector<32x32xbf16>, vector<32x96xbf16>, vector<32x96xf32> -> vector<32x96xf32>
    %64 = vector.extract_strided_slice %35 {offsets = [2, 0], sizes = [1, 96], strides = [1, 1]} : vector<8x96xf32> to vector<1x96xf32>
    %65 = vector.broadcast %64 : vector<1x96xf32> to vector<32x96xf32>
    %66 = arith.addf %63, %65 : vector<32x96xf32>
    %67 = vector.extract_strided_slice %66 {offsets = [0, 0], sizes = [32, 32], strides = [1, 1]} : vector<32x96xf32> to vector<32x32xf32>
    %68 = vector.extract_strided_slice %66 {offsets = [0, 32], sizes = [32, 32], strides = [1, 1]} : vector<32x96xf32> to vector<32x32xf32>
    %69 = vector.extract_strided_slice %66 {offsets = [0, 64], sizes = [32, 32], strides = [1, 1]} : vector<32x96xf32> to vector<32x32xf32>
    %c0_25 = arith.constant 0 : index
    %c0_26 = arith.constant 0 : index
    %c0_27 = arith.constant 0 : index
    %70 = vector.load %arg6[%c0_25, %c0_26, %c0_27] : memref<2x32x32xbf16, #tpu.memory_space<vmem>>, vector<1x32x32xbf16>
    %71 = vector.shape_cast %70 : vector<1x32x32xbf16> to vector<32x32xbf16>
    %72 = vector.extract_strided_slice %67 {offsets = [0, 0], sizes = [32, 16], strides = [1, 1]} : vector<32x32xf32> to vector<32x16xf32>
    %73 = vector.extract_strided_slice %68 {offsets = [0, 0], sizes = [32, 16], strides = [1, 1]} : vector<32x32xf32> to vector<32x16xf32>
    %74 = arith.truncf %72 : vector<32x16xf32> to vector<32x16xbf16>
    %75 = arith.truncf %73 : vector<32x16xf32> to vector<32x16xbf16>
    %cst_28 = arith.constant dense<0.000000e+00> : vector<32x32xf32>
    %76 = tpu.matmul %74, %75, %cst_28 {dimension_numbers = #tpu.dot_dimension_numbers<[1], [1], [0], [0], [0, 0, 1, 0], [], []>} : vector<32x16xbf16>, vector<32x16xbf16>, vector<32x32xf32> -> vector<32x32xf32>
    %cst_29 = arith.constant 2.500000e-01 : f32
    %77 = vector.broadcast %cst_29 : f32 to vector<32x32xf32>
    %78 = arith.mulf %76, %77 : vector<32x32xf32>
    %cst_30 = arith.constant -1.000000e+30 : f32
    %79 = vector.broadcast %cst_30 : f32 to vector<32x32xf32>
    %80 = arith.select %33, %78, %79 : vector<32x32xi1>, vector<32x32xf32>
    %cst_31 = arith.constant dense<0xFF800000> : vector<32xf32>
    %81 = vector.multi_reduction <maximumf>, %80, %cst_31 [1] : vector<32x32xf32> to vector<32xf32>
    %82 = vector.shape_cast %81 : vector<32xf32> to vector<32x1xf32>
    %83 = vector.broadcast %82 : vector<32x1xf32> to vector<32x32xf32>
    %84 = arith.subf %80, %83 : vector<32x32xf32>
    %85 = math.exp %84 : vector<32x32xf32>
    %cst_32 = arith.constant dense<0.000000e+00> : vector<32xf32>
    %86 = vector.multi_reduction <add>, %85, %cst_32 [1] : vector<32x32xf32> to vector<32xf32>
    %87 = vector.shape_cast %86 : vector<32xf32> to vector<32x1xf32>
    %88 = tpu.reciprocal %87 {approx = true} : vector<32x1xf32> -> vector<32x1xf32>
    %89 = vector.broadcast %88 : vector<32x1xf32> to vector<32x32xf32>
    %90 = arith.mulf %85, %89 : vector<32x32xf32>
    %91 = vector.extract_strided_slice %69 {offsets = [0, 0], sizes = [32, 16], strides = [1, 1]} : vector<32x32xf32> to vector<32x16xf32>
    %92 = arith.truncf %90 : vector<32x32xf32> to vector<32x32xbf16>
    %93 = arith.truncf %91 : vector<32x16xf32> to vector<32x16xbf16>
    %cst_33 = arith.constant dense<0.000000e+00> : vector<32x16xf32>
    %94 = tpu.matmul %92, %93, %cst_33 {dimension_numbers = #tpu.dot_dimension_numbers<[1], [0], [0], [1], [0, 0, 1, 1], [], []>} : vector<32x32xbf16>, vector<32x16xbf16>, vector<32x16xf32> -> vector<32x16xf32>
    %95 = vector.extract_strided_slice %71 {offsets = [0, 0], sizes = [16, 32], strides = [1, 1]} : vector<32x32xbf16> to vector<16x32xbf16>
    %96 = arith.truncf %94 : vector<32x16xf32> to vector<32x16xbf16>
    %cst_34 = arith.constant dense<0.000000e+00> : vector<32x32xf32>
    %97 = tpu.matmul %96, %95, %cst_34 {dimension_numbers = #tpu.dot_dimension_numbers<[1], [0], [0], [1], [0, 0, 1, 1], [], []>} : vector<32x16xbf16>, vector<16x32xbf16>, vector<32x32xf32> -> vector<32x32xf32>
    %98 = vector.extract_strided_slice %67 {offsets = [0, 16], sizes = [32, 16], strides = [1, 1]} : vector<32x32xf32> to vector<32x16xf32>
    %99 = vector.extract_strided_slice %68 {offsets = [0, 16], sizes = [32, 16], strides = [1, 1]} : vector<32x32xf32> to vector<32x16xf32>
    %100 = arith.truncf %98 : vector<32x16xf32> to vector<32x16xbf16>
    %101 = arith.truncf %99 : vector<32x16xf32> to vector<32x16xbf16>
    %cst_35 = arith.constant dense<0.000000e+00> : vector<32x32xf32>
    %102 = tpu.matmul %100, %101, %cst_35 {dimension_numbers = #tpu.dot_dimension_numbers<[1], [1], [0], [0], [0, 0, 1, 0], [], []>} : vector<32x16xbf16>, vector<32x16xbf16>, vector<32x32xf32> -> vector<32x32xf32>
    %cst_36 = arith.constant 2.500000e-01 : f32
    %103 = vector.broadcast %cst_36 : f32 to vector<32x32xf32>
    %104 = arith.mulf %102, %103 : vector<32x32xf32>
    %cst_37 = arith.constant -1.000000e+30 : f32
    %105 = vector.broadcast %cst_37 : f32 to vector<32x32xf32>
    %106 = arith.select %33, %104, %105 : vector<32x32xi1>, vector<32x32xf32>
    %cst_38 = arith.constant dense<0xFF800000> : vector<32xf32>
    %107 = vector.multi_reduction <maximumf>, %106, %cst_38 [1] : vector<32x32xf32> to vector<32xf32>
    %108 = vector.shape_cast %107 : vector<32xf32> to vector<32x1xf32>
    %109 = vector.broadcast %108 : vector<32x1xf32> to vector<32x32xf32>
    %110 = arith.subf %106, %109 : vector<32x32xf32>
    %111 = math.exp %110 : vector<32x32xf32>
    %cst_39 = arith.constant dense<0.000000e+00> : vector<32xf32>
    %112 = vector.multi_reduction <add>, %111, %cst_39 [1] : vector<32x32xf32> to vector<32xf32>
    %113 = vector.shape_cast %112 : vector<32xf32> to vector<32x1xf32>
    %114 = tpu.reciprocal %113 {approx = true} : vector<32x1xf32> -> vector<32x1xf32>
    %115 = vector.broadcast %114 : vector<32x1xf32> to vector<32x32xf32>
    %116 = arith.mulf %111, %115 : vector<32x32xf32>
    %117 = vector.extract_strided_slice %69 {offsets = [0, 16], sizes = [32, 16], strides = [1, 1]} : vector<32x32xf32> to vector<32x16xf32>
    %118 = arith.truncf %116 : vector<32x32xf32> to vector<32x32xbf16>
    %119 = arith.truncf %117 : vector<32x16xf32> to vector<32x16xbf16>
    %cst_40 = arith.constant dense<0.000000e+00> : vector<32x16xf32>
    %120 = tpu.matmul %118, %119, %cst_40 {dimension_numbers = #tpu.dot_dimension_numbers<[1], [0], [0], [1], [0, 0, 1, 1], [], []>} : vector<32x32xbf16>, vector<32x16xbf16>, vector<32x16xf32> -> vector<32x16xf32>
    %121 = vector.extract_strided_slice %71 {offsets = [16, 0], sizes = [16, 32], strides = [1, 1]} : vector<32x32xbf16> to vector<16x32xbf16>
    %122 = arith.truncf %120 : vector<32x16xf32> to vector<32x16xbf16>
    %cst_41 = arith.constant dense<0.000000e+00> : vector<32x32xf32>
    %123 = tpu.matmul %122, %121, %cst_41 {dimension_numbers = #tpu.dot_dimension_numbers<[1], [0], [0], [1], [0, 0, 1, 1], [], []>} : vector<32x16xbf16>, vector<16x32xbf16>, vector<32x32xf32> -> vector<32x32xf32>
    %124 = arith.addf %97, %123 : vector<32x32xf32>
    %125 = arith.addf %8, %124 : vector<32x32xf32>
    %126 = vector.extract_strided_slice %35 {offsets = [3, 0], sizes = [1, 32], strides = [1, 1]} : vector<8x96xf32> to vector<1x32xf32>
    %127 = vector.broadcast %126 : vector<1x32xf32> to vector<32x32xf32>
    %128 = arith.addf %125, %127 : vector<32x32xf32>
    %129 = vector.extract_strided_slice %35 {offsets = [4, 0], sizes = [1, 32], strides = [1, 1]} : vector<8x96xf32> to vector<1x32xf32>
    %130 = vector.extract_strided_slice %35 {offsets = [5, 0], sizes = [1, 32], strides = [1, 1]} : vector<8x96xf32> to vector<1x32xf32>
    %cst_42 = arith.constant dense<0.000000e+00> : vector<32xf32>
    %131 = vector.multi_reduction <add>, %128, %cst_42 [1] : vector<32x32xf32> to vector<32xf32>
    %132 = vector.shape_cast %131 : vector<32xf32> to vector<32x1xf32>
    %cst_43 = arith.constant 3.200000e+01 : f32
    %133 = vector.broadcast %cst_43 : f32 to vector<32x1xf32>
    %134 = arith.divf %132, %133 : vector<32x1xf32>
    %135 = vector.broadcast %134 : vector<32x1xf32> to vector<32x32xf32>
    %136 = arith.subf %128, %135 : vector<32x32xf32>
    %137 = arith.mulf %136, %136 : vector<32x32xf32>
    %cst_44 = arith.constant dense<0.000000e+00> : vector<32xf32>
    %138 = vector.multi_reduction <add>, %137, %cst_44 [1] : vector<32x32xf32> to vector<32xf32>
    %139 = vector.shape_cast %138 : vector<32xf32> to vector<32x1xf32>
    %cst_45 = arith.constant 3.200000e+01 : f32
    %140 = vector.broadcast %cst_45 : f32 to vector<32x1xf32>
    %141 = arith.divf %139, %140 : vector<32x1xf32>
    %142 = vector.broadcast %134 : vector<32x1xf32> to vector<32x32xf32>
    %143 = arith.subf %128, %142 : vector<32x32xf32>
    %cst_46 = arith.constant 9.99999974E-6 : f32
    %144 = vector.broadcast %cst_46 : f32 to vector<32x1xf32>
    %145 = arith.addf %141, %144 : vector<32x1xf32>
    %146 = math.rsqrt %145 : vector<32x1xf32>
    %147 = vector.broadcast %146 : vector<32x1xf32> to vector<32x32xf32>
    %148 = arith.mulf %143, %147 : vector<32x32xf32>
    %149 = vector.broadcast %129 : vector<1x32xf32> to vector<32x32xf32>
    %150 = arith.mulf %148, %149 : vector<32x32xf32>
    %151 = vector.broadcast %130 : vector<1x32xf32> to vector<32x32xf32>
    %152 = arith.addf %150, %151 : vector<32x32xf32>
    %c0_47 = arith.constant 0 : index
    %c0_48 = arith.constant 0 : index
    %c0_49 = arith.constant 0 : index
    %153 = vector.load %arg7[%c0_47, %c0_48, %c0_49] : memref<2x32x64xbf16, #tpu.memory_space<vmem>>, vector<1x32x64xbf16>
    %154 = vector.shape_cast %153 : vector<1x32x64xbf16> to vector<32x64xbf16>
    %155 = arith.truncf %152 : vector<32x32xf32> to vector<32x32xbf16>
    %cst_50 = arith.constant dense<0.000000e+00> : vector<32x64xf32>
    %156 = tpu.matmul %155, %154, %cst_50 {dimension_numbers = #tpu.dot_dimension_numbers<[1], [0], [0], [1], [0, 0, 1, 1], [], []>} : vector<32x32xbf16>, vector<32x64xbf16>, vector<32x64xf32> -> vector<32x64xf32>
    %157 = vector.extract_strided_slice %35 {offsets = [6, 0], sizes = [1, 64], strides = [1, 1]} : vector<8x96xf32> to vector<1x64xf32>
    %158 = vector.broadcast %157 : vector<1x64xf32> to vector<32x64xf32>
    %159 = arith.addf %156, %158 : vector<32x64xf32>
    %160 = arith.mulf %159, %159 : vector<32x64xf32>
    %161 = arith.mulf %159, %160 : vector<32x64xf32>
    %cst_51 = arith.constant 4.471500e-02 : f32
    %162 = vector.broadcast %cst_51 : f32 to vector<32x64xf32>
    %163 = arith.mulf %162, %161 : vector<32x64xf32>
    %164 = arith.addf %159, %163 : vector<32x64xf32>
    %cst_52 = arith.constant 0.797884583 : f32
    %165 = vector.broadcast %cst_52 : f32 to vector<32x64xf32>
    %166 = arith.mulf %165, %164 : vector<32x64xf32>
    %167 = math.tanh %166 : vector<32x64xf32>
    %cst_53 = arith.constant 1.000000e+00 : f32
    %168 = vector.broadcast %cst_53 : f32 to vector<32x64xf32>
    %169 = arith.addf %168, %167 : vector<32x64xf32>
    %cst_54 = arith.constant 5.000000e-01 : f32
    %170 = vector.broadcast %cst_54 : f32 to vector<32x64xf32>
    %171 = arith.mulf %170, %169 : vector<32x64xf32>
    %172 = arith.mulf %159, %171 : vector<32x64xf32>
    %c0_55 = arith.constant 0 : index
    %c0_56 = arith.constant 0 : index
    %c0_57 = arith.constant 0 : index
    %173 = vector.load %arg8[%c0_55, %c0_56, %c0_57] : memref<2x64x32xbf16, #tpu.memory_space<vmem>>, vector<1x64x32xbf16>
    %174 = vector.shape_cast %173 : vector<1x64x32xbf16> to vector<64x32xbf16>
    %175 = arith.truncf %172 : vector<32x64xf32> to vector<32x64xbf16>
    %cst_58 = arith.constant dense<0.000000e+00> : vector<32x32xf32>
    %176 = tpu.matmul %175, %174, %cst_58 {dimension_numbers = #tpu.dot_dimension_numbers<[1], [0], [0], [1], [0, 0, 1, 1], [], []>} : vector<32x64xbf16>, vector<64x32xbf16>, vector<32x32xf32> -> vector<32x32xf32>
    %177 = arith.addf %128, %176 : vector<32x32xf32>
    %178 = vector.extract_strided_slice %35 {offsets = [7, 0], sizes = [1, 32], strides = [1, 1]} : vector<8x96xf32> to vector<1x32xf32>
    %179 = vector.broadcast %178 : vector<1x32xf32> to vector<32x32xf32>
    %180 = arith.addf %177, %179 : vector<32x32xf32>
    %c1 = arith.constant 1 : index
    %c0_59 = arith.constant 0 : index
    %c0_60 = arith.constant 0 : index
    %181 = vector.load %arg9[%c1, %c0_59, %c0_60] : memref<2x8x96xf32, #tpu.memory_space<vmem>>, vector<1x8x96xf32>
    %182 = vector.shape_cast %181 : vector<1x8x96xf32> to vector<8x96xf32>
    %183 = vector.extract_strided_slice %182 {offsets = [0, 0], sizes = [1, 32], strides = [1, 1]} : vector<8x96xf32> to vector<1x32xf32>
    %184 = vector.extract_strided_slice %182 {offsets = [1, 0], sizes = [1, 32], strides = [1, 1]} : vector<8x96xf32> to vector<1x32xf32>
    %cst_61 = arith.constant dense<0.000000e+00> : vector<32xf32>
    %185 = vector.multi_reduction <add>, %180, %cst_61 [1] : vector<32x32xf32> to vector<32xf32>
    %186 = vector.shape_cast %185 : vector<32xf32> to vector<32x1xf32>
    %cst_62 = arith.constant 3.200000e+01 : f32
    %187 = vector.broadcast %cst_62 : f32 to vector<32x1xf32>
    %188 = arith.divf %186, %187 : vector<32x1xf32>
    %189 = vector.broadcast %188 : vector<32x1xf32> to vector<32x32xf32>
    %190 = arith.subf %180, %189 : vector<32x32xf32>
    %191 = arith.mulf %190, %190 : vector<32x32xf32>
    %cst_63 = arith.constant dense<0.000000e+00> : vector<32xf32>
    %192 = vector.multi_reduction <add>, %191, %cst_63 [1] : vector<32x32xf32> to vector<32xf32>
    %193 = vector.shape_cast %192 : vector<32xf32> to vector<32x1xf32>
    %cst_64 = arith.constant 3.200000e+01 : f32
    %194 = vector.broadcast %cst_64 : f32 to vector<32x1xf32>
    %195 = arith.divf %193, %194 : vector<32x1xf32>
    %196 = vector.broadcast %188 : vector<32x1xf32> to vector<32x32xf32>
    %197 = arith.subf %180, %196 : vector<32x32xf32>
    %cst_65 = arith.constant 9.99999974E-6 : f32
    %198 = vector.broadcast %cst_65 : f32 to vector<32x1xf32>
    %199 = arith.addf %195, %198 : vector<32x1xf32>
    %200 = math.rsqrt %199 : vector<32x1xf32>
    %201 = vector.broadcast %200 : vector<32x1xf32> to vector<32x32xf32>
    %202 = arith.mulf %197, %201 : vector<32x32xf32>
    %203 = vector.broadcast %183 : vector<1x32xf32> to vector<32x32xf32>
    %204 = arith.mulf %202, %203 : vector<32x32xf32>
    %205 = vector.broadcast %184 : vector<1x32xf32> to vector<32x32xf32>
    %206 = arith.addf %204, %205 : vector<32x32xf32>
    %c1_66 = arith.constant 1 : index
    %c0_67 = arith.constant 0 : index
    %c0_68 = arith.constant 0 : index
    %207 = vector.load %arg5[%c1_66, %c0_67, %c0_68] : memref<2x32x96xbf16, #tpu.memory_space<vmem>>, vector<1x32x96xbf16>
    %208 = vector.shape_cast %207 : vector<1x32x96xbf16> to vector<32x96xbf16>
    %209 = arith.truncf %206 : vector<32x32xf32> to vector<32x32xbf16>
    %cst_69 = arith.constant dense<0.000000e+00> : vector<32x96xf32>
    %210 = tpu.matmul %209, %208, %cst_69 {dimension_numbers = #tpu.dot_dimension_numbers<[1], [0], [0], [1], [0, 0, 1, 1], [], []>} : vector<32x32xbf16>, vector<32x96xbf16>, vector<32x96xf32> -> vector<32x96xf32>
    %211 = vector.extract_strided_slice %182 {offsets = [2, 0], sizes = [1, 96], strides = [1, 1]} : vector<8x96xf32> to vector<1x96xf32>
    %212 = vector.broadcast %211 : vector<1x96xf32> to vector<32x96xf32>
    %213 = arith.addf %210, %212 : vector<32x96xf32>
    %214 = vector.extract_strided_slice %213 {offsets = [0, 0], sizes = [32, 32], strides = [1, 1]} : vector<32x96xf32> to vector<32x32xf32>
    %215 = vector.extract_strided_slice %213 {offsets = [0, 32], sizes = [32, 32], strides = [1, 1]} : vector<32x96xf32> to vector<32x32xf32>
    %216 = vector.extract_strided_slice %213 {offsets = [0, 64], sizes = [32, 32], strides = [1, 1]} : vector<32x96xf32> to vector<32x32xf32>
    %c1_70 = arith.constant 1 : index
    %c0_71 = arith.constant 0 : index
    %c0_72 = arith.constant 0 : index
    %217 = vector.load %arg6[%c1_70, %c0_71, %c0_72] : memref<2x32x32xbf16, #tpu.memory_space<vmem>>, vector<1x32x32xbf16>
    %218 = vector.shape_cast %217 : vector<1x32x32xbf16> to vector<32x32xbf16>
    %219 = vector.extract_strided_slice %214 {offsets = [0, 0], sizes = [32, 16], strides = [1, 1]} : vector<32x32xf32> to vector<32x16xf32>
    %220 = vector.extract_strided_slice %215 {offsets = [0, 0], sizes = [32, 16], strides = [1, 1]} : vector<32x32xf32> to vector<32x16xf32>
    %221 = arith.truncf %219 : vector<32x16xf32> to vector<32x16xbf16>
    %222 = arith.truncf %220 : vector<32x16xf32> to vector<32x16xbf16>
    %cst_73 = arith.constant dense<0.000000e+00> : vector<32x32xf32>
    %223 = tpu.matmul %221, %222, %cst_73 {dimension_numbers = #tpu.dot_dimension_numbers<[1], [1], [0], [0], [0, 0, 1, 0], [], []>} : vector<32x16xbf16>, vector<32x16xbf16>, vector<32x32xf32> -> vector<32x32xf32>
    %cst_74 = arith.constant 2.500000e-01 : f32
    %224 = vector.broadcast %cst_74 : f32 to vector<32x32xf32>
    %225 = arith.mulf %223, %224 : vector<32x32xf32>
    %cst_75 = arith.constant -1.000000e+30 : f32
    %226 = vector.broadcast %cst_75 : f32 to vector<32x32xf32>
    %227 = arith.select %33, %225, %226 : vector<32x32xi1>, vector<32x32xf32>
    %cst_76 = arith.constant dense<0xFF800000> : vector<32xf32>
    %228 = vector.multi_reduction <maximumf>, %227, %cst_76 [1] : vector<32x32xf32> to vector<32xf32>
    %229 = vector.shape_cast %228 : vector<32xf32> to vector<32x1xf32>
    %230 = vector.broadcast %229 : vector<32x1xf32> to vector<32x32xf32>
    %231 = arith.subf %227, %230 : vector<32x32xf32>
    %232 = math.exp %231 : vector<32x32xf32>
    %cst_77 = arith.constant dense<0.000000e+00> : vector<32xf32>
    %233 = vector.multi_reduction <add>, %232, %cst_77 [1] : vector<32x32xf32> to vector<32xf32>
    %234 = vector.shape_cast %233 : vector<32xf32> to vector<32x1xf32>
    %235 = tpu.reciprocal %234 {approx = true} : vector<32x1xf32> -> vector<32x1xf32>
    %236 = vector.broadcast %235 : vector<32x1xf32> to vector<32x32xf32>
    %237 = arith.mulf %232, %236 : vector<32x32xf32>
    %238 = vector.extract_strided_slice %216 {offsets = [0, 0], sizes = [32, 16], strides = [1, 1]} : vector<32x32xf32> to vector<32x16xf32>
    %239 = arith.truncf %237 : vector<32x32xf32> to vector<32x32xbf16>
    %240 = arith.truncf %238 : vector<32x16xf32> to vector<32x16xbf16>
    %cst_78 = arith.constant dense<0.000000e+00> : vector<32x16xf32>
    %241 = tpu.matmul %239, %240, %cst_78 {dimension_numbers = #tpu.dot_dimension_numbers<[1], [0], [0], [1], [0, 0, 1, 1], [], []>} : vector<32x32xbf16>, vector<32x16xbf16>, vector<32x16xf32> -> vector<32x16xf32>
    %242 = vector.extract_strided_slice %218 {offsets = [0, 0], sizes = [16, 32], strides = [1, 1]} : vector<32x32xbf16> to vector<16x32xbf16>
    %243 = arith.truncf %241 : vector<32x16xf32> to vector<32x16xbf16>
    %cst_79 = arith.constant dense<0.000000e+00> : vector<32x32xf32>
    %244 = tpu.matmul %243, %242, %cst_79 {dimension_numbers = #tpu.dot_dimension_numbers<[1], [0], [0], [1], [0, 0, 1, 1], [], []>} : vector<32x16xbf16>, vector<16x32xbf16>, vector<32x32xf32> -> vector<32x32xf32>
    %245 = vector.extract_strided_slice %214 {offsets = [0, 16], sizes = [32, 16], strides = [1, 1]} : vector<32x32xf32> to vector<32x16xf32>
    %246 = vector.extract_strided_slice %215 {offsets = [0, 16], sizes = [32, 16], strides = [1, 1]} : vector<32x32xf32> to vector<32x16xf32>
    %247 = arith.truncf %245 : vector<32x16xf32> to vector<32x16xbf16>
    %248 = arith.truncf %246 : vector<32x16xf32> to vector<32x16xbf16>
    %cst_80 = arith.constant dense<0.000000e+00> : vector<32x32xf32>
    %249 = tpu.matmul %247, %248, %cst_80 {dimension_numbers = #tpu.dot_dimension_numbers<[1], [1], [0], [0], [0, 0, 1, 0], [], []>} : vector<32x16xbf16>, vector<32x16xbf16>, vector<32x32xf32> -> vector<32x32xf32>
    %cst_81 = arith.constant 2.500000e-01 : f32
    %250 = vector.broadcast %cst_81 : f32 to vector<32x32xf32>
    %251 = arith.mulf %249, %250 : vector<32x32xf32>
    %cst_82 = arith.constant -1.000000e+30 : f32
    %252 = vector.broadcast %cst_82 : f32 to vector<32x32xf32>
    %253 = arith.select %33, %251, %252 : vector<32x32xi1>, vector<32x32xf32>
    %cst_83 = arith.constant dense<0xFF800000> : vector<32xf32>
    %254 = vector.multi_reduction <maximumf>, %253, %cst_83 [1] : vector<32x32xf32> to vector<32xf32>
    %255 = vector.shape_cast %254 : vector<32xf32> to vector<32x1xf32>
    %256 = vector.broadcast %255 : vector<32x1xf32> to vector<32x32xf32>
    %257 = arith.subf %253, %256 : vector<32x32xf32>
    %258 = math.exp %257 : vector<32x32xf32>
    %cst_84 = arith.constant dense<0.000000e+00> : vector<32xf32>
    %259 = vector.multi_reduction <add>, %258, %cst_84 [1] : vector<32x32xf32> to vector<32xf32>
    %260 = vector.shape_cast %259 : vector<32xf32> to vector<32x1xf32>
    %261 = tpu.reciprocal %260 {approx = true} : vector<32x1xf32> -> vector<32x1xf32>
    %262 = vector.broadcast %261 : vector<32x1xf32> to vector<32x32xf32>
    %263 = arith.mulf %258, %262 : vector<32x32xf32>
    %264 = vector.extract_strided_slice %216 {offsets = [0, 16], sizes = [32, 16], strides = [1, 1]} : vector<32x32xf32> to vector<32x16xf32>
    %265 = arith.truncf %263 : vector<32x32xf32> to vector<32x32xbf16>
    %266 = arith.truncf %264 : vector<32x16xf32> to vector<32x16xbf16>
    %cst_85 = arith.constant dense<0.000000e+00> : vector<32x16xf32>
    %267 = tpu.matmul %265, %266, %cst_85 {dimension_numbers = #tpu.dot_dimension_numbers<[1], [0], [0], [1], [0, 0, 1, 1], [], []>} : vector<32x32xbf16>, vector<32x16xbf16>, vector<32x16xf32> -> vector<32x16xf32>
    %268 = vector.extract_strided_slice %218 {offsets = [16, 0], sizes = [16, 32], strides = [1, 1]} : vector<32x32xbf16> to vector<16x32xbf16>
    %269 = arith.truncf %267 : vector<32x16xf32> to vector<32x16xbf16>
    %cst_86 = arith.constant dense<0.000000e+00> : vector<32x32xf32>
    %270 = tpu.matmul %269, %268, %cst_86 {dimension_numbers = #tpu.dot_dimension_numbers<[1], [0], [0], [1], [0, 0, 1, 1], [], []>} : vector<32x16xbf16>, vector<16x32xbf16>, vector<32x32xf32> -> vector<32x32xf32>
    %271 = arith.addf %244, %270 : vector<32x32xf32>
    %272 = arith.addf %180, %271 : vector<32x32xf32>
    %273 = vector.extract_strided_slice %182 {offsets = [3, 0], sizes = [1, 32], strides = [1, 1]} : vector<8x96xf32> to vector<1x32xf32>
    %274 = vector.broadcast %273 : vector<1x32xf32> to vector<32x32xf32>
    %275 = arith.addf %272, %274 : vector<32x32xf32>
    %276 = vector.extract_strided_slice %182 {offsets = [4, 0], sizes = [1, 32], strides = [1, 1]} : vector<8x96xf32> to vector<1x32xf32>
    %277 = vector.extract_strided_slice %182 {offsets = [5, 0], sizes = [1, 32], strides = [1, 1]} : vector<8x96xf32> to vector<1x32xf32>
    %cst_87 = arith.constant dense<0.000000e+00> : vector<32xf32>
    %278 = vector.multi_reduction <add>, %275, %cst_87 [1] : vector<32x32xf32> to vector<32xf32>
    %279 = vector.shape_cast %278 : vector<32xf32> to vector<32x1xf32>
    %cst_88 = arith.constant 3.200000e+01 : f32
    %280 = vector.broadcast %cst_88 : f32 to vector<32x1xf32>
    %281 = arith.divf %279, %280 : vector<32x1xf32>
    %282 = vector.broadcast %281 : vector<32x1xf32> to vector<32x32xf32>
    %283 = arith.subf %275, %282 : vector<32x32xf32>
    %284 = arith.mulf %283, %283 : vector<32x32xf32>
    %cst_89 = arith.constant dense<0.000000e+00> : vector<32xf32>
    %285 = vector.multi_reduction <add>, %284, %cst_89 [1] : vector<32x32xf32> to vector<32xf32>
    %286 = vector.shape_cast %285 : vector<32xf32> to vector<32x1xf32>
    %cst_90 = arith.constant 3.200000e+01 : f32
    %287 = vector.broadcast %cst_90 : f32 to vector<32x1xf32>
    %288 = arith.divf %286, %287 : vector<32x1xf32>
    %289 = vector.broadcast %281 : vector<32x1xf32> to vector<32x32xf32>
    %290 = arith.subf %275, %289 : vector<32x32xf32>
    %cst_91 = arith.constant 9.99999974E-6 : f32
    %291 = vector.broadcast %cst_91 : f32 to vector<32x1xf32>
    %292 = arith.addf %288, %291 : vector<32x1xf32>
    %293 = math.rsqrt %292 : vector<32x1xf32>
    %294 = vector.broadcast %293 : vector<32x1xf32> to vector<32x32xf32>
    %295 = arith.mulf %290, %294 : vector<32x32xf32>
    %296 = vector.broadcast %276 : vector<1x32xf32> to vector<32x32xf32>
    %297 = arith.mulf %295, %296 : vector<32x32xf32>
    %298 = vector.broadcast %277 : vector<1x32xf32> to vector<32x32xf32>
    %299 = arith.addf %297, %298 : vector<32x32xf32>
    %c1_92 = arith.constant 1 : index
    %c0_93 = arith.constant 0 : index
    %c0_94 = arith.constant 0 : index
    %300 = vector.load %arg7[%c1_92, %c0_93, %c0_94] : memref<2x32x64xbf16, #tpu.memory_space<vmem>>, vector<1x32x64xbf16>
    %301 = vector.shape_cast %300 : vector<1x32x64xbf16> to vector<32x64xbf16>
    %302 = arith.truncf %299 : vector<32x32xf32> to vector<32x32xbf16>
    %cst_95 = arith.constant dense<0.000000e+00> : vector<32x64xf32>
    %303 = tpu.matmul %302, %301, %cst_95 {dimension_numbers = #tpu.dot_dimension_numbers<[1], [0], [0], [1], [0, 0, 1, 1], [], []>} : vector<32x32xbf16>, vector<32x64xbf16>, vector<32x64xf32> -> vector<32x64xf32>
    %304 = vector.extract_strided_slice %182 {offsets = [6, 0], sizes = [1, 64], strides = [1, 1]} : vector<8x96xf32> to vector<1x64xf32>
    %305 = vector.broadcast %304 : vector<1x64xf32> to vector<32x64xf32>
    %306 = arith.addf %303, %305 : vector<32x64xf32>
    %307 = arith.mulf %306, %306 : vector<32x64xf32>
    %308 = arith.mulf %306, %307 : vector<32x64xf32>
    %cst_96 = arith.constant 4.471500e-02 : f32
    %309 = vector.broadcast %cst_96 : f32 to vector<32x64xf32>
    %310 = arith.mulf %309, %308 : vector<32x64xf32>
    %311 = arith.addf %306, %310 : vector<32x64xf32>
    %cst_97 = arith.constant 0.797884583 : f32
    %312 = vector.broadcast %cst_97 : f32 to vector<32x64xf32>
    %313 = arith.mulf %312, %311 : vector<32x64xf32>
    %314 = math.tanh %313 : vector<32x64xf32>
    %cst_98 = arith.constant 1.000000e+00 : f32
    %315 = vector.broadcast %cst_98 : f32 to vector<32x64xf32>
    %316 = arith.addf %315, %314 : vector<32x64xf32>
    %cst_99 = arith.constant 5.000000e-01 : f32
    %317 = vector.broadcast %cst_99 : f32 to vector<32x64xf32>
    %318 = arith.mulf %317, %316 : vector<32x64xf32>
    %319 = arith.mulf %306, %318 : vector<32x64xf32>
    %c1_100 = arith.constant 1 : index
    %c0_101 = arith.constant 0 : index
    %c0_102 = arith.constant 0 : index
    %320 = vector.load %arg8[%c1_100, %c0_101, %c0_102] : memref<2x64x32xbf16, #tpu.memory_space<vmem>>, vector<1x64x32xbf16>
    %321 = vector.shape_cast %320 : vector<1x64x32xbf16> to vector<64x32xbf16>
    %322 = arith.truncf %319 : vector<32x64xf32> to vector<32x64xbf16>
    %cst_103 = arith.constant dense<0.000000e+00> : vector<32x32xf32>
    %323 = tpu.matmul %322, %321, %cst_103 {dimension_numbers = #tpu.dot_dimension_numbers<[1], [0], [0], [1], [0, 0, 1, 1], [], []>} : vector<32x64xbf16>, vector<64x32xbf16>, vector<32x32xf32> -> vector<32x32xf32>
    %324 = arith.addf %275, %323 : vector<32x32xf32>
    %325 = vector.extract_strided_slice %182 {offsets = [7, 0], sizes = [1, 32], strides = [1, 1]} : vector<8x96xf32> to vector<1x32xf32>
    %326 = vector.broadcast %325 : vector<1x32xf32> to vector<32x32xf32>
    %327 = arith.addf %324, %326 : vector<32x32xf32>
    %328 = vector.extract_strided_slice %0 {offsets = [0, 0], sizes = [1, 32], strides = [1, 1]} : vector<21x96xf32> to vector<1x32xf32>
    %329 = vector.extract_strided_slice %0 {offsets = [1, 0], sizes = [1, 32], strides = [1, 1]} : vector<21x96xf32> to vector<1x32xf32>
    %cst_104 = arith.constant dense<0.000000e+00> : vector<32xf32>
    %330 = vector.multi_reduction <add>, %327, %cst_104 [1] : vector<32x32xf32> to vector<32xf32>
    %331 = vector.shape_cast %330 : vector<32xf32> to vector<32x1xf32>
    %cst_105 = arith.constant 3.200000e+01 : f32
    %332 = vector.broadcast %cst_105 : f32 to vector<32x1xf32>
    %333 = arith.divf %331, %332 : vector<32x1xf32>
    %334 = vector.broadcast %333 : vector<32x1xf32> to vector<32x32xf32>
    %335 = arith.subf %327, %334 : vector<32x32xf32>
    %336 = arith.mulf %335, %335 : vector<32x32xf32>
    %cst_106 = arith.constant dense<0.000000e+00> : vector<32xf32>
    %337 = vector.multi_reduction <add>, %336, %cst_106 [1] : vector<32x32xf32> to vector<32xf32>
    %338 = vector.shape_cast %337 : vector<32xf32> to vector<32x1xf32>
    %cst_107 = arith.constant 3.200000e+01 : f32
    %339 = vector.broadcast %cst_107 : f32 to vector<32x1xf32>
    %340 = arith.divf %338, %339 : vector<32x1xf32>
    %341 = vector.broadcast %333 : vector<32x1xf32> to vector<32x32xf32>
    %342 = arith.subf %327, %341 : vector<32x32xf32>
    %cst_108 = arith.constant 9.99999974E-6 : f32
    %343 = vector.broadcast %cst_108 : f32 to vector<32x1xf32>
    %344 = arith.addf %340, %343 : vector<32x1xf32>
    %345 = math.rsqrt %344 : vector<32x1xf32>
    %346 = vector.broadcast %345 : vector<32x1xf32> to vector<32x32xf32>
    %347 = arith.mulf %342, %346 : vector<32x32xf32>
    %348 = vector.broadcast %328 : vector<1x32xf32> to vector<32x32xf32>
    %349 = arith.mulf %347, %348 : vector<32x32xf32>
    %350 = vector.broadcast %329 : vector<1x32xf32> to vector<32x32xf32>
    %351 = arith.addf %349, %350 : vector<32x32xf32>
    %c0_109 = arith.constant 0 : index
    %c0_110 = arith.constant 0 : index
    %c0_111 = arith.constant 0 : index
    %352 = vector.load %arg2[%c0_109, %c0_110, %c0_111] : memref<1x8x32xf32, #tpu.memory_space<vmem>>, vector<1x8x32xf32>
    %353 = vector.shape_cast %352 : vector<1x8x32xf32> to vector<8x32xf32>
    %354 = vector.extract_strided_slice %0 {offsets = [2, 0], sizes = [4, 32], strides = [1, 1]} : vector<21x96xf32> to vector<4x32xf32>
    %355 = vector.extract_strided_slice %353 {offsets = [0, 0], sizes = [2, 32], strides = [1, 1]} : vector<8x32xf32> to vector<2x32xf32>
    %356 = tpu.concatenate %354, %355 in 0 : vector<4x32xf32>, vector<2x32xf32> -> vector<6x32xf32>
    %357 = vector.extract_strided_slice %353 {offsets = [2, 0], sizes = [2, 32], strides = [1, 1]} : vector<8x32xf32> to vector<2x32xf32>
    %358 = tpu.concatenate %354, %357 in 0 : vector<4x32xf32>, vector<2x32xf32> -> vector<6x32xf32>
    %359 = vector.extract_strided_slice %353 {offsets = [4, 0], sizes = [2, 32], strides = [1, 1]} : vector<8x32xf32> to vector<2x32xf32>
    %360 = tpu.concatenate %354, %359 in 0 : vector<4x32xf32>, vector<2x32xf32> -> vector<6x32xf32>
    %361 = vector.extract_strided_slice %353 {offsets = [6, 0], sizes = [2, 32], strides = [1, 1]} : vector<8x32xf32> to vector<2x32xf32>
    %362 = tpu.concatenate %354, %361 in 0 : vector<4x32xf32>, vector<2x32xf32> -> vector<6x32xf32>
    %363 = tpu.concatenate %356, %358, %360, %362 in 0 : vector<6x32xf32>, vector<6x32xf32>, vector<6x32xf32>, vector<6x32xf32> -> vector<24x32xf32>
    %364 = tpu.iota {dimensions = array<i32: 0>} : vector<24x24xi32>
    %365 = tpu.iota {dimensions = array<i32: 1>} : vector<24x24xi32>
    %c0_i32_112 = arith.constant 0 : i32
    %366 = vector.broadcast %c0_i32_112 : i32 to vector<24x24xi32>
    %367 = arith.cmpi sge, %364, %366 : vector<24x24xi32>
    %c6_i32 = arith.constant 6 : i32
    %368 = vector.broadcast %c6_i32 : i32 to vector<24x24xi32>
    %369 = arith.cmpi slt, %364, %368 : vector<24x24xi32>
    %370 = arith.andi %367, %369 : vector<24x24xi1>
    %c0_i32_113 = arith.constant 0 : i32
    %371 = vector.broadcast %c0_i32_113 : i32 to vector<24x24xi32>
    %372 = arith.cmpi sge, %365, %371 : vector<24x24xi32>
    %373 = arith.andi %370, %372 : vector<24x24xi1>
    %c6_i32_114 = arith.constant 6 : i32
    %374 = vector.broadcast %c6_i32_114 : i32 to vector<24x24xi32>
    %375 = arith.cmpi slt, %365, %374 : vector<24x24xi32>
    %376 = arith.andi %373, %375 : vector<24x24xi1>
    %c6_i32_115 = arith.constant 6 : i32
    %377 = vector.broadcast %c6_i32_115 : i32 to vector<24x24xi32>
    %378 = arith.cmpi sge, %364, %377 : vector<24x24xi32>
    %c12_i32 = arith.constant 12 : i32
    %379 = vector.broadcast %c12_i32 : i32 to vector<24x24xi32>
    %380 = arith.cmpi slt, %364, %379 : vector<24x24xi32>
    %381 = arith.andi %378, %380 : vector<24x24xi1>
    %c6_i32_116 = arith.constant 6 : i32
    %382 = vector.broadcast %c6_i32_116 : i32 to vector<24x24xi32>
    %383 = arith.cmpi sge, %365, %382 : vector<24x24xi32>
    %384 = arith.andi %381, %383 : vector<24x24xi1>
    %c12_i32_117 = arith.constant 12 : i32
    %385 = vector.broadcast %c12_i32_117 : i32 to vector<24x24xi32>
    %386 = arith.cmpi slt, %365, %385 : vector<24x24xi32>
    %387 = arith.andi %384, %386 : vector<24x24xi1>
    %388 = arith.ori %376, %387 : vector<24x24xi1>
    %c12_i32_118 = arith.constant 12 : i32
    %389 = vector.broadcast %c12_i32_118 : i32 to vector<24x24xi32>
    %390 = arith.cmpi sge, %364, %389 : vector<24x24xi32>
    %c18_i32 = arith.constant 18 : i32
    %391 = vector.broadcast %c18_i32 : i32 to vector<24x24xi32>
    %392 = arith.cmpi slt, %364, %391 : vector<24x24xi32>
    %393 = arith.andi %390, %392 : vector<24x24xi1>
    %c12_i32_119 = arith.constant 12 : i32
    %394 = vector.broadcast %c12_i32_119 : i32 to vector<24x24xi32>
    %395 = arith.cmpi sge, %365, %394 : vector<24x24xi32>
    %396 = arith.andi %393, %395 : vector<24x24xi1>
    %c18_i32_120 = arith.constant 18 : i32
    %397 = vector.broadcast %c18_i32_120 : i32 to vector<24x24xi32>
    %398 = arith.cmpi slt, %365, %397 : vector<24x24xi32>
    %399 = arith.andi %396, %398 : vector<24x24xi1>
    %400 = arith.ori %388, %399 : vector<24x24xi1>
    %c18_i32_121 = arith.constant 18 : i32
    %401 = vector.broadcast %c18_i32_121 : i32 to vector<24x24xi32>
    %402 = arith.cmpi sge, %364, %401 : vector<24x24xi32>
    %c24_i32 = arith.constant 24 : i32
    %403 = vector.broadcast %c24_i32 : i32 to vector<24x24xi32>
    %404 = arith.cmpi slt, %364, %403 : vector<24x24xi32>
    %405 = arith.andi %402, %404 : vector<24x24xi1>
    %c18_i32_122 = arith.constant 18 : i32
    %406 = vector.broadcast %c18_i32_122 : i32 to vector<24x24xi32>
    %407 = arith.cmpi sge, %365, %406 : vector<24x24xi32>
    %408 = arith.andi %405, %407 : vector<24x24xi1>
    %c24_i32_123 = arith.constant 24 : i32
    %409 = vector.broadcast %c24_i32_123 : i32 to vector<24x24xi32>
    %410 = arith.cmpi slt, %365, %409 : vector<24x24xi32>
    %411 = arith.andi %408, %410 : vector<24x24xi1>
    %412 = arith.ori %400, %411 : vector<24x24xi1>
    %c0_124 = arith.constant 0 : index
    %c0_125 = arith.constant 0 : index
    %413 = vector.load %arg10[%c0_124, %c0_125] : memref<32x96xbf16, #tpu.memory_space<vmem>>, vector<32x96xbf16>
    %414 = arith.truncf %363 : vector<24x32xf32> to vector<24x32xbf16>
    %cst_126 = arith.constant dense<0.000000e+00> : vector<24x96xf32>
    %415 = tpu.matmul %414, %413, %cst_126 {dimension_numbers = #tpu.dot_dimension_numbers<[1], [0], [0], [1], [0, 0, 1, 1], [], []>} : vector<24x32xbf16>, vector<32x96xbf16>, vector<24x96xf32> -> vector<24x96xf32>
    %416 = vector.extract_strided_slice %0 {offsets = [12, 0], sizes = [1, 96], strides = [1, 1]} : vector<21x96xf32> to vector<1x96xf32>
    %417 = vector.broadcast %416 : vector<1x96xf32> to vector<24x96xf32>
    %418 = arith.addf %415, %417 : vector<24x96xf32>
    %419 = vector.extract_strided_slice %418 {offsets = [0, 0], sizes = [24, 32], strides = [1, 1]} : vector<24x96xf32> to vector<24x32xf32>
    %420 = vector.extract_strided_slice %418 {offsets = [0, 32], sizes = [24, 32], strides = [1, 1]} : vector<24x96xf32> to vector<24x32xf32>
    %421 = vector.extract_strided_slice %418 {offsets = [0, 64], sizes = [24, 32], strides = [1, 1]} : vector<24x96xf32> to vector<24x32xf32>
    %c0_127 = arith.constant 0 : index
    %c0_128 = arith.constant 0 : index
    %422 = vector.load %arg11[%c0_127, %c0_128] : memref<32x32xbf16, #tpu.memory_space<vmem>>, vector<32x32xbf16>
    %423 = vector.extract_strided_slice %419 {offsets = [0, 0], sizes = [24, 16], strides = [1, 1]} : vector<24x32xf32> to vector<24x16xf32>
    %424 = vector.extract_strided_slice %420 {offsets = [0, 0], sizes = [24, 16], strides = [1, 1]} : vector<24x32xf32> to vector<24x16xf32>
    %425 = arith.truncf %423 : vector<24x16xf32> to vector<24x16xbf16>
    %426 = arith.truncf %424 : vector<24x16xf32> to vector<24x16xbf16>
    %cst_129 = arith.constant dense<0.000000e+00> : vector<24x24xf32>
    %427 = tpu.matmul %425, %426, %cst_129 {dimension_numbers = #tpu.dot_dimension_numbers<[1], [1], [0], [0], [0, 0, 1, 0], [], []>} : vector<24x16xbf16>, vector<24x16xbf16>, vector<24x24xf32> -> vector<24x24xf32>
    %cst_130 = arith.constant 2.500000e-01 : f32
    %428 = vector.broadcast %cst_130 : f32 to vector<24x24xf32>
    %429 = arith.mulf %427, %428 : vector<24x24xf32>
    %cst_131 = arith.constant -1.000000e+30 : f32
    %430 = vector.broadcast %cst_131 : f32 to vector<24x24xf32>
    %431 = arith.select %412, %429, %430 : vector<24x24xi1>, vector<24x24xf32>
    %cst_132 = arith.constant dense<0xFF800000> : vector<24xf32>
    %432 = vector.multi_reduction <maximumf>, %431, %cst_132 [1] : vector<24x24xf32> to vector<24xf32>
    %433 = vector.shape_cast %432 : vector<24xf32> to vector<24x1xf32>
    %434 = vector.broadcast %433 : vector<24x1xf32> to vector<24x24xf32>
    %435 = arith.subf %431, %434 : vector<24x24xf32>
    %436 = math.exp %435 : vector<24x24xf32>
    %cst_133 = arith.constant dense<0.000000e+00> : vector<24xf32>
    %437 = vector.multi_reduction <add>, %436, %cst_133 [1] : vector<24x24xf32> to vector<24xf32>
    %438 = vector.shape_cast %437 : vector<24xf32> to vector<24x1xf32>
    %439 = tpu.reciprocal %438 {approx = true} : vector<24x1xf32> -> vector<24x1xf32>
    %440 = vector.broadcast %439 : vector<24x1xf32> to vector<24x24xf32>
    %441 = arith.mulf %436, %440 : vector<24x24xf32>
    %442 = vector.extract_strided_slice %421 {offsets = [0, 0], sizes = [24, 16], strides = [1, 1]} : vector<24x32xf32> to vector<24x16xf32>
    %443 = arith.truncf %441 : vector<24x24xf32> to vector<24x24xbf16>
    %444 = arith.truncf %442 : vector<24x16xf32> to vector<24x16xbf16>
    %cst_134 = arith.constant dense<0.000000e+00> : vector<24x16xf32>
    %445 = tpu.matmul %443, %444, %cst_134 {dimension_numbers = #tpu.dot_dimension_numbers<[1], [0], [0], [1], [0, 0, 1, 1], [], []>} : vector<24x24xbf16>, vector<24x16xbf16>, vector<24x16xf32> -> vector<24x16xf32>
    %446 = vector.extract_strided_slice %422 {offsets = [0, 0], sizes = [16, 32], strides = [1, 1]} : vector<32x32xbf16> to vector<16x32xbf16>
    %447 = arith.truncf %445 : vector<24x16xf32> to vector<24x16xbf16>
    %cst_135 = arith.constant dense<0.000000e+00> : vector<24x32xf32>
    %448 = tpu.matmul %447, %446, %cst_135 {dimension_numbers = #tpu.dot_dimension_numbers<[1], [0], [0], [1], [0, 0, 1, 1], [], []>} : vector<24x16xbf16>, vector<16x32xbf16>, vector<24x32xf32> -> vector<24x32xf32>
    %449 = vector.extract_strided_slice %419 {offsets = [0, 16], sizes = [24, 16], strides = [1, 1]} : vector<24x32xf32> to vector<24x16xf32>
    %450 = vector.extract_strided_slice %420 {offsets = [0, 16], sizes = [24, 16], strides = [1, 1]} : vector<24x32xf32> to vector<24x16xf32>
    %451 = arith.truncf %449 : vector<24x16xf32> to vector<24x16xbf16>
    %452 = arith.truncf %450 : vector<24x16xf32> to vector<24x16xbf16>
    %cst_136 = arith.constant dense<0.000000e+00> : vector<24x24xf32>
    %453 = tpu.matmul %451, %452, %cst_136 {dimension_numbers = #tpu.dot_dimension_numbers<[1], [1], [0], [0], [0, 0, 1, 0], [], []>} : vector<24x16xbf16>, vector<24x16xbf16>, vector<24x24xf32> -> vector<24x24xf32>
    %cst_137 = arith.constant 2.500000e-01 : f32
    %454 = vector.broadcast %cst_137 : f32 to vector<24x24xf32>
    %455 = arith.mulf %453, %454 : vector<24x24xf32>
    %cst_138 = arith.constant -1.000000e+30 : f32
    %456 = vector.broadcast %cst_138 : f32 to vector<24x24xf32>
    %457 = arith.select %412, %455, %456 : vector<24x24xi1>, vector<24x24xf32>
    %cst_139 = arith.constant dense<0xFF800000> : vector<24xf32>
    %458 = vector.multi_reduction <maximumf>, %457, %cst_139 [1] : vector<24x24xf32> to vector<24xf32>
    %459 = vector.shape_cast %458 : vector<24xf32> to vector<24x1xf32>
    %460 = vector.broadcast %459 : vector<24x1xf32> to vector<24x24xf32>
    %461 = arith.subf %457, %460 : vector<24x24xf32>
    %462 = math.exp %461 : vector<24x24xf32>
    %cst_140 = arith.constant dense<0.000000e+00> : vector<24xf32>
    %463 = vector.multi_reduction <add>, %462, %cst_140 [1] : vector<24x24xf32> to vector<24xf32>
    %464 = vector.shape_cast %463 : vector<24xf32> to vector<24x1xf32>
    %465 = tpu.reciprocal %464 {approx = true} : vector<24x1xf32> -> vector<24x1xf32>
    %466 = vector.broadcast %465 : vector<24x1xf32> to vector<24x24xf32>
    %467 = arith.mulf %462, %466 : vector<24x24xf32>
    %468 = vector.extract_strided_slice %421 {offsets = [0, 16], sizes = [24, 16], strides = [1, 1]} : vector<24x32xf32> to vector<24x16xf32>
    %469 = arith.truncf %467 : vector<24x24xf32> to vector<24x24xbf16>
    %470 = arith.truncf %468 : vector<24x16xf32> to vector<24x16xbf16>
    %cst_141 = arith.constant dense<0.000000e+00> : vector<24x16xf32>
    %471 = tpu.matmul %469, %470, %cst_141 {dimension_numbers = #tpu.dot_dimension_numbers<[1], [0], [0], [1], [0, 0, 1, 1], [], []>} : vector<24x24xbf16>, vector<24x16xbf16>, vector<24x16xf32> -> vector<24x16xf32>
    %472 = vector.extract_strided_slice %422 {offsets = [16, 0], sizes = [16, 32], strides = [1, 1]} : vector<32x32xbf16> to vector<16x32xbf16>
    %473 = arith.truncf %471 : vector<24x16xf32> to vector<24x16xbf16>
    %cst_142 = arith.constant dense<0.000000e+00> : vector<24x32xf32>
    %474 = tpu.matmul %473, %472, %cst_142 {dimension_numbers = #tpu.dot_dimension_numbers<[1], [0], [0], [1], [0, 0, 1, 1], [], []>} : vector<24x16xbf16>, vector<16x32xbf16>, vector<24x32xf32> -> vector<24x32xf32>
    %475 = arith.addf %448, %474 : vector<24x32xf32>
    %476 = arith.addf %363, %475 : vector<24x32xf32>
    %477 = vector.extract_strided_slice %0 {offsets = [13, 0], sizes = [1, 32], strides = [1, 1]} : vector<21x96xf32> to vector<1x32xf32>
    %478 = vector.broadcast %477 : vector<1x32xf32> to vector<24x32xf32>
    %479 = arith.addf %476, %478 : vector<24x32xf32>
    %480 = vector.extract_strided_slice %0 {offsets = [6, 0], sizes = [1, 32], strides = [1, 1]} : vector<21x96xf32> to vector<1x32xf32>
    %481 = vector.extract_strided_slice %0 {offsets = [7, 0], sizes = [1, 32], strides = [1, 1]} : vector<21x96xf32> to vector<1x32xf32>
    %cst_143 = arith.constant dense<0.000000e+00> : vector<24xf32>
    %482 = vector.multi_reduction <add>, %479, %cst_143 [1] : vector<24x32xf32> to vector<24xf32>
    %483 = vector.shape_cast %482 : vector<24xf32> to vector<24x1xf32>
    %cst_144 = arith.constant 3.200000e+01 : f32
    %484 = vector.broadcast %cst_144 : f32 to vector<24x1xf32>
    %485 = arith.divf %483, %484 : vector<24x1xf32>
    %486 = vector.broadcast %485 : vector<24x1xf32> to vector<24x32xf32>
    %487 = arith.subf %479, %486 : vector<24x32xf32>
    %488 = arith.mulf %487, %487 : vector<24x32xf32>
    %cst_145 = arith.constant dense<0.000000e+00> : vector<24xf32>
    %489 = vector.multi_reduction <add>, %488, %cst_145 [1] : vector<24x32xf32> to vector<24xf32>
    %490 = vector.shape_cast %489 : vector<24xf32> to vector<24x1xf32>
    %cst_146 = arith.constant 3.200000e+01 : f32
    %491 = vector.broadcast %cst_146 : f32 to vector<24x1xf32>
    %492 = arith.divf %490, %491 : vector<24x1xf32>
    %493 = vector.broadcast %485 : vector<24x1xf32> to vector<24x32xf32>
    %494 = arith.subf %479, %493 : vector<24x32xf32>
    %cst_147 = arith.constant 9.99999974E-6 : f32
    %495 = vector.broadcast %cst_147 : f32 to vector<24x1xf32>
    %496 = arith.addf %492, %495 : vector<24x1xf32>
    %497 = math.rsqrt %496 : vector<24x1xf32>
    %498 = vector.broadcast %497 : vector<24x1xf32> to vector<24x32xf32>
    %499 = arith.mulf %494, %498 : vector<24x32xf32>
    %500 = vector.broadcast %480 : vector<1x32xf32> to vector<24x32xf32>
    %501 = arith.mulf %499, %500 : vector<24x32xf32>
    %502 = vector.broadcast %481 : vector<1x32xf32> to vector<24x32xf32>
    %503 = arith.addf %501, %502 : vector<24x32xf32>
    %504 = tpu.iota {dimensions = array<i32: 0>} : vector<24x32xi32>
    %505 = tpu.iota {dimensions = array<i32: 1>} : vector<24x32xi32>
    %c0_i32_148 = arith.constant 0 : i32
    %506 = vector.broadcast %c0_i32_148 : i32 to vector<24x32xi32>
    %507 = arith.cmpi sge, %504, %506 : vector<24x32xi32>
    %c12_i32_149 = arith.constant 12 : i32
    %508 = vector.broadcast %c12_i32_149 : i32 to vector<24x32xi32>
    %509 = arith.cmpi slt, %504, %508 : vector<24x32xi32>
    %510 = arith.andi %507, %509 : vector<24x32xi1>
    %c0_i32_150 = arith.constant 0 : i32
    %511 = vector.broadcast %c0_i32_150 : i32 to vector<24x32xi32>
    %512 = arith.cmpi sge, %505, %511 : vector<24x32xi32>
    %513 = arith.andi %510, %512 : vector<24x32xi1>
    %c16_i32_151 = arith.constant 16 : i32
    %514 = vector.broadcast %c16_i32_151 : i32 to vector<24x32xi32>
    %515 = arith.cmpi slt, %505, %514 : vector<24x32xi32>
    %516 = arith.andi %513, %515 : vector<24x32xi1>
    %c12_i32_152 = arith.constant 12 : i32
    %517 = vector.broadcast %c12_i32_152 : i32 to vector<24x32xi32>
    %518 = arith.cmpi sge, %504, %517 : vector<24x32xi32>
    %c24_i32_153 = arith.constant 24 : i32
    %519 = vector.broadcast %c24_i32_153 : i32 to vector<24x32xi32>
    %520 = arith.cmpi slt, %504, %519 : vector<24x32xi32>
    %521 = arith.andi %518, %520 : vector<24x32xi1>
    %c16_i32_154 = arith.constant 16 : i32
    %522 = vector.broadcast %c16_i32_154 : i32 to vector<24x32xi32>
    %523 = arith.cmpi sge, %505, %522 : vector<24x32xi32>
    %524 = arith.andi %521, %523 : vector<24x32xi1>
    %c32_i32_155 = arith.constant 32 : i32
    %525 = vector.broadcast %c32_i32_155 : i32 to vector<24x32xi32>
    %526 = arith.cmpi slt, %505, %525 : vector<24x32xi32>
    %527 = arith.andi %524, %526 : vector<24x32xi1>
    %528 = arith.ori %516, %527 : vector<24x32xi1>
    %c0_156 = arith.constant 0 : index
    %c0_157 = arith.constant 0 : index
    %529 = vector.load %arg12[%c0_156, %c0_157] : memref<32x32xbf16, #tpu.memory_space<vmem>>, vector<32x32xbf16>
    %530 = arith.truncf %503 : vector<24x32xf32> to vector<24x32xbf16>
    %cst_158 = arith.constant dense<0.000000e+00> : vector<24x32xf32>
    %531 = tpu.matmul %530, %529, %cst_158 {dimension_numbers = #tpu.dot_dimension_numbers<[1], [0], [0], [1], [0, 0, 1, 1], [], []>} : vector<24x32xbf16>, vector<32x32xbf16>, vector<24x32xf32> -> vector<24x32xf32>
    %532 = vector.extract_strided_slice %0 {offsets = [14, 0], sizes = [1, 32], strides = [1, 1]} : vector<21x96xf32> to vector<1x32xf32>
    %533 = vector.broadcast %532 : vector<1x32xf32> to vector<24x32xf32>
    %534 = arith.addf %531, %533 : vector<24x32xf32>
    %c0_159 = arith.constant 0 : index
    %c0_160 = arith.constant 0 : index
    %535 = vector.load %arg13[%c0_159, %c0_160] : memref<32x64xbf16, #tpu.memory_space<vmem>>, vector<32x64xbf16>
    %536 = arith.truncf %351 : vector<32x32xf32> to vector<32x32xbf16>
    %cst_161 = arith.constant dense<0.000000e+00> : vector<32x64xf32>
    %537 = tpu.matmul %536, %535, %cst_161 {dimension_numbers = #tpu.dot_dimension_numbers<[1], [0], [0], [1], [0, 0, 1, 1], [], []>} : vector<32x32xbf16>, vector<32x64xbf16>, vector<32x64xf32> -> vector<32x64xf32>
    %538 = vector.extract_strided_slice %0 {offsets = [15, 0], sizes = [1, 64], strides = [1, 1]} : vector<21x96xf32> to vector<1x64xf32>
    %539 = vector.broadcast %538 : vector<1x64xf32> to vector<32x64xf32>
    %540 = arith.addf %537, %539 : vector<32x64xf32>
    %541 = vector.extract_strided_slice %540 {offsets = [0, 0], sizes = [32, 32], strides = [1, 1]} : vector<32x64xf32> to vector<32x32xf32>
    %542 = vector.extract_strided_slice %540 {offsets = [0, 32], sizes = [32, 32], strides = [1, 1]} : vector<32x64xf32> to vector<32x32xf32>
    %c0_162 = arith.constant 0 : index
    %c0_163 = arith.constant 0 : index
    %543 = vector.load %arg14[%c0_162, %c0_163] : memref<32x32xbf16, #tpu.memory_space<vmem>>, vector<32x32xbf16>
    %544 = vector.extract_strided_slice %534 {offsets = [0, 0], sizes = [24, 16], strides = [1, 1]} : vector<24x32xf32> to vector<24x16xf32>
    %545 = vector.extract_strided_slice %541 {offsets = [0, 0], sizes = [32, 16], strides = [1, 1]} : vector<32x32xf32> to vector<32x16xf32>
    %546 = arith.truncf %544 : vector<24x16xf32> to vector<24x16xbf16>
    %547 = arith.truncf %545 : vector<32x16xf32> to vector<32x16xbf16>
    %cst_164 = arith.constant dense<0.000000e+00> : vector<24x32xf32>
    %548 = tpu.matmul %546, %547, %cst_164 {dimension_numbers = #tpu.dot_dimension_numbers<[1], [1], [0], [0], [0, 0, 1, 0], [], []>} : vector<24x16xbf16>, vector<32x16xbf16>, vector<24x32xf32> -> vector<24x32xf32>
    %cst_165 = arith.constant 2.500000e-01 : f32
    %549 = vector.broadcast %cst_165 : f32 to vector<24x32xf32>
    %550 = arith.mulf %548, %549 : vector<24x32xf32>
    %cst_166 = arith.constant -1.000000e+30 : f32
    %551 = vector.broadcast %cst_166 : f32 to vector<24x32xf32>
    %552 = arith.select %528, %550, %551 : vector<24x32xi1>, vector<24x32xf32>
    %cst_167 = arith.constant dense<0xFF800000> : vector<24xf32>
    %553 = vector.multi_reduction <maximumf>, %552, %cst_167 [1] : vector<24x32xf32> to vector<24xf32>
    %554 = vector.shape_cast %553 : vector<24xf32> to vector<24x1xf32>
    %555 = vector.broadcast %554 : vector<24x1xf32> to vector<24x32xf32>
    %556 = arith.subf %552, %555 : vector<24x32xf32>
    %557 = math.exp %556 : vector<24x32xf32>
    %cst_168 = arith.constant dense<0.000000e+00> : vector<24xf32>
    %558 = vector.multi_reduction <add>, %557, %cst_168 [1] : vector<24x32xf32> to vector<24xf32>
    %559 = vector.shape_cast %558 : vector<24xf32> to vector<24x1xf32>
    %560 = tpu.reciprocal %559 {approx = true} : vector<24x1xf32> -> vector<24x1xf32>
    %561 = vector.broadcast %560 : vector<24x1xf32> to vector<24x32xf32>
    %562 = arith.mulf %557, %561 : vector<24x32xf32>
    %563 = vector.extract_strided_slice %542 {offsets = [0, 0], sizes = [32, 16], strides = [1, 1]} : vector<32x32xf32> to vector<32x16xf32>
    %564 = arith.truncf %562 : vector<24x32xf32> to vector<24x32xbf16>
    %565 = arith.truncf %563 : vector<32x16xf32> to vector<32x16xbf16>
    %cst_169 = arith.constant dense<0.000000e+00> : vector<24x16xf32>
    %566 = tpu.matmul %564, %565, %cst_169 {dimension_numbers = #tpu.dot_dimension_numbers<[1], [0], [0], [1], [0, 0, 1, 1], [], []>} : vector<24x32xbf16>, vector<32x16xbf16>, vector<24x16xf32> -> vector<24x16xf32>
    %567 = vector.extract_strided_slice %543 {offsets = [0, 0], sizes = [16, 32], strides = [1, 1]} : vector<32x32xbf16> to vector<16x32xbf16>
    %568 = arith.truncf %566 : vector<24x16xf32> to vector<24x16xbf16>
    %cst_170 = arith.constant dense<0.000000e+00> : vector<24x32xf32>
    %569 = tpu.matmul %568, %567, %cst_170 {dimension_numbers = #tpu.dot_dimension_numbers<[1], [0], [0], [1], [0, 0, 1, 1], [], []>} : vector<24x16xbf16>, vector<16x32xbf16>, vector<24x32xf32> -> vector<24x32xf32>
    %570 = vector.extract_strided_slice %534 {offsets = [0, 16], sizes = [24, 16], strides = [1, 1]} : vector<24x32xf32> to vector<24x16xf32>
    %571 = vector.extract_strided_slice %541 {offsets = [0, 16], sizes = [32, 16], strides = [1, 1]} : vector<32x32xf32> to vector<32x16xf32>
    %572 = arith.truncf %570 : vector<24x16xf32> to vector<24x16xbf16>
    %573 = arith.truncf %571 : vector<32x16xf32> to vector<32x16xbf16>
    %cst_171 = arith.constant dense<0.000000e+00> : vector<24x32xf32>
    %574 = tpu.matmul %572, %573, %cst_171 {dimension_numbers = #tpu.dot_dimension_numbers<[1], [1], [0], [0], [0, 0, 1, 0], [], []>} : vector<24x16xbf16>, vector<32x16xbf16>, vector<24x32xf32> -> vector<24x32xf32>
    %cst_172 = arith.constant 2.500000e-01 : f32
    %575 = vector.broadcast %cst_172 : f32 to vector<24x32xf32>
    %576 = arith.mulf %574, %575 : vector<24x32xf32>
    %cst_173 = arith.constant -1.000000e+30 : f32
    %577 = vector.broadcast %cst_173 : f32 to vector<24x32xf32>
    %578 = arith.select %528, %576, %577 : vector<24x32xi1>, vector<24x32xf32>
    %cst_174 = arith.constant dense<0xFF800000> : vector<24xf32>
    %579 = vector.multi_reduction <maximumf>, %578, %cst_174 [1] : vector<24x32xf32> to vector<24xf32>
    %580 = vector.shape_cast %579 : vector<24xf32> to vector<24x1xf32>
    %581 = vector.broadcast %580 : vector<24x1xf32> to vector<24x32xf32>
    %582 = arith.subf %578, %581 : vector<24x32xf32>
    %583 = math.exp %582 : vector<24x32xf32>
    %cst_175 = arith.constant dense<0.000000e+00> : vector<24xf32>
    %584 = vector.multi_reduction <add>, %583, %cst_175 [1] : vector<24x32xf32> to vector<24xf32>
    %585 = vector.shape_cast %584 : vector<24xf32> to vector<24x1xf32>
    %586 = tpu.reciprocal %585 {approx = true} : vector<24x1xf32> -> vector<24x1xf32>
    %587 = vector.broadcast %586 : vector<24x1xf32> to vector<24x32xf32>
    %588 = arith.mulf %583, %587 : vector<24x32xf32>
    %589 = vector.extract_strided_slice %542 {offsets = [0, 16], sizes = [32, 16], strides = [1, 1]} : vector<32x32xf32> to vector<32x16xf32>
    %590 = arith.truncf %588 : vector<24x32xf32> to vector<24x32xbf16>
    %591 = arith.truncf %589 : vector<32x16xf32> to vector<32x16xbf16>
    %cst_176 = arith.constant dense<0.000000e+00> : vector<24x16xf32>
    %592 = tpu.matmul %590, %591, %cst_176 {dimension_numbers = #tpu.dot_dimension_numbers<[1], [0], [0], [1], [0, 0, 1, 1], [], []>} : vector<24x32xbf16>, vector<32x16xbf16>, vector<24x16xf32> -> vector<24x16xf32>
    %593 = vector.extract_strided_slice %543 {offsets = [16, 0], sizes = [16, 32], strides = [1, 1]} : vector<32x32xbf16> to vector<16x32xbf16>
    %594 = arith.truncf %592 : vector<24x16xf32> to vector<24x16xbf16>
    %cst_177 = arith.constant dense<0.000000e+00> : vector<24x32xf32>
    %595 = tpu.matmul %594, %593, %cst_177 {dimension_numbers = #tpu.dot_dimension_numbers<[1], [0], [0], [1], [0, 0, 1, 1], [], []>} : vector<24x16xbf16>, vector<16x32xbf16>, vector<24x32xf32> -> vector<24x32xf32>
    %596 = arith.addf %569, %595 : vector<24x32xf32>
    %597 = arith.addf %503, %596 : vector<24x32xf32>
    %598 = vector.extract_strided_slice %0 {offsets = [16, 0], sizes = [1, 32], strides = [1, 1]} : vector<21x96xf32> to vector<1x32xf32>
    %599 = vector.broadcast %598 : vector<1x32xf32> to vector<24x32xf32>
    %600 = arith.addf %597, %599 : vector<24x32xf32>
    %601 = vector.extract_strided_slice %0 {offsets = [8, 0], sizes = [1, 32], strides = [1, 1]} : vector<21x96xf32> to vector<1x32xf32>
    %602 = vector.extract_strided_slice %0 {offsets = [9, 0], sizes = [1, 32], strides = [1, 1]} : vector<21x96xf32> to vector<1x32xf32>
    %cst_178 = arith.constant dense<0.000000e+00> : vector<24xf32>
    %603 = vector.multi_reduction <add>, %600, %cst_178 [1] : vector<24x32xf32> to vector<24xf32>
    %604 = vector.shape_cast %603 : vector<24xf32> to vector<24x1xf32>
    %cst_179 = arith.constant 3.200000e+01 : f32
    %605 = vector.broadcast %cst_179 : f32 to vector<24x1xf32>
    %606 = arith.divf %604, %605 : vector<24x1xf32>
    %607 = vector.broadcast %606 : vector<24x1xf32> to vector<24x32xf32>
    %608 = arith.subf %600, %607 : vector<24x32xf32>
    %609 = arith.mulf %608, %608 : vector<24x32xf32>
    %cst_180 = arith.constant dense<0.000000e+00> : vector<24xf32>
    %610 = vector.multi_reduction <add>, %609, %cst_180 [1] : vector<24x32xf32> to vector<24xf32>
    %611 = vector.shape_cast %610 : vector<24xf32> to vector<24x1xf32>
    %cst_181 = arith.constant 3.200000e+01 : f32
    %612 = vector.broadcast %cst_181 : f32 to vector<24x1xf32>
    %613 = arith.divf %611, %612 : vector<24x1xf32>
    %614 = vector.broadcast %606 : vector<24x1xf32> to vector<24x32xf32>
    %615 = arith.subf %600, %614 : vector<24x32xf32>
    %cst_182 = arith.constant 9.99999974E-6 : f32
    %616 = vector.broadcast %cst_182 : f32 to vector<24x1xf32>
    %617 = arith.addf %613, %616 : vector<24x1xf32>
    %618 = math.rsqrt %617 : vector<24x1xf32>
    %619 = vector.broadcast %618 : vector<24x1xf32> to vector<24x32xf32>
    %620 = arith.mulf %615, %619 : vector<24x32xf32>
    %621 = vector.broadcast %601 : vector<1x32xf32> to vector<24x32xf32>
    %622 = arith.mulf %620, %621 : vector<24x32xf32>
    %623 = vector.broadcast %602 : vector<1x32xf32> to vector<24x32xf32>
    %624 = arith.addf %622, %623 : vector<24x32xf32>
    %c0_183 = arith.constant 0 : index
    %c0_184 = arith.constant 0 : index
    %625 = vector.load %arg15[%c0_183, %c0_184] : memref<32x64xbf16, #tpu.memory_space<vmem>>, vector<32x64xbf16>
    %626 = arith.truncf %624 : vector<24x32xf32> to vector<24x32xbf16>
    %cst_185 = arith.constant dense<0.000000e+00> : vector<24x64xf32>
    %627 = tpu.matmul %626, %625, %cst_185 {dimension_numbers = #tpu.dot_dimension_numbers<[1], [0], [0], [1], [0, 0, 1, 1], [], []>} : vector<24x32xbf16>, vector<32x64xbf16>, vector<24x64xf32> -> vector<24x64xf32>
    %628 = vector.extract_strided_slice %0 {offsets = [17, 0], sizes = [1, 64], strides = [1, 1]} : vector<21x96xf32> to vector<1x64xf32>
    %629 = vector.broadcast %628 : vector<1x64xf32> to vector<24x64xf32>
    %630 = arith.addf %627, %629 : vector<24x64xf32>
    %631 = arith.mulf %630, %630 : vector<24x64xf32>
    %632 = arith.mulf %630, %631 : vector<24x64xf32>
    %cst_186 = arith.constant 4.471500e-02 : f32
    %633 = vector.broadcast %cst_186 : f32 to vector<24x64xf32>
    %634 = arith.mulf %633, %632 : vector<24x64xf32>
    %635 = arith.addf %630, %634 : vector<24x64xf32>
    %cst_187 = arith.constant 0.797884583 : f32
    %636 = vector.broadcast %cst_187 : f32 to vector<24x64xf32>
    %637 = arith.mulf %636, %635 : vector<24x64xf32>
    %638 = math.tanh %637 : vector<24x64xf32>
    %cst_188 = arith.constant 1.000000e+00 : f32
    %639 = vector.broadcast %cst_188 : f32 to vector<24x64xf32>
    %640 = arith.addf %639, %638 : vector<24x64xf32>
    %cst_189 = arith.constant 5.000000e-01 : f32
    %641 = vector.broadcast %cst_189 : f32 to vector<24x64xf32>
    %642 = arith.mulf %641, %640 : vector<24x64xf32>
    %643 = arith.mulf %630, %642 : vector<24x64xf32>
    %c0_190 = arith.constant 0 : index
    %c0_191 = arith.constant 0 : index
    %644 = vector.load %arg16[%c0_190, %c0_191] : memref<64x32xbf16, #tpu.memory_space<vmem>>, vector<64x32xbf16>
    %645 = arith.truncf %643 : vector<24x64xf32> to vector<24x64xbf16>
    %cst_192 = arith.constant dense<0.000000e+00> : vector<24x32xf32>
    %646 = tpu.matmul %645, %644, %cst_192 {dimension_numbers = #tpu.dot_dimension_numbers<[1], [0], [0], [1], [0, 0, 1, 1], [], []>} : vector<24x64xbf16>, vector<64x32xbf16>, vector<24x32xf32> -> vector<24x32xf32>
    %647 = arith.addf %624, %646 : vector<24x32xf32>
    %648 = vector.extract_strided_slice %0 {offsets = [18, 0], sizes = [1, 32], strides = [1, 1]} : vector<21x96xf32> to vector<1x32xf32>
    %649 = vector.broadcast %648 : vector<1x32xf32> to vector<24x32xf32>
    %650 = arith.addf %647, %649 : vector<24x32xf32>
    %651 = vector.extract_strided_slice %0 {offsets = [10, 0], sizes = [1, 32], strides = [1, 1]} : vector<21x96xf32> to vector<1x32xf32>
    %652 = vector.extract_strided_slice %0 {offsets = [11, 0], sizes = [1, 32], strides = [1, 1]} : vector<21x96xf32> to vector<1x32xf32>
    %cst_193 = arith.constant dense<0.000000e+00> : vector<24xf32>
    %653 = vector.multi_reduction <add>, %650, %cst_193 [1] : vector<24x32xf32> to vector<24xf32>
    %654 = vector.shape_cast %653 : vector<24xf32> to vector<24x1xf32>
    %cst_194 = arith.constant 3.200000e+01 : f32
    %655 = vector.broadcast %cst_194 : f32 to vector<24x1xf32>
    %656 = arith.divf %654, %655 : vector<24x1xf32>
    %657 = vector.broadcast %656 : vector<24x1xf32> to vector<24x32xf32>
    %658 = arith.subf %650, %657 : vector<24x32xf32>
    %659 = arith.mulf %658, %658 : vector<24x32xf32>
    %cst_195 = arith.constant dense<0.000000e+00> : vector<24xf32>
    %660 = vector.multi_reduction <add>, %659, %cst_195 [1] : vector<24x32xf32> to vector<24xf32>
    %661 = vector.shape_cast %660 : vector<24xf32> to vector<24x1xf32>
    %cst_196 = arith.constant 3.200000e+01 : f32
    %662 = vector.broadcast %cst_196 : f32 to vector<24x1xf32>
    %663 = arith.divf %661, %662 : vector<24x1xf32>
    %664 = vector.broadcast %656 : vector<24x1xf32> to vector<24x32xf32>
    %665 = arith.subf %650, %664 : vector<24x32xf32>
    %cst_197 = arith.constant 9.99999974E-6 : f32
    %666 = vector.broadcast %cst_197 : f32 to vector<24x1xf32>
    %667 = arith.addf %663, %666 : vector<24x1xf32>
    %668 = math.rsqrt %667 : vector<24x1xf32>
    %669 = vector.broadcast %668 : vector<24x1xf32> to vector<24x32xf32>
    %670 = arith.mulf %665, %669 : vector<24x32xf32>
    %671 = vector.broadcast %651 : vector<1x32xf32> to vector<24x32xf32>
    %672 = arith.mulf %670, %671 : vector<24x32xf32>
    %673 = vector.broadcast %652 : vector<1x32xf32> to vector<24x32xf32>
    %674 = arith.addf %672, %673 : vector<24x32xf32>
    %c0_198 = arith.constant 0 : index
    %c0_199 = arith.constant 0 : index
    %675 = vector.load %arg17[%c0_198, %c0_199] : memref<32x32xbf16, #tpu.memory_space<vmem>>, vector<32x32xbf16>
    %676 = arith.truncf %674 : vector<24x32xf32> to vector<24x32xbf16>
    %cst_200 = arith.constant dense<0.000000e+00> : vector<24x32xf32>
    %677 = tpu.matmul %676, %675, %cst_200 {dimension_numbers = #tpu.dot_dimension_numbers<[1], [0], [0], [1], [0, 0, 1, 1], [], []>} : vector<24x32xbf16>, vector<32x32xbf16>, vector<24x32xf32> -> vector<24x32xf32>
    %678 = vector.extract_strided_slice %0 {offsets = [19, 0], sizes = [1, 32], strides = [1, 1]} : vector<21x96xf32> to vector<1x32xf32>
    %679 = vector.broadcast %678 : vector<1x32xf32> to vector<24x32xf32>
    %680 = arith.addf %677, %679 : vector<24x32xf32>
    %681 = arith.mulf %680, %680 : vector<24x32xf32>
    %682 = arith.mulf %680, %681 : vector<24x32xf32>
    %cst_201 = arith.constant 4.471500e-02 : f32
    %683 = vector.broadcast %cst_201 : f32 to vector<24x32xf32>
    %684 = arith.mulf %683, %682 : vector<24x32xf32>
    %685 = arith.addf %680, %684 : vector<24x32xf32>
    %cst_202 = arith.constant 0.797884583 : f32
    %686 = vector.broadcast %cst_202 : f32 to vector<24x32xf32>
    %687 = arith.mulf %686, %685 : vector<24x32xf32>
    %688 = math.tanh %687 : vector<24x32xf32>
    %cst_203 = arith.constant 1.000000e+00 : f32
    %689 = vector.broadcast %cst_203 : f32 to vector<24x32xf32>
    %690 = arith.addf %689, %688 : vector<24x32xf32>
    %cst_204 = arith.constant 5.000000e-01 : f32
    %691 = vector.broadcast %cst_204 : f32 to vector<24x32xf32>
    %692 = arith.mulf %691, %690 : vector<24x32xf32>
    %693 = arith.mulf %680, %692 : vector<24x32xf32>
    %c0_205 = arith.constant 0 : index
    %c0_206 = arith.constant 0 : index
    %694 = vector.load %arg18[%c0_205, %c0_206] : memref<32x32xbf16, #tpu.memory_space<vmem>>, vector<32x32xbf16>
    %695 = arith.truncf %693 : vector<24x32xf32> to vector<24x32xbf16>
    %cst_207 = arith.constant dense<0.000000e+00> : vector<24x32xf32>
    %696 = tpu.matmul %695, %694, %cst_207 {dimension_numbers = #tpu.dot_dimension_numbers<[1], [0], [0], [1], [0, 0, 1, 1], [], []>} : vector<24x32xbf16>, vector<32x32xbf16>, vector<24x32xf32> -> vector<24x32xf32>
    %697 = vector.extract_strided_slice %0 {offsets = [20, 0], sizes = [1, 32], strides = [1, 1]} : vector<21x96xf32> to vector<1x32xf32>
    %698 = vector.broadcast %697 : vector<1x32xf32> to vector<24x32xf32>
    %699 = arith.addf %696, %698 : vector<24x32xf32>
    %700 = arith.truncf %699 : vector<24x32xf32> to vector<24x32xbf16>
    %701 = arith.truncf %351 : vector<32x32xf32> to vector<32x32xbf16>
    %cst_208 = arith.constant dense<0.000000e+00> : vector<24x32xf32>
    %702 = tpu.matmul %700, %701, %cst_208 {dimension_numbers = #tpu.dot_dimension_numbers<[1], [1], [0], [0], [0, 0, 1, 0], [], []>} : vector<24x32xbf16>, vector<32x32xbf16>, vector<24x32xf32> -> vector<24x32xf32>
    %703 = vector.extract_strided_slice %702 {offsets = [1, 0], sizes = [1, 16], strides = [1, 1]} : vector<24x32xf32> to vector<1x16xf32>
    %704 = vector.extract_strided_slice %702 {offsets = [2, 0], sizes = [1, 16], strides = [1, 1]} : vector<24x32xf32> to vector<1x16xf32>
    %705 = vector.extract_strided_slice %702 {offsets = [3, 0], sizes = [1, 16], strides = [1, 1]} : vector<24x32xf32> to vector<1x16xf32>
    %706 = tpu.concatenate %703, %704, %705 in 1 : vector<1x16xf32>, vector<1x16xf32>, vector<1x16xf32> -> vector<1x48xf32>
    %707 = vector.extract_strided_slice %702 {offsets = [7, 0], sizes = [1, 16], strides = [1, 1]} : vector<24x32xf32> to vector<1x16xf32>
    %708 = vector.extract_strided_slice %702 {offsets = [8, 0], sizes = [1, 16], strides = [1, 1]} : vector<24x32xf32> to vector<1x16xf32>
    %709 = vector.extract_strided_slice %702 {offsets = [9, 0], sizes = [1, 16], strides = [1, 1]} : vector<24x32xf32> to vector<1x16xf32>
    %710 = tpu.concatenate %707, %708, %709 in 1 : vector<1x16xf32>, vector<1x16xf32>, vector<1x16xf32> -> vector<1x48xf32>
    %711 = vector.extract_strided_slice %702 {offsets = [13, 16], sizes = [1, 16], strides = [1, 1]} : vector<24x32xf32> to vector<1x16xf32>
    %712 = vector.extract_strided_slice %702 {offsets = [14, 16], sizes = [1, 16], strides = [1, 1]} : vector<24x32xf32> to vector<1x16xf32>
    %713 = vector.extract_strided_slice %702 {offsets = [15, 16], sizes = [1, 16], strides = [1, 1]} : vector<24x32xf32> to vector<1x16xf32>
    %714 = tpu.concatenate %711, %712, %713 in 1 : vector<1x16xf32>, vector<1x16xf32>, vector<1x16xf32> -> vector<1x48xf32>
    %715 = vector.extract_strided_slice %702 {offsets = [19, 16], sizes = [1, 16], strides = [1, 1]} : vector<24x32xf32> to vector<1x16xf32>
    %716 = vector.extract_strided_slice %702 {offsets = [20, 16], sizes = [1, 16], strides = [1, 1]} : vector<24x32xf32> to vector<1x16xf32>
    %717 = vector.extract_strided_slice %702 {offsets = [21, 16], sizes = [1, 16], strides = [1, 1]} : vector<24x32xf32> to vector<1x16xf32>
    %718 = tpu.concatenate %715, %716, %717 in 1 : vector<1x16xf32>, vector<1x16xf32>, vector<1x16xf32> -> vector<1x48xf32>
    %719 = tpu.concatenate %706, %710, %714, %718 in 0 : vector<1x48xf32>, vector<1x48xf32>, vector<1x48xf32>, vector<1x48xf32> -> vector<4x48xf32>
    %c0_209 = arith.constant 0 : index
    %c0_210 = arith.constant 0 : index
    %c0_211 = arith.constant 0 : index
    %720 = vector.load %arg20[%c0_209, %c0_210, %c0_211] : memref<1x4x48xf32, #tpu.memory_space<vmem>>, vector<1x4x48xf32>
    %721 = vector.shape_cast %720 : vector<1x4x48xf32> to vector<4x48xf32>
    %722 = vector.shape_cast %719 : vector<4x48xf32> to vector<1x4x48xf32>
    tpu.vector_store %arg20[%c0_209, %c0_210, %c0_211], %722 {strides = array<i32>} : memref<1x4x48xf32, #tpu.memory_space<vmem>>, vector<1x4x48xf32>,
    return
  }
  func.func @transform_0(%arg0: i32) -> (i32, i32, i32) {
    %c0_i32 = arith.constant 0 : i32
    %c0_i32_0 = arith.constant 0 : i32
    %c0_i32_1 = arith.constant 0 : i32
    return %arg0, %c0_i32, %c0_i32_0 : i32, i32, i32
  }
  func.func @transform_1(%arg0: i32) -> (i32, i32, i32) {
    %c0_i32 = arith.constant 0 : i32
    %c0_i32_0 = arith.constant 0 : i32
    %c0_i32_1 = arith.constant 0 : i32
    return %arg0, %c0_i32, %c0_i32_0 : i32, i32, i32
  }
  func.func @transform_2(%arg0: i32) -> (i32, i32) {
    %c0_i32 = arith.constant 0 : i32
    %c0_i32_0 = arith.constant 0 : i32
    %c0_i32_1 = arith.constant 0 : i32
    return %c0_i32, %c0_i32_0 : i32, i32
  }
  func.func @transform_3(%arg0: i32) -> (i32, i32) {
    %c0_i32 = arith.constant 0 : i32
    %c0_i32_0 = arith.constant 0 : i32
    %c0_i32_1 = arith.constant 0 : i32
    return %c0_i32, %c0_i32_0 : i32, i32
  }
  func.func @transform_4(%arg0: i32) -> (i32, i32, i32) {
    %c0_i32 = arith.constant 0 : i32
    %c0_i32_0 = arith.constant 0 : i32
    %c0_i32_1 = arith.constant 0 : i32
    %c0_i32_2 = arith.constant 0 : i32
    return %c0_i32, %c0_i32_0, %c0_i32_1 : i32, i32, i32
  }
  func.func @transform_5(%arg0: i32) -> (i32, i32, i32) {
    %c0_i32 = arith.constant 0 : i32
    %c0_i32_0 = arith.constant 0 : i32
    %c0_i32_1 = arith.constant 0 : i32
    %c0_i32_2 = arith.constant 0 : i32
    return %c0_i32, %c0_i32_0, %c0_i32_1 : i32, i32, i32
  }
  func.func @transform_6(%arg0: i32) -> (i32, i32, i32) {
    %c0_i32 = arith.constant 0 : i32
    %c0_i32_0 = arith.constant 0 : i32
    %c0_i32_1 = arith.constant 0 : i32
    %c0_i32_2 = arith.constant 0 : i32
    return %c0_i32, %c0_i32_0, %c0_i32_1 : i32, i32, i32
  }
  func.func @transform_7(%arg0: i32) -> (i32, i32, i32) {
    %c0_i32 = arith.constant 0 : i32
    %c0_i32_0 = arith.constant 0 : i32
    %c0_i32_1 = arith.constant 0 : i32
    %c0_i32_2 = arith.constant 0 : i32
    return %c0_i32, %c0_i32_0, %c0_i32_1 : i32, i32, i32
  }
  func.func @transform_8(%arg0: i32) -> (i32, i32, i32) {
    %c0_i32 = arith.constant 0 : i32
    %c0_i32_0 = arith.constant 0 : i32
    %c0_i32_1 = arith.constant 0 : i32
    %c0_i32_2 = arith.constant 0 : i32
    return %c0_i32, %c0_i32_0, %c0_i32_1 : i32, i32, i32
  }
  func.func @transform_9(%arg0: i32) -> (i32, i32) {
    %c0_i32 = arith.constant 0 : i32
    %c0_i32_0 = arith.constant 0 : i32
    %c0_i32_1 = arith.constant 0 : i32
    return %c0_i32, %c0_i32_0 : i32, i32
  }
  func.func @transform_10(%arg0: i32) -> (i32, i32) {
    %c0_i32 = arith.constant 0 : i32
    %c0_i32_0 = arith.constant 0 : i32
    %c0_i32_1 = arith.constant 0 : i32
    return %c0_i32, %c0_i32_0 : i32, i32
  }
  func.func @transform_11(%arg0: i32) -> (i32, i32) {
    %c0_i32 = arith.constant 0 : i32
    %c0_i32_0 = arith.constant 0 : i32
    %c0_i32_1 = arith.constant 0 : i32
    return %c0_i32, %c0_i32_0 : i32, i32
  }
  func.func @transform_12(%arg0: i32) -> (i32, i32) {
    %c0_i32 = arith.constant 0 : i32
    %c0_i32_0 = arith.constant 0 : i32
    %c0_i32_1 = arith.constant 0 : i32
    return %c0_i32, %c0_i32_0 : i32, i32
  }
  func.func @transform_13(%arg0: i32) -> (i32, i32) {
    %c0_i32 = arith.constant 0 : i32
    %c0_i32_0 = arith.constant 0 : i32
    %c0_i32_1 = arith.constant 0 : i32
    return %c0_i32, %c0_i32_0 : i32, i32
  }
  func.func @transform_14(%arg0: i32) -> (i32, i32) {
    %c0_i32 = arith.constant 0 : i32
    %c0_i32_0 = arith.constant 0 : i32
    %c0_i32_1 = arith.constant 0 : i32
    return %c0_i32, %c0_i32_0 : i32, i32
  }
  func.func @transform_15(%arg0: i32) -> (i32, i32) {
    %c0_i32 = arith.constant 0 : i32
    %c0_i32_0 = arith.constant 0 : i32
    %c0_i32_1 = arith.constant 0 : i32
    return %c0_i32, %c0_i32_0 : i32, i32
  }
  func.func @transform_16(%arg0: i32) -> (i32, i32) {
    %c0_i32 = arith.constant 0 : i32
    %c0_i32_0 = arith.constant 0 : i32
    %c0_i32_1 = arith.constant 0 : i32
    return %c0_i32, %c0_i32_0 : i32, i32
  }
  func.func @transform_17(%arg0: i32) -> (i32, i32) {
    %c0_i32 = arith.constant 0 : i32
    %c0_i32_0 = arith.constant 0 : i32
    %c0_i32_1 = arith.constant 0 : i32
    return %c0_i32, %c0_i32_0 : i32, i32
  }
  func.func @transform_18(%arg0: i32) -> (i32, i32) {
    %c0_i32 = arith.constant 0 : i32
    %c0_i32_0 = arith.constant 0 : i32
    %c0_i32_1 = arith.constant 0 : i32
    return %c0_i32, %c0_i32_0 : i32, i32
  }
  func.func @transform_19(%arg0: i32) -> (i32, i32, i32) {
    %c0_i32 = arith.constant 0 : i32
    %c0_i32_0 = arith.constant 0 : i32
    %c0_i32_1 = arith.constant 0 : i32
    return %arg0, %c0_i32, %c0_i32_0 : i32, i32, i32
  }
}

</mosaic_0001>

<bundles_post_ra>
// kernel: efficient_sam_forward.1
= control target key start
LH: loop header
LB: loop body
LE: loop exit
PB: predicated region body
PF: predicated region fallthrough
CT: control target
= control target key end

     0   :  { %s6941_s0 = inlined_call_operand.vmem [shape: f32[2,32,192], index: 0, kind: input, shape index: {}]   ;;  %s6942_s1 = inlined_call_operand.vmem [shape: f32[2,8,32], index: 1, kind: input, shape index: {}]   ;;  %s6943_s2 = inlined_call_operand.vmem [shape: bf16[192,32], index: 2, kind: input, shape index: {}]   ;;  %s6944_s3 = inlined_call_operand.vmem [shape: f32[16,32], index: 3, kind: input, shape index: {}]   ;;  %s6945_s4 = inlined_call_operand.vmem [shape: bf16[2,32,96], index: 4, kind: input, shape index: {}]   ;;  %s6946_s5 = inlined_call_operand.vmem [shape: bf16[2,32,32], index: 5, kind: input, shape index: {}]   ;;  %s6947_s6 = inlined_call_operand.vmem [shape: bf16[2,32,64], index: 6, kind: input, shape index: {}]   ;;  %s6948_s7 = inlined_call_operand.vmem [shape: bf16[2,64,32], index: 7, kind: input, shape index: {}]   ;;  %s6949_s8 = inlined_call_operand.vmem [shape: f32[2,8,96], index: 8, kind: input, shape index: {}]   ;;  %s6950_s9 = inlined_call_operand.vmem [shape: bf16[32,96], index: 9, kind: input, shape index: {}]   ;;  %s6951_s10 = inlined_call_operand.vmem [shape: bf16[32,32], index: 10, kind: input, shape index: {}]   ;;  %s6952_s11 = inlined_call_operand.vmem [shape: bf16[32,32], index: 11, kind: input, shape index: {}]   ;;  %s6953_s12 = inlined_call_operand.vmem [shape: bf16[32,64], index: 12, kind: input, shape index: {}]   ;;  %s6954_s13 = inlined_call_operand.vmem [shape: bf16[32,32], index: 13, kind: input, shape index: {}]   ;;  %s6955_s14 = inlined_call_operand.vmem [shape: bf16[32,64], index: 14, kind: input, shape index: {}]   ;;  %s6956_s15 = inlined_call_operand.vmem [shape: bf16[64,32], index: 15, kind: input, shape index: {}]   ;;  %s6957_s16 = inlined_call_operand.vmem [shape: bf16[32,32], index: 16, kind: input, shape index: {}]   ;;  %s6958_s17 = inlined_call_operand.vmem [shape: bf16[32,32], index: 17, kind: input, shape index: {}]   ;;  %s6959_s18 = inlined_call_operand.vmem [shape: f32[21,96], index: 18, kind: input, shape index: {}]   ;;  %s6960_s19 = inlined_call_operand.vmem [shape: f32[2,4,48], index: 19, kind: output, shape index: {}]  }
   0x1   :  { %6983 = sst [smem:[#allocation2_spill]] %s6941_s0  ;;  %s5850_s0 = smov 0  }
   0x2   :  { %6984 = sst [smem:[#allocation3_spill]] %s6942_s1 }
   0x3   :  { %6985 = sst [smem:[#allocation4_spill]] %s6943_s2 }
   0x4   :  { %6986 = sst [smem:[#allocation5_spill]] %s6944_s3 }
   0x5 LB: > { %s4824_s30 = sadd.s32 4294967295, %s5740_s0   ;;  %p4828_p0 = scmp.ge.s32.totalorder %s5740_s0, 1  ;;  %s5740_s0 = sphi %s5850_s0, %s29_s0  }
   0x6   : > { %p546_p1 = scmp.lt.s32.totalorder %s5740_s0, 3 }
   0x8   : > { %p547_p2 = pnand %p4828_p0, %p546_p1 }
   0x9   : > { %s6987_s1 = sld [smem:[#allocation4_spill]] (!%p547_p2)  ;;  %v5742_v1 = vmov (!%p547_p2), 0   ;;  %p605_p3 = scmp.lt.s32.totalorder (!%p547_p2), %s4824_s30, 1  ;;  %vm6979_vm0 = vcmask (!%p547_p2), 523264   ;;  %vm6981_vm1 = vcmask (!%p547_p2), 261120   ;;  %v5493_v63 = vld [vmem:[%s6945_s4] sm:$0xff] (!%p547_p2)  }
   0xa   : > { %550 = sbr.rel (%p547_p2) target bundleno = 11177 (0x2ba9), region = 96  ;;  %739 = vmatprep.subr.bf16.mxu0 (!%p547_p2), %v5742_v1  ;;  %s6988_s27 = sld [smem:[#allocation2_spill]] (!%p547_p2)  ;;  %5137 = vmatprep.subr.bf16.mxu1 (!%p547_p2), %v5493_v63  ;;  %vm6977_vm2 = vcmask (!%p547_p2), 130048   ;;  %vm6978_vm7 = vcmask (!%p547_p2), 1043456   ;;  %vm2820_vm8 = vcmask (!%p547_p2), 1045504   ;;  %vm6973_vm9 = vcmask (!%p547_p2), 1041408  }
   0xb   : > { %s6989_s26 = sld [smem:[#allocation5_spill]] (!%p547_p2)  ;;  %5138 = vmatpush3.bf16.msra.mxu1 (!%p547_p2), %v5493_v63  ;;  %s6971_s24 = smov (!%p547_p2), 96  }
   0xc   : > { %s6967_s3 = smov (!%p547_p2), 80   ;;  %s6963_s29 = smov (!%p547_p2), 48  }
   0xd   : > { %s6993_s20 = smov (!%p547_p2), 48   ;;  %s6995_s23 = smov (!%p547_p2), 96  }
   0xf   : > { %v5481_v0 = vld [vmem:[%s6987_s1] sm:$0xff] (!%p547_p2)   ;;  %v5482_v2 = vld [vmem:[%s6987_s1 + $0x8] sm:$0xff] (!%p547_p2)   ;;  %v5483_v3 = vld [vmem:[%s6987_s1 + $0x10] sm:$0xff] (!%p547_p2)  }
  0x10   : > { %740 = vmatpush1.bf16.msra.mxu0 (!%p547_p2), %v5481_v0  ;;  %v5484_v4 = vld [vmem:[%s6987_s1 + $0x18] sm:$0xff] (!%p547_p2)   ;;  %v5485_v8 = vld [vmem:[%s6987_s1 + $0x20] sm:$0xff] (!%p547_p2)   ;;  %v5486_v9 = vld [vmem:[%s6987_s1 + $0x28] sm:$0xff] (!%p547_p2)  }
  0x11   : > { %741 = vmatprep.subr.bf16.mxu0 %v5742_v1  ;;  %s7121_s30 = smov (!%p605_p3, %s4824_s30), 1  ;;  %v5487_v10 = vld [vmem:[%s6987_s1 + $0x30] sm:$0xff]   ;;  %v5488_v11 = vld [vmem:[%s6987_s1 + $0x38] sm:$0xff]   ;;  %v5489_v12 = vld [vmem:[%s6987_s1 + $0x40] sm:$0xff]  }
  0x12   : > { %s4986_s25 = sshll.u32 %s7121_s30, 6  ;;  %v5490_v13 = vld [vmem:[%s6987_s1 + $0x48] sm:$0xff]   ;;  %v5491_v14 = vld [vmem:[%s6987_s1 + $0x50] sm:$0xff]   ;;  %v5492_v15 = vld [vmem:[%s6987_s1 + $0x58] sm:$0xff]   ;;  %s4831_s2 = sshll.u32 %s7121_s30, 3 }
  0x13   : > { %s5873_s28 = scalar_lea.vmem %s6988_s27, %s4986_s25  ;;  %v658_v25 = vld [vmem:[%s6989_s26] sm:$0xff]  ;;  %v659_v27 = vld [vmem:[%s6989_s26 + $0x8] sm:$0xff]  ;;  %s6969_s25 = smov 64  }
  0x14   : > { %742 = vmatpush1.bf16.msra.mxu0 %v5482_v2  ;;  %v623_v5 = vld [vmem:[%s5873_s28 + $0x8] sm:$0xff]  ;;  %v625_v6 = vld [vmem:[%s5873_s28 + $0x18] sm:$0xff]  ;;  %v622_v16 = vld [vmem:[%s5873_s28] sm:$0xff]  ;;  %s6965_s27 = smov 112  }
  0x15   : > { %743 = vmatprep.subr.bf16.mxu0 %v5742_v1  ;;  %v655_v7 = vpack.c.bf16 %v625_v6, %v623_v5  ;;  %v624_v17 = vld [vmem:[%s5873_s28 + $0x10] sm:$0xff]  ;;  %v627_v18 = vld [vmem:[%s5873_s28 + $0x28] sm:$0xff]  ;;  %v629_v19 = vld [vmem:[%s5873_s28 + $0x38] sm:$0xff]  ;;  %v788_v5 = vlaneseq }
  0x16   : > { %v654_v20 = vpack.c.bf16 %v624_v17, %v622_v16  ;;  %v657_v21 = vpack.c.bf16 %v629_v19, %v627_v18  ;;  %v626_v22 = vld [vmem:[%s5873_s28 + $0x20] sm:$0xff]  ;;  %v628_v23 = vld [vmem:[%s5873_s28 + $0x30] sm:$0xff]  ;;  %v5494_v0 = vld [vmem:[%s6945_s4 + $0x8] sm:$0xff]   ;;  %s6992_s28 = smov 112  }
  0x17   : > { %4845 = vmatprep.mubr.msk.bf16.mxu0 %vm6979_vm0, %v655_v7  ;;  %v656_v24 = vpack.c.bf16 %v628_v23, %v626_v22  ;;  %5139 = vmatprep.subr.bf16.mxu1 %v5494_v0 }
  0x18   : > { %744 = vmatpush1.bf16.msra.mxu0 %v5483_v3  ;;  %5140 = vmatpush3.bf16.msra.mxu1 %v5494_v0 }
  0x19   : > { %745 = vmatprep.subr.bf16.mxu0 %v5742_v1 }
  0x1c   : > { %746 = vmatpush1.bf16.msra.mxu0 %v5484_v4 }
  0x1d   : > { %747 = vmatprep.subr.bf16.mxu0 %v5742_v1 }
  0x20   : > { %748 = vmatpush1.bf16.msra.mxu0 %v5485_v8 }
  0x21   : > { %749 = vmatprep.subr.bf16.mxu0 %v5742_v1 }
  0x24   : > { %750 = vmatpush1.bf16.msra.mxu0 %v5486_v9  ;;  %v5949_v9 = vshrl.u32 %v788_v5, 7 }
  0x25   : > { %751 = vmatprep.subr.bf16.mxu0 %v5742_v1 }
  0x26   : > { %vm2838_vm12 = vcmp.ge.s32.totalorder %v5949_v9, 6  ;;  %vm2825_vm14 = vcmp.lt.s32.totalorder %v5949_v9, 6 }
  0x28   : > { %752 = vmatpush1.bf16.msra.mxu0 %v5487_v10 }
  0x29   : > { %753 = vmatprep.subr.bf16.mxu0 %v5742_v1 }
  0x2c   : > { %754 = vmatpush1.bf16.msra.mxu0 %v5488_v11 }
  0x2d   : > { %755 = vmatprep.subr.bf16.mxu0 %v5742_v1 }
  0x30   : > { %756 = vmatpush1.bf16.msra.mxu0 %v5489_v12 }
  0x31   : > { %757 = vmatprep.subr.bf16.mxu0 %v5742_v1 }
  0x34   : > { %758 = vmatpush1.bf16.msra.mxu0 %v5490_v13  ;;  %v5952_v13 = vsub.s32 0, %v5949_v9 }
  0x35   : > { %759 = vmatprep.subr.bf16.mxu0 %v5742_v1 }
  0x38   : > { %760 = vmatpush1.bf16.msra.mxu0 %v5491_v14 }
  0x39   : > { %761 = vmatprep.subr.bf16.mxu0 %v5742_v1 }
  0x3c   : > { %762 = vmatpush1.bf16.msra.mxu0 %v5492_v15  ;;  %v5957_v15 = vld [vmem:[%s6949_s8] sm:$0xff] }
  0x3d   : > { %v901_v19 = vrot.slane %v5957_v15, %v5952_v13 }
  0x3f   : > { %772 = vmatmul.mubr.bf16.vlgmr.msra.gmra.mrb[0].mxu0 %v654_v20  ;;  %v5962_v20 = vsub.s32 1, %v5949_v9 }
  0x40   : > { %4846 = vmatprep.mubr.msk.bf16.mxu0 %vm6979_vm0, %v657_v21 }
  0x47   : > { %780 = vmatmul.mubr.bf16.gmra.mrb[4].mxu0 %v656_v24  ;;  %v909_v24 = vrot.slane %v5957_v15, %v5962_v20 }
 0x112   : > { %v773_v26 = vpop.f32.mrb[0].mxu0 }
 0x113   : > { %v5918_v28 = vadd.f32 %v773_v26, %v658_v25  ;;  %v775_v29 = vpop.f32.mrb[1].mxu0 }
 0x114   : > { %v776_v30 = vpop.f32.mrb[2].mxu0 }
 0x115   : > { %v5920_v31 = vadd.f32 %v776_v30, %v659_v27  ;;  %v778_v32 = vpop.f32.mrb[3].mxu0  ;;  %v845_v33 = vsel %vm6981_vm1, %v5918_v28, 0.0 }
 0x116   : > { %846 = vadd.xlane.f32.xlu0 %v845_v33 }
 0x117   : > { %v848_v34 = vsel %vm6981_vm1, %v5920_v31, 0.0 }
 0x11a   : > { %v781_v35 = vpop.f32.mrb[4].mxu0  ;;  %849 = vadd.xlane.f32.xlu0 %v848_v34 }
 0x11b   : > { %v5926_v36 = vadd.f32 %v781_v35, %v658_v25  ;;  %v783_v37 = vpop.f32.mrb[5].mxu0 }
 0x11c   : > { %v784_v38 = vpop.f32.mrb[6].mxu0 }
 0x11d   : > { %v5928_v39 = vadd.f32 %v784_v38, %v659_v27  ;;  %v786_v40 = vpop.f32.mrb[7].mxu0  ;;  %v851_v41 = vsel %vm6981_vm1, %v5926_v36, 0.0 }
 0x11e   : > { %852 = vadd.xlane.f32.xlu1 %v851_v41 }
 0x11f   : > { %v854_v42 = vsel %vm6981_vm1, %v5928_v39, 0.0 }
 0x122   : > { %855 = vadd.xlane.f32.xlu1 %v854_v42  ;;  %v5969_v42 = vsub.s32 2, %v5949_v9 }
 0x1a3   : > { %v847_v43 = vpop.xlane.xlu0 %846 }
 0x1a4   : > { %v858_v44 = vmul.f32 0.03125, %v847_v43  ;;  %v923_v43 = vrot.slane %v5957_v15, %v5969_v42 }
 0x1a6   : > { %v862_v45 = vsub.f32 %v5918_v28, %v858_v44 }
 0x1a7   : > { %v850_v46 = vpop.xlane.xlu0 %849 }
 0x1a8   : > { %v859_v47 = vmul.f32 0.03125, %v850_v46  ;;  %v866_v48 = vmul.f32 %v862_v45, %v862_v45 }
 0x1aa   : > { %v863_v49 = vsub.f32 %v5920_v31, %v859_v47  ;;  %v870_v50 = vsel %vm6981_vm1, %v866_v48, 0.0 }
 0x1ab   : > { %v853_v51 = vpop.xlane.xlu1 %852  ;;  %871 = vadd.xlane.f32.xlu0 %v870_v50 }
 0x1ac   : > { %v860_v52 = vmul.f32 0.03125, %v853_v51  ;;  %v867_v53 = vmul.f32 %v863_v49, %v863_v49 }
 0x1ae   : > { %v864_v54 = vsub.f32 %v5926_v36, %v860_v52  ;;  %v873_v55 = vsel %vm6981_vm1, %v867_v53, 0.0 }
 0x1af   : > { %v856_v56 = vpop.xlane.xlu1 %855  ;;  %874 = vadd.xlane.f32.xlu1 %v873_v55 }
 0x1b0   : > { %v861_v57 = vmul.f32 0.03125, %v856_v56  ;;  %v868_v58 = vmul.f32 %v864_v54, %v864_v54 }
 0x1b2   : > { %v865_v59 = vsub.f32 %v5928_v39, %v861_v57  ;;  %v876_v60 = vsel %vm6981_vm1, %v868_v58, 0.0  ;;  %v5990_v58 = vand.u32 127, %v788_v5 }
 0x1b3   : > { %877 = vadd.xlane.f32.xlu0 %v876_v60 }
 0x1b4   : > { %v869_v61 = vmul.f32 %v865_v59, %v865_v59  ;;  %vm6975_vm3 = vcmp.lt.s32.totalorder %v5990_v58, 16  ;;  %vm6976_vm4 = vcmp.ge.s32.totalorder %v5990_v58, 16  ;;  %vm6974_vm5 = vcmp.lt.s32.totalorder %v5990_v58, 32 }
 0x1b5   : > { %vm6002_vm6 = vmand %vm6976_vm4, %vm6974_vm5  ;;  %vm2867_vm10 = vcmp.ge.s32.totalorder %v5990_v58, 12  ;;  %vm2847_vm13 = vcmp.ge.s32.totalorder %v5990_v58, 6  ;;  %vm2834_vm15 = vcmp.lt.s32.totalorder %v5990_v58, 6 }
 0x1b6   : > { %v879_v62 = vsel %vm6981_vm1, %v869_v61, 0.0  ;;  %vm2848_vm5 = vmand %vm2838_vm12, %vm2847_vm13 }
 0x1b7   : > { %880 = vadd.xlane.f32.xlu1 %v879_v62  ;;  %vm6438_vm4 = vmand %vm2825_vm14, %vm2834_vm15 }
 0x238   : > { %v872_v1 = vpop.xlane.xlu0 %871 }
 0x239   : > { %v882_v2 = vmul.f32 0.03125, %v872_v1 }
 0x23b   : > { %v886_v3 = vadd.f32 1e-05, %v882_v2 }
 0x23c   : > { %v875_v4 = vpop.xlane.xlu1 %874 }
 0x23d   : > { %5533 = vrsqrt.f32 %v886_v3  ;;  %v883_v6 = vmul.f32 0.03125, %v875_v4 }
 0x23f   : > { %v887_v7 = vadd.f32 1e-05, %v883_v6 }
 0x240   : > { %v878_v8 = vpop.xlane.xlu0 %877 }
 0x241   : > { %5535 = vrsqrt.f32 %v887_v7  ;;  %v884_v10 = vmul.f32 0.03125, %v878_v8 }
 0x243   : > { %v888_v11 = vadd.f32 1e-05, %v884_v10 }
 0x244   : > { %v881_v12 = vpop.xlane.xlu1 %880 }
 0x245   : > { %5537 = vrsqrt.f32 %v888_v11  ;;  %v885_v14 = vmul.f32 0.03125, %v881_v12 }
 0x247   : > { %v5534_v16 = vpop.eup %5533  ;;  %v889_v17 = vadd.f32 1e-05, %v885_v14 }
 0x248   : > { %v894_v18 = vmul.f32 %v5534_v16, %v862_v45 }
 0x249   : > { %5539 = vrsqrt.f32 %v889_v17 }
 0x24a   : > { %v902_v23 = vmul.f32 %v901_v19, %v894_v18 }
 0x24b   : > { %v5536_v21 = vpop.eup %5535 }
 0x24c   : > { %v895_v22 = vmul.f32 %v5536_v21, %v863_v49  ;;  %v910_v27 = vadd.f32 %v909_v24, %v902_v23 }
 0x24e   : > { %v903_v25 = vmul.f32 %v901_v19, %v895_v22 }
 0x24f   : > { %v5538_v26 = vpop.eup %5537 }
 0x250   : > { %v911_v29 = vadd.f32 %v909_v24, %v903_v25  ;;  %v896_v30 = vmul.f32 %v5538_v26, %v864_v54 }
 0x252   : > { %v918_v32 = vpack.c.bf16 %v911_v29, %v910_v27  ;;  %v904_v35 = vmul.f32 %v901_v19, %v896_v30 }
 0x253   : > { %v5540_v33 = vpop.eup %5539 }
 0x254   : > { %5141 = vmatprep.mubr.msk.bf16.mxu1 %vm6981_vm1, %v918_v32  ;;  %v897_v34 = vmul.f32 %v5540_v33, %v865_v59  ;;  %v912_v38 = vadd.f32 %v909_v24, %v904_v35 }
 0x256   : > { %v905_v37 = vmul.f32 %v901_v19, %v897_v34 }
 0x258   : > { %v913_v40 = vadd.f32 %v909_v24, %v905_v37 }
 0x25a   : > { %v919_v41 = vpack.c.bf16 %v913_v40, %v912_v38 }
 0x25c   : > { %5142 = vmatmul.mubr.msk.bf16.vlgmr.msra.gmra.mrb[0].mxu1 %vm6981_vm1, %v919_v41 }
 0x32f   : > { %v5143_v44 = vpop.f32.mrb[0].mxu1 }
 0x330   : > { %v976_v45 = vpop.f32.mrb[1].mxu1  ;;  %v985_v47 = vadd.f32 %v5143_v44, %v923_v43 }
 0x331   : > { %v5144_v46 = vpop.f32.mrb[2].mxu1  ;;  %v977_v50 = vadd.f32 %v976_v45, %v923_v43 }
 0x332   : > { %v988_v48 = vadd.f32 %v5144_v46, %v923_v43  ;;  %v979_v49 = vpop.f32.mrb[3].mxu1 }
 0x333   : > { %v980_v51 = vadd.f32 %v979_v49, %v923_v43 }
 0x334   : > { %v5973_v52 = vpack.c.bf16 %v988_v48, %v985_v47 }
 0x335   : > { %v5975_v53 = vpack.c.bf16 %v980_v51, %v977_v50 }
 0x336   : > { %1001 = vrot.lane.b32.xlu1 %v5973_v52, %s6971_s24 }
 0x337   : > { %999 = vrot.lane.b32.xlu0 %v5975_v53, %s6971_s24  ;;  %5149 = vmatprep.mubr.msk.bf16.mxu1 %vm6977_vm2, %v5975_v53 }
 0x3a8   : > { %v1002_v56 = vpop.permute.xlu1 %1001 }
 0x3a9   : > { %v1000_v54 = vpop.permute.xlu0 %999  ;;  %v1014_v57 = vsel %vm6977_vm2, %v1002_v56, 0 }
 0x3aa   : > { %5445 = vmatprep.subr.msk.bf16.mxu1 %vm6977_vm2, %v1000_v54  ;;  %v1011_v55 = vsel %vm6977_vm2, %v1000_v54, 0 }
 0x3ab   : > { %5146 = vmatpush3.bf16.xpose.msra.mxu1 %v1011_v55 }
 0x3ac   : > { %5446 = vmatprep.subr.msk.bf16.mxu1 %vm6977_vm2, %v1002_v56 }
 0x3b3   : > { %5148 = vmatpush3.bf16.xpose.msra.mxu1 %v1014_v57 }
 0x3ba   : > { %5150 = vmatmul.mubr.msk.bf16.vlgmr.msra.gmra.mrb[4].mxu1 %vm6977_vm2, %v5973_v52 }
 0x48d   : > { %v5151_v59 = vpop.f32.mrb[4].mxu1 }
 0x48e   : > { %v1050_v60 = vpop.f32.mrb[5].mxu1  ;;  %v1067_v1 = vmul.f32 0.25, %v5151_v59 }
 0x48f   : > { %v1065_v61 = vmul.f32 0.25, %v1050_v60  ;;  %v5152_v62 = vpop.f32.mrb[6].mxu1 }
 0x490   : > { %v1068_v63 = vmul.f32 0.25, %v5152_v62  ;;  %v1053_v0 = vpop.f32.mrb[7].mxu1  ;;  %v1071_v10 = vsel %vm6002_vm6, %v1067_v1, -1e+30 }
 0x491   : > { %v1066_v2 = vmul.f32 0.25, %v1053_v0  ;;  %v1069_v3 = vsel %vm6975_vm3, %v1065_v61, -1e+30  ;;  %v1079_v12 = vsel %vm6981_vm1, %v1071_v10, -inf }
 0x492   : > { %v1073_v4 = vsel %vm6981_vm1, %v1069_v3, -inf  ;;  %v1072_v7 = vsel %vm6002_vm6, %v1068_v63, -1e+30 }
 0x493   : > { %1074 = vmax.xlane.f32.xlu1 %v1073_v4  ;;  %v1070_v6 = vsel %vm6975_vm3, %v1066_v2, -1e+30  ;;  %v1082_v11 = vsel %vm6981_vm1, %v1072_v7, -inf }
 0x494   : > { %v1076_v8 = vsel %vm6981_vm1, %v1070_v6, -inf }
 0x495   : > { %1077 = vmax.xlane.f32.xlu0 %v1076_v8 }
 0x497   : > { %1083 = vmax.xlane.f32.xlu1 %v1082_v11 }
 0x499   : > { %1080 = vmax.xlane.f32.xlu0 %v1079_v12 }
 0x4a8   : > { %1121 = vrot.lane.b32.xlu1 %v5973_v52, %s6969_s25 }
 0x520   : > { %v1075_v14 = vpop.xlane.xlu1 %1074 }
 0x521   : > { %v1085_v19 = vsub.f32 %v1069_v3, %v1075_v14 }
 0x522   : > { %v1078_v16 = vpop.xlane.xlu0 %1077 }
 0x523   : > { %v1086_v17 = vsub.f32 %v1070_v6, %v1078_v16  ;;  %v1089_v26 = vmul.f32 1.442695, %v1085_v19 }
 0x524   : > { %v1084_v18 = vpop.xlane.xlu1 %1083 }
 0x525   : > { %v1088_v21 = vsub.f32 %v1072_v7, %v1084_v18  ;;  %v1091_v22 = vmul.f32 1.442695, %v1086_v17 }
 0x526   : > { %v1081_v23 = vpop.xlane.xlu0 %1080 }
 0x527   : > { %v1095_v24 = vmul.f32 1.442695, %v1088_v21  ;;  %v1087_v25 = vsub.f32 %v1071_v10, %v1081_v23 }
 0x528   : > { %v1122_v40 = vpop.permute.xlu1 %1121 }
 0x529   : > { %5541 = vpow2.f32 %v1095_v24  ;;  %v1093_v27 = vmul.f32 1.442695, %v1087_v25 }
 0x52a   : > { %5543 = vpow2.f32 %v1091_v22 }
 0x52b   : > { %5545 = vpow2.f32 %v1093_v27 }
 0x52c   : > { %5547 = vpow2.f32 %v1089_v26 }
 0x533   : > { %v5542_v29 = vpop.eup %5541 }
 0x534   : > { %v5544_v30 = vpop.eup %5543  ;;  %v1106_v32 = vsel %vm6981_vm1, %v5542_v29, 0.0 }
 0x535   : > { %v5546_v33 = vpop.eup %5545  ;;  %1107 = vadd.xlane.f32.xlu1 %v1106_v32  ;;  %v1100_v37 = vsel %vm6981_vm1, %v5544_v30, 0.0 }
 0x536   : > { %v1103_v34 = vsel %vm6981_vm1, %v5546_v33, 0.0  ;;  %v5548_v35 = vpop.eup %5547 }
 0x537   : > { %1104 = vadd.xlane.f32.xlu0 %v1103_v34  ;;  %v1097_v38 = vsel %vm6981_vm1, %v5548_v35, 0.0 }
 0x539   : > { %1101 = vadd.xlane.f32.xlu1 %v1100_v37 }
 0x53b   : > { %1098 = vadd.xlane.f32.xlu0 %v1097_v38 }
 0x54a   : > { %1186 = vrot.lane.b32.xlu1 %v5975_v53, %s6967_s3 }
 0x54e   : > { %1188 = vrot.lane.b32.xlu1 %v5973_v52, %s6967_s3 }
 0x551   : > { %1119 = vrot.lane.b32.xlu0 %v5975_v53, %s6969_s25 }
 0x552   : > { %1184 = vrot.lane.b32.xlu1 %v5973_v52, %s6965_s27 }
 0x555   : > { %1182 = vrot.lane.b32.xlu0 %v5975_v53, %s6965_s27 }
 0x5c2   : > { %v1108_v41 = vpop.xlane.xlu1 %1107 }
 0x5c4   : > { %v1105_v43 = vpop.xlane.xlu0 %1104 }
 0x5c5   : > { %5549 = vrcp.f32 %v1105_v43 }
 0x5c6   : > { %v1102_v44 = vpop.xlane.xlu1 %1101 }
 0x5c7   : > { %5551 = vrcp.f32 %v1102_v44 }
 0x5c8   : > { %5553 = vrcp.f32 %v1108_v41  ;;  %v1099_v45 = vpop.xlane.xlu0 %1098 }
 0x5c9   : > { %5555 = vrcp.f32 %v1099_v45 }
 0x5ca   : > { %v1187_v50 = vpop.permute.xlu1 %1186 }
 0x5cb   : > { %v1197_v62 = vsel %vm6977_vm2, %v1187_v50, 0 }
 0x5cc   : > { %v1120_v46 = vpop.permute.xlu0 %1119 }
 0x5cd   : > { %5153 = vmatprep.subr.bf16.mxu1 %v1120_v46 }
 0x5ce   : > { %5154 = vmatpush3.bf16.msra.mxu1 %v1120_v46  ;;  %v1189_v63 = vpop.permute.xlu1 %1188 }
 0x5cf   : > { %5155 = vmatprep.subr.bf16.mxu1 %v1122_v40  ;;  %v5550_v47 = vpop.eup %5549  ;;  %v1200_v0 = vsel %vm6977_vm2, %v1189_v63, 0 }
 0x5d0   : > { %v1115_v54 = vmul.f32 %v5550_v47, %v5546_v33  ;;  %v1183_v61 = vpop.permute.xlu0 %1182 }
 0x5d1   : > { %v5552_v48 = vpop.eup %5551 }
 0x5d2   : > { %v5554_v49 = vpop.eup %5553  ;;  %5156 = vmatpush3.bf16.msra.mxu1 %v1122_v40  ;;  %v1114_v56 = vmul.f32 %v5552_v48, %v5544_v30  ;;  %v1185_v1 = vpop.permute.xlu1 %1184 }
 0x5d3   : > { %v5556_v51 = vpop.eup %5555  ;;  %5447 = vmatprep.subr.msk.bf16.mxu1 %vm6977_vm2, %v1187_v50  ;;  %v1116_v57 = vmul.f32 %v5554_v49, %v5542_v29 }
 0x5d4   : > { %v1113_v55 = vmul.f32 %v5556_v51, %v5548_v35 }
 0x5d5   : > { %v1118_v60 = vpack.c.bf16 %v1116_v57, %v1115_v54 }
 0x5d6   : > { %v1117_v59 = vpack.c.bf16 %v1114_v56, %v1113_v55  ;;  %v5495_v56 = vld [vmem:[%s6946_s5 + $0x8] sm:$0xff]  }
 0x5d7   : > { %5177 = vmatprep.subr.bf16.mxu0 %v5495_v56 }
 0x5d8   : > { %5157 = vmatprep.mubr.msk.bf16.mxu1 %vm6981_vm1, %v1117_v59  ;;  %5178 = vmatpush3.bf16.msra.mxu0 %v5495_v56 }
 0x5d9   : > { %5158 = vmatmul.mubr.msk.bf16.vlgmr.msra.gmra.mrb[8].mxu1 %vm6981_vm1, %v1118_v60 }
 0x5da   : > { %5165 = vmatprep.mubr.msk.bf16.mxu1 %vm6977_vm2, %v1183_v61 }
 0x5db   : > { %5162 = vmatpush3.bf16.xpose.msra.mxu1 %v1197_v62 }
 0x5dc   : > { %5448 = vmatprep.subr.msk.bf16.mxu1 %vm6977_vm2, %v1189_v63 }
 0x5e3   : > { %5164 = vmatpush3.bf16.xpose.msra.mxu1 %v1200_v0 }
 0x5ea   : > { %5166 = vmatmul.mubr.msk.bf16.vlgmr.msra.gmra.mrb[12].mxu1 %vm6977_vm2, %v1185_v1 }
 0x6ac   : > { %v6039_v2 = vpop.f32.mrb[8].mxu1 }
 0x6ad   : > { %v6041_v3 = vpop.f32.mrb[9].mxu1 }
 0x6ae   : > { %v6043_v4 = vpop.f32.mrb[10].mxu1 }
 0x6af   : > { %v1181_v6 = vpack.c.bf16 %v6043_v4, %v6039_v2  ;;  %v6047_v7 = vpop.f32.mrb[11].mxu1 }
 0x6b0   : > { %v1180_v8 = vpack.c.bf16 %v6047_v7, %v6041_v3 }
 0x6bd   : > { %v5167_v10 = vpop.f32.mrb[12].mxu1 }
 0x6be   : > { %v1236_v11 = vpop.f32.mrb[13].mxu1  ;;  %v1253_v12 = vmul.f32 0.25, %v5167_v10 }
 0x6bf   : > { %v1251_v14 = vmul.f32 0.25, %v1236_v11  ;;  %v5168_v16 = vpop.f32.mrb[14].mxu1 }
 0x6c0   : > { %v1239_v17 = vpop.f32.mrb[15].mxu1  ;;  %v1254_v22 = vmul.f32 0.25, %v5168_v16  ;;  %v1257_v24 = vsel %vm6002_vm6, %v1253_v12, -1e+30 }
 0x6c1   : > { %v1252_v18 = vmul.f32 0.25, %v1239_v17  ;;  %v1255_v19 = vsel %vm6975_vm3, %v1251_v14, -1e+30  ;;  %v1265_v26 = vsel %vm6981_vm1, %v1257_v24, -inf }
 0x6c2   : > { %v1259_v21 = vsel %vm6981_vm1, %v1255_v19, -inf  ;;  %v1258_v27 = vsel %vm6002_vm6, %v1254_v22, -1e+30 }
 0x6c3   : > { %1260 = vmax.xlane.f32.xlu0 %v1259_v21  ;;  %v1256_v23 = vsel %vm6975_vm3, %v1252_v18, -1e+30  ;;  %v1268_v29 = vsel %vm6981_vm1, %v1258_v27, -inf  ;;  %v5496_v18 = vld [vmem:[%s6946_s5] sm:$0xff]  }
 0x6c4   : > { %v1262_v25 = vsel %vm6981_vm1, %v1256_v23, -inf  ;;  %5183 = vmatprep.subr.bf16.mxu0 %v5496_v18 }
 0x6c5   : > { %1263 = vmax.xlane.f32.xlu1 %v1262_v25 }
 0x6c7   : > { %1266 = vmax.xlane.f32.xlu0 %v1265_v26  ;;  %v6090_v26 = vsub.s32 3, %v5949_v9 }
 0x6cb   : > { %1269 = vmax.xlane.f32.xlu0 %v1268_v29  ;;  %v1497_v29 = vrot.slane %v5957_v15, %v6090_v26 }
 0x750   : > { %v1261_v30 = vpop.xlane.xlu0 %1260 }
 0x751   : > { %v1271_v32 = vsub.f32 %v1255_v19, %v1261_v30 }
 0x752   : > { %v1264_v33 = vpop.xlane.xlu1 %1263 }
 0x753   : > { %v1275_v37 = vmul.f32 1.442695, %v1271_v32  ;;  %v1272_v38 = vsub.f32 %v1256_v23, %v1264_v33 }
 0x754   : > { %v1267_v34 = vpop.xlane.xlu0 %1266 }
 0x755   : > { %v1273_v35 = vsub.f32 %v1257_v24, %v1267_v34  ;;  %v1277_v44 = vmul.f32 1.442695, %v1272_v38 }
 0x757   : > { %v1279_v40 = vmul.f32 1.442695, %v1273_v35 }
 0x758   : > { %v1270_v41 = vpop.xlane.xlu0 %1269 }
 0x759   : > { %5557 = vpow2.f32 %v1279_v40  ;;  %v1274_v43 = vsub.f32 %v1258_v27, %v1270_v41 }
 0x75a   : > { %5559 = vpow2.f32 %v1275_v37 }
 0x75b   : > { %v1281_v45 = vmul.f32 1.442695, %v1274_v43 }
 0x75d   : > { %5561 = vpow2.f32 %v1281_v45 }
 0x75e   : > { %5563 = vpow2.f32 %v1277_v44 }
 0x763   : > { %v5558_v46 = vpop.eup %5557 }
 0x764   : > { %v1289_v47 = vsel %vm6981_vm1, %v5558_v46, 0.0  ;;  %v5560_v48 = vpop.eup %5559 }
 0x765   : > { %1290 = vadd.xlane.f32.xlu0 %v1289_v47  ;;  %v1283_v50 = vsel %vm6981_vm1, %v5560_v48, 0.0 }
 0x767   : > { %v5562_v49 = vpop.eup %5561 }
 0x768   : > { %v1292_v51 = vsel %vm6981_vm1, %v5562_v49, 0.0  ;;  %v5564_v54 = vpop.eup %5563 }
 0x769   : > { %1284 = vadd.xlane.f32.xlu0 %v1283_v50  ;;  %1293 = vadd.xlane.f32.xlu1 %v1292_v51  ;;  %v1286_v55 = vsel %vm6981_vm1, %v5564_v54, 0.0 }
 0x76d   : > { %1287 = vadd.xlane.f32.xlu1 %v1286_v55 }
 0x77e   : > { %1307 = vrot.lane.b32.xlu1 %v5973_v52, %s6963_s29 }
 0x77f   : > { %1305 = vrot.lane.b32.xlu0 %v5975_v53, %s6963_s29  ;;  %s6994_s29 = sld [smem:[#allocation3_spill]] }
 0x7f2   : > { %v1291_v57 = vpop.xlane.xlu0 %1290 }
 0x7f6   : > { %v1285_v59 = vpop.xlane.xlu0 %1284  ;;  %v1294_v60 = vpop.xlane.xlu1 %1293 }
 0x7f7   : > { %5565 = vrcp.f32 %v1294_v60 }
 0x7f8   : > { %5567 = vrcp.f32 %v1285_v59 }
 0x7f9   : > { %5569 = vrcp.f32 %v1291_v57 }
 0x7fa   : > { %v1306_v61 = vpop.permute.xlu0 %1305  ;;  %v1288_v62 = vpop.xlane.xlu1 %1287 }
 0x7fb   : > { %5571 = vrcp.f32 %v1288_v62  ;;  %5169 = vmatprep.subr.bf16.mxu1 %v1306_v61  ;;  %v5497_v62 = vld [vmem:[%s6947_s6] sm:$0xff]  }
 0x7fc   : > { %5170 = vmatpush3.bf16.msra.mxu1 %v1306_v61 }
 0x7fe   : > { %v1308_v52 = vpop.permute.xlu1 %1307 }
 0x7ff   : > { %5171 = vmatprep.subr.bf16.mxu1 %v1308_v52 }
 0x800   : > { %5172 = vmatpush3.bf16.msra.mxu1 %v1308_v52  ;;  %v5498_v52 = vld [vmem:[%s6947_s6 + $0x8] sm:$0xff]  }
 0x801   : > { %v5566_v53 = vpop.eup %5565  ;;  %5189 = vmatprep.subr.bf16.mxu1 %v5497_v62 }
 0x802   : > { %v5568_v63 = vpop.eup %5567  ;;  %v1302_v10 = vmul.f32 %v5566_v53, %v5562_v49 }
 0x803   : > { %v5570_v0 = vpop.eup %5569  ;;  %v1299_v11 = vmul.f32 %v5568_v63, %v5560_v48 }
 0x804   : > { %v1301_v14 = vmul.f32 %v5570_v0, %v5558_v46 }
 0x805   : > { %v5572_v1 = vpop.eup %5571 }
 0x806   : > { %v1300_v12 = vmul.f32 %v5572_v1, %v5564_v54  ;;  %v1304_v17 = vpack.c.bf16 %v1302_v10, %v1301_v14 }
 0x808   : > { %v1303_v16 = vpack.c.bf16 %v1300_v12, %v1299_v11 }
 0x80a   : > { %5173 = vmatprep.mubr.msk.bf16.mxu1 %vm6981_vm1, %v1303_v16 }
 0x80b   : > { %5174 = vmatmul.mubr.msk.bf16.vlgmr.msra.gmra.mrb[16].mxu1 %vm6981_vm1, %v1304_v17 }
 0x80c   : > { %5190 = vmatpush3.bf16.msra.mxu1 %v5497_v62 }
 0x80d   : > { %5191 = vmatprep.subr.bf16.mxu1 %v5498_v52 }
 0x810   : > { %5192 = vmatpush3.bf16.msra.mxu1 %v5498_v52 }
 0x8de   : > { %v5175_v19 = vpop.f32.mrb[16].mxu1 }
 0x8df   : > { %v1351_v21 = vpop.f32.mrb[17].mxu1 }
 0x8e0   : > { %v5176_v22 = vpop.f32.mrb[18].mxu1 }
 0x8e1   : > { %v1367_v23 = vpack.c.bf16 %v5176_v22, %v5175_v19  ;;  %v1354_v24 = vpop.f32.mrb[19].mxu1 }
 0x8e2   : > { %v1366_v25 = vpack.c.bf16 %v1354_v24, %v1351_v21  ;;  %v6129_v21 = vsub.s32 4, %v5949_v9 }
 0x8e4   : > { %5179 = vmatprep.mubr.msk.bf16.mxu0 %vm6977_vm2, %v1366_v25  ;;  %v1557_v22 = vrot.slane %v5957_v15, %v6129_v21 }
 0x8e5   : > { %5180 = vmatmul.mubr.msk.bf16.vlgmr.msra.gmra.mrb[8].mxu0 %vm6977_vm2, %v1367_v23  ;;  %v6134_v23 = vsub.s32 5, %v5949_v9 }
 0x8e6   : > { %5184 = vmatpush3.bf16.msra.mxu0 %v5496_v18  ;;  %5185 = vmatprep.mubr.msk.bf16.mxu0 %vm6977_vm2, %v1180_v8 }
 0x8f1   : > { %5186 = vmatmul.mubr.msk.bf16.vlgmr.msra.gmra.mrb[8].mxu0 %vm6977_vm2, %v1181_v6 }
 0x9c4   : > { %v5187_v27 = vpop.f32.mrb[8].mxu0 }
 0x9c5   : > { %v1475_v30 = vpop.f32.mrb[9].mxu0  ;;  %v1492_v8 = vadd.f32 %v5187_v27, %v5926_v36 }
 0x9c6   : > { %v1490_v32 = vadd.f32 %v1475_v30, %v5918_v28  ;;  %v5188_v33 = vpop.f32.mrb[10].mxu0 }
 0x9c7   : > { %v1493_v3 = vadd.f32 %v5188_v33, %v5928_v39  ;;  %v1478_v7 = vpop.f32.mrb[11].mxu0  ;;  %v6106_v37 = vadd.f32 %v1497_v29, %v1492_v8 }
 0x9c8   : > { %v6097_v34 = vadd.f32 %v1497_v29, %v1490_v32  ;;  %v1491_v2 = vadd.f32 %v1478_v7, %v5920_v31  ;;  %v1565_v32 = vrot.slane %v5957_v15, %v6134_v23 }
 0x9c9   : > { %v6100_v4 = vadd.f32 %v1497_v29, %v1493_v3  ;;  %v1508_v31 = vsel %vm6981_vm1, %v6106_v37, 0.0 }
 0x9ca   : > { %v6102_v6 = vadd.f32 %v1497_v29, %v1491_v2  ;;  %v1502_v35 = vsel %vm6981_vm1, %v6097_v34, 0.0 }
 0x9cb   : > { %1503 = vadd.xlane.f32.xlu1 %v1502_v35  ;;  %v1511_v36 = vsel %vm6981_vm1, %v6100_v4, 0.0 }
 0x9cc   : > { %v1505_v28 = vsel %vm6981_vm1, %v6102_v6, 0.0 }
 0x9cd   : > { %1506 = vadd.xlane.f32.xlu0 %v1505_v28 }
 0x9cf   : > { %1512 = vadd.xlane.f32.xlu1 %v1511_v36 }
 0x9d1   : > { %1509 = vadd.xlane.f32.xlu0 %v1508_v31 }
 0xa58   : > { %v1504_v39 = vpop.xlane.xlu1 %1503 }
 0xa59   : > { %v1514_v38 = vmul.f32 0.03125, %v1504_v39 }
 0xa5a   : > { %v1507_v40 = vpop.xlane.xlu0 %1506 }
 0xa5b   : > { %v1518_v41 = vsub.f32 %v6097_v34, %v1514_v38  ;;  %v1515_v43 = vmul.f32 0.03125, %v1507_v40 }
 0xa5c   : > { %v1513_v44 = vpop.xlane.xlu1 %1512 }
 0xa5d   : > { %v1519_v45 = vsub.f32 %v6102_v6, %v1515_v43  ;;  %v1517_v46 = vmul.f32 0.03125, %v1513_v44  ;;  %v1522_v47 = vmul.f32 %v1518_v41, %v1518_v41  ;;  %v5499_v43 = vld [vmem:[%s6948_s7] sm:$0xff]   ;;  %v5500_v44 = vld [vmem:[%s6948_s7 + $0x8] sm:$0xff]  }
 0xa5e   : > { %v1510_v48 = vpop.xlane.xlu0 %1509  ;;  %5197 = vmatprep.subr.bf16.mxu1 %v5499_v43 }
 0xa5f   : > { %v1521_v49 = vsub.f32 %v6100_v4, %v1517_v46  ;;  %v1516_v50 = vmul.f32 0.03125, %v1510_v48  ;;  %v1526_v51 = vsel %vm6981_vm1, %v1522_v47, 0.0  ;;  %v1523_v54 = vmul.f32 %v1519_v45, %v1519_v45  ;;  %v5502_v46 = vld [vmem:[%s6948_s7 + $0x18] sm:$0xff]  }
 0xa60   : > { %1527 = vadd.xlane.f32.xlu0 %v1526_v51  ;;  %v6153_v47 = vsub.s32 6, %v5949_v9 }
 0xa61   : > { %v1520_v55 = vsub.f32 %v6106_v37, %v1516_v50  ;;  %v1529_v56 = vsel %vm6981_vm1, %v1523_v54, 0.0  ;;  %v1525_v57 = vmul.f32 %v1521_v49, %v1521_v49 }
 0xa62   : > { %1530 = vadd.xlane.f32.xlu1 %v1529_v56  ;;  %v1579_v48 = vrot.slane %v5957_v15, %v6153_v47 }
 0xa63   : > { %v1524_v59 = vmul.f32 %v1520_v55, %v1520_v55  ;;  %v1535_v60 = vsel %vm6981_vm1, %v1525_v57, 0.0 }
 0xa65   : > { %v1532_v61 = vsel %vm6981_vm1, %v1524_v59, 0.0 }
 0xa66   : > { %1536 = vadd.xlane.f32.xlu1 %v1535_v60  ;;  %1533 = vadd.xlane.f32.xlu0 %v1532_v61 }
 0xaed   : > { %v1528_v53 = vpop.xlane.xlu0 %1527 }
 0xaee   : > { %v1538_v63 = vmul.f32 0.03125, %v1528_v53 }
 0xaef   : > { %v1531_v0 = vpop.xlane.xlu1 %1530 }
 0xaf0   : > { %v1542_v1 = vadd.f32 1e-05, %v1538_v63  ;;  %v1539_v10 = vmul.f32 0.03125, %v1531_v0 }
 0xaf2   : > { %5573 = vrsqrt.f32 %v1542_v1  ;;  %v1543_v11 = vadd.f32 1e-05, %v1539_v10 }
 0xaf3   : > { %v1537_v12 = vpop.xlane.xlu1 %1536  ;;  %v1534_v14 = vpop.xlane.xlu0 %1533 }
 0xaf4   : > { %5575 = vrsqrt.f32 %v1543_v11  ;;  %v1541_v16 = vmul.f32 0.03125, %v1537_v12  ;;  %v1540_v17 = vmul.f32 0.03125, %v1534_v14 }
 0xaf6   : > { %v1545_v18 = vadd.f32 1e-05, %v1541_v16  ;;  %v1544_v19 = vadd.f32 1e-05, %v1540_v17 }
 0xaf8   : > { %5577 = vrsqrt.f32 %v1545_v18 }
 0xaf9   : > { %5579 = vrsqrt.f32 %v1544_v19 }
 0xafc   : > { %v5574_v24 = vpop.eup %5573 }
 0xafd   : > { %v1550_v25 = vmul.f32 %v5574_v24, %v1518_v41 }
 0xafe   : > { %v5576_v27 = vpop.eup %5575 }
 0xaff   : > { %v1551_v29 = vmul.f32 %v5576_v27, %v1519_v45  ;;  %v1558_v30 = vmul.f32 %v1557_v22, %v1550_v25  ;;  %v5501_v45 = vld [vmem:[%s6948_s7 + $0x10] sm:$0xff]  }
 0xb01   : > { %v1559_v33 = vmul.f32 %v1557_v22, %v1551_v29  ;;  %v1566_v2 = vadd.f32 %v1565_v32, %v1558_v30 }
 0xb02   : > { %v5578_v3 = vpop.eup %5577 }
 0xb03   : > { %v5580_v7 = vpop.eup %5579  ;;  %v1553_v8 = vmul.f32 %v5578_v3, %v1521_v49  ;;  %v1567_v35 = vadd.f32 %v1565_v32, %v1559_v33 }
 0xb04   : > { %v1552_v28 = vmul.f32 %v5580_v7, %v1520_v55 }
 0xb05   : > { %v1561_v36 = vmul.f32 %v1557_v22, %v1553_v8  ;;  %v1574_v31 = vpack.c.bf16 %v1567_v35, %v1566_v2 }
 0xb06   : > { %v1560_v39 = vmul.f32 %v1557_v22, %v1552_v28 }
 0xb07   : > { %5193 = vmatprep.mubr.msk.bf16.mxu1 %vm6981_vm1, %v1574_v31  ;;  %v1569_v38 = vadd.f32 %v1565_v32, %v1561_v36 }
 0xb08   : > { %v1568_v40 = vadd.f32 %v1565_v32, %v1560_v39 }
 0xb0a   : > { %v1575_v41 = vpack.c.bf16 %v1569_v38, %v1568_v40 }
 0xb0c   : > { %5194 = vmatmul.mubr.msk.bf16.vlgmr.msra.gmra.mrb[20].mxu1 %vm6981_vm1, %v1575_v41 }
 0xb0d   : > { %5198 = vmatpush3.bf16.msra.mxu1 %v5499_v43 }
 0xb0e   : > { %5199 = vmatprep.subr.bf16.mxu1 %v5500_v44 }
 0xb11   : > { %5200 = vmatpush3.bf16.msra.mxu1 %v5500_v44 }
 0xb12   : > { %5201 = vmatprep.subr.bf16.mxu1 %v5501_v45 }
 0xb15   : > { %5202 = vmatpush3.bf16.msra.mxu1 %v5501_v45  ;;  %v6160_v45 = vsub.s32 7, %v5949_v9 }
 0xb16   : > { %5203 = vmatprep.subr.bf16.mxu1 %v5502_v46 }
 0xb19   : > { %5204 = vmatpush3.bf16.msra.mxu1 %v5502_v46 }
 0xbdf   : > { %v5195_v49 = vpop.f32.mrb[20].mxu1 }
 0xbe0   : > { %v1641_v50 = vadd.f32 %v5195_v49, %v1579_v48  ;;  %v1632_v51 = vpop.f32.mrb[21].mxu1 }
 0xbe1   : > { %v1633_v54 = vadd.f32 %v1632_v51, %v1579_v48  ;;  %v5196_v55 = vpop.f32.mrb[22].mxu1 }
 0xbe2   : > { %v1649_v56 = vmul.f32 %v1641_v50, %v1641_v50  ;;  %v1644_v57 = vadd.f32 %v5196_v55, %v1579_v48  ;;  %v1635_v59 = vpop.f32.mrb[23].mxu1 }
 0xbe3   : > { %v1647_v60 = vmul.f32 %v1633_v54, %v1633_v54  ;;  %v1636_v61 = vadd.f32 %v1635_v59, %v1579_v48  ;;  %v1779_v48 = vrot.slane %v5957_v15, %v6160_v45 }
 0xbe4   : > { %v1653_v62 = vmul.f32 %v1649_v56, %v1641_v50  ;;  %v1650_v52 = vmul.f32 %v1644_v57, %v1644_v57 }
 0xbe5   : > { %v1651_v53 = vmul.f32 %v1647_v60, %v1633_v54  ;;  %v1648_v63 = vmul.f32 %v1636_v61, %v1636_v61 }
 0xbe6   : > { %v1657_v0 = vmul.f32 0.044715, %v1653_v62  ;;  %v1654_v1 = vmul.f32 %v1650_v52, %v1644_v57 }
 0xbe7   : > { %v1655_v10 = vmul.f32 0.044715, %v1651_v53  ;;  %v1652_v11 = vmul.f32 %v1648_v63, %v1636_v61 }
 0xbe8   : > { %v1661_v12 = vadd.f32 %v1657_v0, %v1641_v50  ;;  %v1658_v14 = vmul.f32 0.044715, %v1654_v1 }
 0xbe9   : > { %v1659_v16 = vadd.f32 %v1655_v10, %v1633_v54  ;;  %v1656_v17 = vmul.f32 0.044715, %v1652_v11 }
 0xbea   : > { %v1665_v18 = vmul.f32 0.7978846, %v1661_v12  ;;  %v1662_v19 = vadd.f32 %v1658_v14, %v1644_v57 }
 0xbeb   : > { %v1663_v22 = vmul.f32 0.7978846, %v1659_v16  ;;  %v1660_v24 = vadd.f32 %v1656_v17, %v1636_v61 }
 0xbec   : > { %5581 = vtanh.f32 %v1665_v18  ;;  %v1666_v25 = vmul.f32 0.7978846, %v1662_v19 }
 0xbed   : > { %5583 = vtanh.f32 %v1663_v22  ;;  %v1664_v27 = vmul.f32 0.7978846, %v1660_v24 }
 0xbee   : > { %5585 = vtanh.f32 %v1666_v25 }
 0xbef   : > { %5587 = vtanh.f32 %v1664_v27 }
 0xbf6   : > { %v5582_v29 = vpop.eup %5581 }
 0xbf7   : > { %v5584_v30 = vpop.eup %5583  ;;  %v1673_v32 = vadd.f32 1.0, %v5582_v29 }
 0xbf8   : > { %v5586_v33 = vpop.eup %5585  ;;  %v1671_v3 = vadd.f32 1.0, %v5584_v30 }
 0xbf9   : > { %v5588_v7 = vpop.eup %5587  ;;  %v1677_v8 = vmul.f32 0.5, %v1673_v32  ;;  %v1674_v2 = vadd.f32 1.0, %v5586_v33  ;;  %v5503_v32 = vld [vmem:[%s6945_s4 + $0x10] sm:$0xff]   ;;  %v5504_v33 = vld [vmem:[%s6945_s4 + $0x18] sm:$0xff]  }
 0xbfa   : > { %v1675_v35 = vmul.f32 0.5, %v1671_v3  ;;  %v1672_v28 = vadd.f32 1.0, %v5588_v7  ;;  %5209 = vmatprep.subr.bf16.mxu0 %v5503_v32 }
 0xbfb   : > { %v1678_v36 = vmul.f32 0.5, %v1674_v2  ;;  %v1681_v39 = vmul.f32 %v1677_v8, %v1641_v50  ;;  %5210 = vmatpush3.bf16.msra.mxu0 %v5503_v32 }
 0xbfc   : > { %v1676_v31 = vmul.f32 0.5, %v1672_v28  ;;  %v1679_v40 = vmul.f32 %v1675_v35, %v1633_v54  ;;  %5211 = vmatprep.subr.bf16.mxu0 %v5504_v33 }
 0xbfd   : > { %v1682_v38 = vmul.f32 %v1678_v36, %v1644_v57 }
 0xbfe   : > { %v1680_v41 = vmul.f32 %v1676_v31, %v1636_v61 }
 0xbff   : > { %v1692_v43 = vpack.c.bf16 %v1682_v38, %v1681_v39  ;;  %5212 = vmatpush3.bf16.msra.mxu0 %v5504_v33 }
 0xc00   : > { %v1691_v44 = vpack.c.bf16 %v1680_v41, %v1679_v40 }
 0xc02   : > { %5205 = vmatprep.mubr.msk.bf16.mxu1 %vm6979_vm0, %v1691_v44 }
 0xc03   : > { %5206 = vmatmul.mubr.msk.bf16.vlgmr.msra.gmra.mrb[24].mxu1 %vm6979_vm0, %v1692_v43  ;;  %v6201_v43 = vld [vmem:[%s6949_s8 + $0x8] sm:$0xff]  ;;  %vm2887_vm0 = vcmp.ge.s32.totalorder %v5990_v58, 18 }
 0xc04   : > { %v1841_v44 = vrot.slane %v6201_v43, %v5952_v13 }
 0xcd6   : > { %v5207_v46 = vpop.f32.mrb[24].mxu1 }
 0xcd7   : > { %v1757_v49 = vpop.f32.mrb[25].mxu1  ;;  %v1774_v51 = vadd.f32 %v5207_v46, %v6106_v37 }
 0xcd8   : > { %v1772_v50 = vadd.f32 %v1757_v49, %v6097_v34  ;;  %v5208_v54 = vpop.f32.mrb[26].mxu1 }
 0xcd9   : > { %v1760_v55 = vpop.f32.mrb[27].mxu1  ;;  %v1775_v57 = vadd.f32 %v5208_v54, %v6100_v4  ;;  %v6170_v60 = vadd.f32 %v1779_v48, %v1774_v51  ;;  %v1849_v54 = vrot.slane %v6201_v43, %v5962_v20 }
 0xcda   : > { %v6166_v56 = vadd.f32 %v1779_v48, %v1772_v50  ;;  %v1773_v59 = vadd.f32 %v1760_v55, %v6102_v6 }
 0xcdb   : > { %v6176_v62 = vadd.f32 %v1779_v48, %v1775_v57  ;;  %v1792_v37 = vsel %vm6981_vm1, %v6170_v60, 0.0 }
 0xcdc   : > { %v6172_v61 = vadd.f32 %v1779_v48, %v1773_v59  ;;  %v1786_v15 = vsel %vm6981_vm1, %v6166_v56, 0.0 }
 0xcdd   : > { %1787 = vadd.xlane.f32.xlu0 %v1786_v15  ;;  %v1795_v4 = vsel %vm6981_vm1, %v6176_v62, 0.0 }
 0xcde   : > { %v1789_v34 = vsel %vm6981_vm1, %v6172_v61, 0.0 }
 0xcdf   : > { %1790 = vadd.xlane.f32.xlu1 %v1789_v34 }
 0xce1   : > { %1793 = vadd.xlane.f32.xlu0 %v1792_v37 }
 0xce3   : > { %1796 = vadd.xlane.f32.xlu1 %v1795_v4 }
 0xd6a   : > { %v1788_v6 = vpop.xlane.xlu0 %1787 }
 0xd6b   : > { %v1798_v52 = vmul.f32 0.03125, %v1788_v6 }
 0xd6c   : > { %v1791_v53 = vpop.xlane.xlu1 %1790 }
 0xd6d   : > { %v1802_v63 = vsub.f32 %v6166_v56, %v1798_v52  ;;  %v1799_v0 = vmul.f32 0.03125, %v1791_v53 }
 0xd6e   : > { %v1794_v1 = vpop.xlane.xlu0 %1793 }
 0xd6f   : > { %v1803_v10 = vsub.f32 %v6172_v61, %v1799_v0  ;;  %v1800_v11 = vmul.f32 0.03125, %v1794_v1  ;;  %v1806_v12 = vmul.f32 %v1802_v63, %v1802_v63 }
 0xd70   : > { %v1797_v14 = vpop.xlane.xlu1 %1796 }
 0xd71   : > { %v1804_v16 = vsub.f32 %v6170_v60, %v1800_v11  ;;  %v1801_v17 = vmul.f32 0.03125, %v1797_v14  ;;  %v1810_v18 = vsel %vm6981_vm1, %v1806_v12, 0.0  ;;  %v1807_v19 = vmul.f32 %v1803_v10, %v1803_v10 }
 0xd72   : > { %1811 = vadd.xlane.f32.xlu0 %v1810_v18 }
 0xd73   : > { %v1805_v22 = vsub.f32 %v6176_v62, %v1801_v17  ;;  %v1813_v24 = vsel %vm6981_vm1, %v1807_v19, 0.0  ;;  %v1808_v25 = vmul.f32 %v1804_v16, %v1804_v16 }
 0xd74   : > { %1814 = vadd.xlane.f32.xlu1 %v1813_v24 }
 0xd75   : > { %v1816_v27 = vsel %vm6981_vm1, %v1808_v25, 0.0  ;;  %v1809_v29 = vmul.f32 %v1805_v22, %v1805_v22 }
 0xd76   : > { %1817 = vadd.xlane.f32.xlu0 %v1816_v27 }
 0xd77   : > { %v1819_v30 = vsel %vm6981_vm1, %v1809_v29, 0.0 }
 0xd78   : > { %1820 = vadd.xlane.f32.xlu1 %v1819_v30 }
 0xdff   : > { %v1812_v3 = vpop.xlane.xlu0 %1811 }
 0xe00   : > { %v1822_v7 = vmul.f32 0.03125, %v1812_v3 }
 0xe01   : > { %v1815_v8 = vpop.xlane.xlu1 %1814 }
 0xe02   : > { %v1826_v2 = vadd.f32 1e-05, %v1822_v7  ;;  %v1823_v35 = vmul.f32 0.03125, %v1815_v8 }
 0xe03   : > { %v1818_v28 = vpop.xlane.xlu0 %1817 }
 0xe04   : > { %5589 = vrsqrt.f32 %v1826_v2  ;;  %v1827_v36 = vadd.f32 1e-05, %v1823_v35  ;;  %v1824_v31 = vmul.f32 0.03125, %v1818_v28 }
 0xe05   : > { %v1821_v39 = vpop.xlane.xlu1 %1820 }
 0xe06   : > { %5591 = vrsqrt.f32 %v1827_v36  ;;  %v1828_v38 = vadd.f32 1e-05, %v1824_v31  ;;  %v1825_v40 = vmul.f32 0.03125, %v1821_v39 }
 0xe08   : > { %5593 = vrsqrt.f32 %v1828_v38  ;;  %v1829_v41 = vadd.f32 1e-05, %v1825_v40 }
 0xe0a   : > { %5595 = vrsqrt.f32 %v1829_v41 }
 0xe0e   : > { %v5590_v46 = vpop.eup %5589 }
 0xe0f   : > { %v1834_v48 = vmul.f32 %v5590_v46, %v1802_v63 }
 0xe10   : > { %v5592_v49 = vpop.eup %5591 }
 0xe11   : > { %v1835_v51 = vmul.f32 %v5592_v49, %v1803_v10  ;;  %v1842_v50 = vmul.f32 %v1841_v44, %v1834_v48  ;;  %v1864_v10 = vrot.slane %v6201_v43, %v5969_v42 }
 0xe12   : > { %v5594_v55 = vpop.eup %5593 }
 0xe13   : > { %v1836_v57 = vmul.f32 %v5594_v55, %v1804_v16  ;;  %v1843_v59 = vmul.f32 %v1841_v44, %v1835_v51  ;;  %v1850_v4 = vadd.f32 %v1849_v54, %v1842_v50 }
 0xe14   : > { %v5596_v15 = vpop.eup %5595 }
 0xe15   : > { %v1844_v34 = vmul.f32 %v1841_v44, %v1836_v57  ;;  %v1837_v37 = vmul.f32 %v5596_v15, %v1805_v22  ;;  %v1851_v6 = vadd.f32 %v1849_v54, %v1843_v59 }
 0xe17   : > { %v1845_v52 = vmul.f32 %v1841_v44, %v1837_v37  ;;  %v1859_v53 = vpack.c.bf16 %v1851_v6, %v1850_v4  ;;  %v1852_v0 = vadd.f32 %v1849_v54, %v1844_v34 }
 0xe19   : > { %5213 = vmatprep.mubr.msk.bf16.mxu0 %vm6981_vm1, %v1859_v53  ;;  %v1853_v63 = vadd.f32 %v1849_v54, %v1845_v52 }
 0xe1b   : > { %v1860_v1 = vpack.c.bf16 %v1853_v63, %v1852_v0 }
 0xe1d   : > { %5214 = vmatmul.mubr.msk.bf16.vlgmr.msra.gmra.mrb[12].mxu0 %vm6981_vm1, %v1860_v1 }
 0xef0   : > { %v5215_v11 = vpop.f32.mrb[12].mxu0 }
 0xef1   : > { %v1917_v12 = vpop.f32.mrb[13].mxu0  ;;  %v1926_v16 = vadd.f32 %v5215_v11, %v1864_v10 }
 0xef2   : > { %v5216_v14 = vpop.f32.mrb[14].mxu0  ;;  %v1918_v19 = vadd.f32 %v1917_v12, %v1864_v10 }
 0xef3   : > { %v1929_v17 = vadd.f32 %v5216_v14, %v1864_v10  ;;  %v1920_v18 = vpop.f32.mrb[15].mxu0 }
 0xef4   : > { %v1921_v22 = vadd.f32 %v1920_v18, %v1864_v10 }
 0xef5   : > { %v6211_v24 = vpack.c.bf16 %v1929_v17, %v1926_v16 }
 0xef6   : > { %v6213_v25 = vpack.c.bf16 %v1921_v22, %v1918_v19 }
 0xef7   : > { %1943 = vrot.lane.b32.xlu1 %v6211_v24, %s6971_s24 }
 0xef8   : > { %1941 = vrot.lane.b32.xlu0 %v6213_v25, %s6971_s24  ;;  %5221 = vmatprep.mubr.msk.bf16.mxu0 %vm6977_vm2, %v6213_v25  ;;  %s7012_s24 = smov 64  }
 0xf69   : > { %v1944_v30 = vpop.permute.xlu1 %1943 }
 0xf6a   : > { %v1942_v27 = vpop.permute.xlu0 %1941  ;;  %v1955_v32 = vsel %vm6977_vm2, %v1944_v30, 0 }
 0xf6b   : > { %5449 = vmatprep.subr.msk.bf16.mxu0 %vm6977_vm2, %v1942_v27  ;;  %v1952_v29 = vsel %vm6977_vm2, %v1942_v27, 0 }
 0xf6c   : > { %5218 = vmatpush3.bf16.xpose.msra.mxu0 %v1952_v29 }
 0xf6d   : > { %5450 = vmatprep.subr.msk.bf16.mxu0 %vm6977_vm2, %v1944_v30 }
 0xf74   : > { %5220 = vmatpush3.bf16.xpose.msra.mxu0 %v1955_v32 }
 0xf7b   : > { %5222 = vmatmul.mubr.msk.bf16.vlgmr.msra.gmra.mrb[16].mxu0 %vm6977_vm2, %v6211_v24 }
0x104e   : > { %v5223_v33 = vpop.f32.mrb[16].mxu0 }
0x104f   : > { %v1991_v3 = vpop.f32.mrb[17].mxu0  ;;  %v2008_v28 = vmul.f32 0.25, %v5223_v33 }
0x1050   : > { %v2006_v7 = vmul.f32 0.25, %v1991_v3  ;;  %v5224_v8 = vpop.f32.mrb[18].mxu0 }
0x1051   : > { %v2009_v2 = vmul.f32 0.25, %v5224_v8  ;;  %v1994_v35 = vpop.f32.mrb[19].mxu0  ;;  %v2012_v44 = vsel %vm6002_vm6, %v2008_v28, -1e+30 }
0x1052   : > { %v2007_v36 = vmul.f32 0.25, %v1994_v35  ;;  %v2010_v31 = vsel %vm6975_vm3, %v2006_v7, -1e+30  ;;  %v2020_v48 = vsel %vm6981_vm1, %v2012_v44, -inf }
0x1053   : > { %v2014_v39 = vsel %vm6981_vm1, %v2010_v31, -inf  ;;  %v2013_v40 = vsel %vm6002_vm6, %v2009_v2, -1e+30 }
0x1054   : > { %2015 = vmax.xlane.f32.xlu1 %v2014_v39  ;;  %v2011_v38 = vsel %vm6975_vm3, %v2007_v36, -1e+30  ;;  %v2023_v46 = vsel %vm6981_vm1, %v2013_v40, -inf }
0x1055   : > { %v2017_v41 = vsel %vm6981_vm1, %v2011_v38, -inf }
0x1056   : > { %2018 = vmax.xlane.f32.xlu0 %v2017_v41 }
0x1058   : > { %2024 = vmax.xlane.f32.xlu1 %v2023_v46 }
0x105a   : > { %2021 = vmax.xlane.f32.xlu0 %v2020_v48 }
0x1069   : > { %2062 = vrot.lane.b32.xlu1 %v6211_v24, %s6969_s25 }
0x10e1   : > { %v2016_v49 = vpop.xlane.xlu1 %2015 }
0x10e2   : > { %v2026_v55 = vsub.f32 %v2010_v31, %v2016_v49 }
0x10e3   : > { %v2019_v51 = vpop.xlane.xlu0 %2018 }
0x10e4   : > { %v2027_v50 = vsub.f32 %v2011_v38, %v2019_v51  ;;  %v2030_v4 = vmul.f32 1.442695, %v2026_v55 }
0x10e5   : > { %v2025_v54 = vpop.xlane.xlu1 %2024 }
0x10e6   : > { %v2029_v57 = vsub.f32 %v2013_v40, %v2025_v54  ;;  %v2032_v59 = vmul.f32 1.442695, %v2027_v50 }
0x10e7   : > { %v2022_v15 = vpop.xlane.xlu0 %2021 }
0x10e8   : > { %v2036_v34 = vmul.f32 1.442695, %v2029_v57  ;;  %v2028_v37 = vsub.f32 %v2012_v44, %v2022_v15 }
0x10e9   : > { %v2063_v14 = vpop.permute.xlu1 %2062 }
0x10ea   : > { %5597 = vpow2.f32 %v2036_v34  ;;  %v2034_v6 = vmul.f32 1.442695, %v2028_v37 }
0x10eb   : > { %5599 = vpow2.f32 %v2032_v59 }
0x10ec   : > { %5601 = vpow2.f32 %v2034_v6 }
0x10ed   : > { %5603 = vpow2.f32 %v2030_v4 }
0x10f4   : > { %v5598_v52 = vpop.eup %5597 }
0x10f5   : > { %v5600_v53 = vpop.eup %5599  ;;  %v2047_v0 = vsel %vm6981_vm1, %v5598_v52, 0.0 }
0x10f6   : > { %v5602_v63 = vpop.eup %5601  ;;  %2048 = vadd.xlane.f32.xlu1 %v2047_v0  ;;  %v2041_v11 = vsel %vm6981_vm1, %v5600_v53, 0.0 }
0x10f7   : > { %v2044_v1 = vsel %vm6981_vm1, %v5602_v63, 0.0  ;;  %v5604_v10 = vpop.eup %5603 }
0x10f8   : > { %2045 = vadd.xlane.f32.xlu0 %v2044_v1  ;;  %v2038_v12 = vsel %vm6981_vm1, %v5604_v10, 0.0 }
0x10fa   : > { %2042 = vadd.xlane.f32.xlu1 %v2041_v11 }
0x10fc   : > { %2039 = vadd.xlane.f32.xlu0 %v2038_v12 }
0x110b   : > { %2127 = vrot.lane.b32.xlu1 %v6213_v25, %s6967_s3 }
0x110f   : > { %2129 = vrot.lane.b32.xlu1 %v6211_v24, %s6967_s3  ;;  %s613_s3 = scalar_lea.vmem %s6994_s29, %s4831_s2 }
0x1112   : > { %2060 = vrot.lane.b32.xlu0 %v6213_v25, %s6969_s25  ;;  %s7013_s25 = smov 80  }
0x1113   : > { %2125 = vrot.lane.b32.xlu1 %v6211_v24, %s6992_s28 }
0x1116   : > { %2123 = vrot.lane.b32.xlu0 %v6213_v25, %s6992_s28 }
0x1183   : > { %v2049_v16 = vpop.xlane.xlu1 %2048 }
0x1185   : > { %v2046_v17 = vpop.xlane.xlu0 %2045 }
0x1186   : > { %5605 = vrcp.f32 %v2046_v17 }
0x1187   : > { %v2043_v18 = vpop.xlane.xlu1 %2042 }
0x1188   : > { %5607 = vrcp.f32 %v2043_v18 }
0x1189   : > { %5609 = vrcp.f32 %v2049_v16  ;;  %v2040_v19 = vpop.xlane.xlu0 %2039 }
0x118a   : > { %5611 = vrcp.f32 %v2040_v19 }
0x118b   : > { %v2128_v32 = vpop.permute.xlu1 %2127 }
0x118c   : > { %v2138_v31 = vsel %vm6977_vm2, %v2128_v32, 0 }
0x118d   : > { %v2061_v22 = vpop.permute.xlu0 %2060 }
0x118e   : > { %5225 = vmatprep.subr.bf16.mxu1 %v2061_v22 }
0x118f   : > { %5226 = vmatpush3.bf16.msra.mxu1 %v2061_v22  ;;  %v2130_v39 = vpop.permute.xlu1 %2129 }
0x1190   : > { %5227 = vmatprep.subr.bf16.mxu1 %v2063_v14  ;;  %v5606_v27 = vpop.eup %5605  ;;  %v2141_v38 = vsel %vm6977_vm2, %v2130_v39, 0 }
0x1191   : > { %v2056_v3 = vmul.f32 %v5606_v27, %v5602_v63  ;;  %v2124_v36 = vpop.permute.xlu0 %2123 }
0x1192   : > { %v5608_v29 = vpop.eup %5607 }
0x1193   : > { %v5610_v30 = vpop.eup %5609  ;;  %5228 = vmatpush3.bf16.msra.mxu1 %v2063_v14  ;;  %v2055_v8 = vmul.f32 %v5608_v29, %v5600_v53  ;;  %v2126_v40 = vpop.permute.xlu1 %2125 }
0x1194   : > { %v5612_v33 = vpop.eup %5611  ;;  %5451 = vmatprep.subr.msk.bf16.mxu1 %vm6977_vm2, %v2128_v32  ;;  %v2057_v2 = vmul.f32 %v5610_v30, %v5598_v52 }
0x1195   : > { %v2054_v7 = vmul.f32 %v5612_v33, %v5604_v10 }
0x1196   : > { %v2059_v28 = vpack.c.bf16 %v2057_v2, %v2056_v3 }
0x1197   : > { %v2058_v35 = vpack.c.bf16 %v2055_v8, %v2054_v7 }
0x1199   : > { %5229 = vmatprep.mubr.msk.bf16.mxu1 %vm6981_vm1, %v2058_v35 }
0x119a   : > { %5230 = vmatmul.mubr.msk.bf16.vlgmr.msra.gmra.mrb[28].mxu1 %vm6981_vm1, %v2059_v28 }
0x119b   : > { %5237 = vmatprep.mubr.msk.bf16.mxu1 %vm6977_vm2, %v2124_v36 }
0x119c   : > { %5234 = vmatpush3.bf16.xpose.msra.mxu1 %v2138_v31 }
0x119d   : > { %5452 = vmatprep.subr.msk.bf16.mxu1 %vm6977_vm2, %v2130_v39 }
0x11a4   : > { %5236 = vmatpush3.bf16.xpose.msra.mxu1 %v2141_v38 }
0x11ab   : > { %5238 = vmatmul.mubr.msk.bf16.vlgmr.msra.gmra.mrb[32].mxu1 %vm6977_vm2, %v2126_v40 }
0x126d   : > { %v6263_v41 = vpop.f32.mrb[28].mxu1 }
0x126e   : > { %v6265_v44 = vpop.f32.mrb[29].mxu1 }
0x126f   : > { %v6267_v46 = vpop.f32.mrb[30].mxu1 }
0x1270   : > { %v2122_v48 = vpack.c.bf16 %v6267_v46, %v6263_v41  ;;  %v6271_v49 = vpop.f32.mrb[31].mxu1 }
0x1271   : > { %v2121_v51 = vpack.c.bf16 %v6271_v49, %v6265_v44  ;;  %v5508_v49 = vld [vmem:[%s6950_s9 + $0x8] sm:$0xff]  }
0x127e   : > { %v5239_v50 = vpop.f32.mrb[32].mxu1 }
0x127f   : > { %v2177_v54 = vpop.f32.mrb[33].mxu1  ;;  %v2194_v55 = vmul.f32 0.25, %v5239_v50 }
0x1280   : > { %v2192_v57 = vmul.f32 0.25, %v2177_v54  ;;  %v5240_v59 = vpop.f32.mrb[34].mxu1  ;;  %v5505_v54 = vld [vmem:[%s6946_s5 + $0x18] sm:$0xff]  }
0x1281   : > { %v2180_v15 = vpop.f32.mrb[35].mxu1  ;;  %v2195_v6 = vmul.f32 0.25, %v5240_v59  ;;  %v2198_v53 = vsel %vm6002_vm6, %v2194_v55, -1e+30 }
0x1282   : > { %v2193_v34 = vmul.f32 0.25, %v2180_v15  ;;  %v2196_v37 = vsel %vm6975_vm3, %v2192_v57, -1e+30  ;;  %v2206_v63 = vsel %vm6981_vm1, %v2198_v53, -inf }
0x1283   : > { %v2200_v4 = vsel %vm6981_vm1, %v2196_v37, -inf  ;;  %v2199_v1 = vsel %vm6002_vm6, %v2195_v6, -1e+30 }
0x1284   : > { %2201 = vmax.xlane.f32.xlu0 %v2200_v4  ;;  %v2197_v52 = vsel %vm6975_vm3, %v2193_v34, -1e+30  ;;  %v2209_v10 = vsel %vm6981_vm1, %v2199_v1, -inf  ;;  %vm2851_vm3 = vcmp.lt.s32.totalorder %v5990_v58, 12 }
0x1285   : > { %v2203_v0 = vsel %vm6981_vm1, %v2197_v52, -inf }
0x1286   : > { %2204 = vmax.xlane.f32.xlu1 %v2203_v0  ;;  %v619_v0 = vld [vmem:[%s6959_s18] sm:$0xff] }
0x1288   : > { %2207 = vmax.xlane.f32.xlu0 %v2206_v63  ;;  %v2795_v63 = vld [vmem:[%s613_s3] sm:$0xff]  ;;  %s5749_s3 = smov 16  }
0x128c   : > { %2210 = vmax.xlane.f32.xlu0 %v2209_v10 }
0x1311   : > { %v2202_v11 = vpop.xlane.xlu0 %2201 }
0x1312   : > { %v2212_v12 = vsub.f32 %v2196_v37, %v2202_v11 }
0x1313   : > { %v2205_v14 = vpop.xlane.xlu1 %2204 }
0x1314   : > { %v2216_v18 = vmul.f32 1.442695, %v2212_v12  ;;  %v2213_v19 = vsub.f32 %v2197_v52, %v2205_v14  ;;  %v2797_v12 = vrot.slane %v619_v0, 2  ;;  %v2804_v14 = vrot.slane %v2795_v63, 6 }
0x1315   : > { %v2208_v16 = vpop.xlane.xlu0 %2207 }
0x1316   : > { %v2214_v17 = vsub.f32 %v2198_v53, %v2208_v16  ;;  %v2218_v30 = vmul.f32 1.442695, %v2213_v19  ;;  %v5506_v53 = vld [vmem:[%s6946_s5 + $0x10] sm:$0xff]   ;;  %v5507_v19 = vld [vmem:[%s6950_s9] sm:$0xff]  }
0x1318   : > { %v2220_v22 = vmul.f32 1.442695, %v2214_v17 }
0x1319   : > { %v2211_v27 = vpop.xlane.xlu0 %2210 }
0x131a   : > { %5613 = vpow2.f32 %v2220_v22  ;;  %v2215_v29 = vsub.f32 %v2199_v1, %v2211_v27  ;;  %v2800_v22 = vrot.slane %v2795_v63, 4  ;;  %v2806_v27 = vsel %vm6978_vm7, %v2797_v12, %v2804_v14 }
0x131b   : > { %5615 = vpow2.f32 %v2216_v18 }
0x131c   : > { %v2222_v32 = vmul.f32 1.442695, %v2215_v29  ;;  %v2807_v29 = vsel %vm6978_vm7, %v2797_v12, %v2795_v63 }
0x131e   : > { %5617 = vpow2.f32 %v2222_v32  ;;  %v2812_v32 = vrot.slane %v2806_v27, 2 }
0x131f   : > { %5619 = vpow2.f32 %v2218_v30  ;;  %v2808_v30 = vrot.slane %v2795_v63, 2 }
0x1324   : > { %v5614_v33 = vpop.eup %5613 }
0x1325   : > { %v2230_v3 = vsel %vm6981_vm1, %v5614_v33, 0.0  ;;  %v5616_v7 = vpop.eup %5615 }
0x1326   : > { %2231 = vadd.xlane.f32.xlu0 %v2230_v3  ;;  %v2224_v2 = vsel %vm6981_vm1, %v5616_v7, 0.0  ;;  %v2803_v3 = vsel %vm6978_vm7, %v2797_v12, %v2800_v22 }
0x1328   : > { %v5618_v8 = vpop.eup %5617 }
0x1329   : > { %v2233_v35 = vsel %vm6981_vm1, %v5618_v8, 0.0  ;;  %v5620_v28 = vpop.eup %5619 }
0x132a   : > { %2225 = vadd.xlane.f32.xlu0 %v2224_v2  ;;  %2234 = vadd.xlane.f32.xlu1 %v2233_v35  ;;  %v2227_v36 = vsel %vm6981_vm1, %v5620_v28, 0.0  ;;  %v2810_v2 = vsel %vm6978_vm7, %v2797_v12, %v2808_v30 }
0x132b   : > { %v2818_v44 = vrot.slane %v2810_v2, 6 }
0x132e   : > { %2228 = vadd.xlane.f32.xlu1 %v2227_v36 }
0x133f   : > { %2248 = vrot.lane.b32.xlu1 %v6211_v24, %s6993_s20 }
0x1340   : > { %2246 = vrot.lane.b32.xlu0 %v6213_v25, %s6993_s20 }
0x13b3   : > { %v2232_v31 = vpop.xlane.xlu0 %2231 }
0x13b7   : > { %v2226_v39 = vpop.xlane.xlu0 %2225  ;;  %v2235_v38 = vpop.xlane.xlu1 %2234 }
0x13b8   : > { %5621 = vrcp.f32 %v2235_v38 }
0x13b9   : > { %5623 = vrcp.f32 %v2226_v39 }
0x13ba   : > { %5625 = vrcp.f32 %v2232_v31  ;;  %v2438_v31 = vrot.slane %v6201_v43, %v6090_v26 }
0x13bb   : > { %v2247_v40 = vpop.permute.xlu0 %2246  ;;  %v2229_v50 = vpop.xlane.xlu1 %2228 }
0x13bc   : > { %5627 = vrcp.f32 %v2229_v50  ;;  %5241 = vmatprep.subr.bf16.mxu0 %v2247_v40  ;;  %v6353_v50 = vld [vmem:[%s6959_s18 + $0x8] sm:$0xff] }
0x13bd   : > { %5242 = vmatpush3.bf16.msra.mxu0 %v2247_v40 }
0x13bf   : > { %v2249_v55 = vpop.permute.xlu1 %2248 }
0x13c0   : > { %5243 = vmatprep.subr.bf16.mxu0 %v2249_v55 }
0x13c1   : > { %5244 = vmatpush3.bf16.msra.mxu0 %v2249_v55 }
0x13c2   : > { %5249 = vmatprep.subr.bf16.mxu0 %v5505_v54  ;;  %v5622_v24 = vpop.eup %5621 }
0x13c3   : > { %v5624_v25 = vpop.eup %5623  ;;  %v2243_v15 = vmul.f32 %v5622_v24, %v5618_v8 }
0x13c4   : > { %v5626_v57 = vpop.eup %5625  ;;  %v2240_v34 = vmul.f32 %v5624_v25, %v5616_v7  ;;  %v6322_v7 = vsel %vm2820_vm8, %v2803_v3, %v2812_v32 }
0x13c5   : > { %v2242_v4 = vmul.f32 %v5626_v57, %v5614_v33  ;;  %v2815_v33 = vrot.slane %v2807_v29, 4 }
0x13c6   : > { %v5628_v59 = vpop.eup %5627 }
0x13c7   : > { %v2241_v37 = vmul.f32 %v5628_v59, %v5620_v28  ;;  %v2245_v52 = vpack.c.bf16 %v2243_v15, %v2242_v4  ;;  %v6325_v8 = vsel %vm6978_vm7, %v2812_v32, %v2815_v33  ;;  %vm6447_vm7 = vmand %vm2848_vm5, %vm2851_vm3 }
0x13c8   : > { %v2902_v35 = vpack.c.bf16 %v6325_v8, %v6322_v7 }
0x13c9   : > { %v2244_v6 = vpack.c.bf16 %v2241_v37, %v2240_v34 }
0x13cb   : > { %5245 = vmatprep.mubr.msk.bf16.mxu0 %vm6981_vm1, %v2244_v6 }
0x13cc   : > { %5246 = vmatmul.mubr.msk.bf16.vlgmr.msra.gmra.mrb[20].mxu0 %vm6981_vm1, %v2245_v52 }
0x13cd   : > { %5250 = vmatpush3.bf16.msra.mxu0 %v5505_v54 }
0x13ce   : > { %5255 = vmatprep.subr.bf16.mxu0 %v5506_v53 }
0x149f   : > { %v5247_v1 = vpop.f32.mrb[20].mxu0 }
0x14a0   : > { %v2292_v10 = vpop.f32.mrb[21].mxu0 }
0x14a1   : > { %v5248_v11 = vpop.f32.mrb[22].mxu0 }
0x14a2   : > { %v2308_v16 = vpack.c.bf16 %v5248_v11, %v5247_v1  ;;  %v2295_v17 = vpop.f32.mrb[23].mxu0 }
0x14a3   : > { %v2307_v18 = vpack.c.bf16 %v2295_v17, %v2292_v10 }
0x14a5   : > { %5251 = vmatprep.mubr.msk.bf16.mxu0 %vm6977_vm2, %v2307_v18 }
0x14a6   : > { %5252 = vmatmul.mubr.msk.bf16.vlgmr.msra.gmra.mrb[24].mxu0 %vm6977_vm2, %v2308_v16 }
0x14a7   : > { %5256 = vmatpush3.bf16.msra.mxu0 %v5506_v53  ;;  %5257 = vmatprep.mubr.msk.bf16.mxu0 %vm6977_vm2, %v2121_v51  ;;  %v6339_v51 = vsel %vm6973_vm9, %v2815_v33, %v2818_v44 }
0x14a8   : > { %5281 = vmatprep.subr.bf16.mxu0 %v5507_v19  ;;  %v2903_v28 = vpack.c.bf16 %v6339_v51, %v6339_v51 }
0x14b2   : > { %5258 = vmatmul.mubr.msk.bf16.vlgmr.msra.gmra.mrb[24].mxu0 %vm6977_vm2, %v2122_v48 }
0x14b3   : > { %5282 = vmatpush3.bf16.msra.mxu0 %v5507_v19  ;;  %5285 = vmatprep.mubr.msk.bf16.mxu0 %vm6981_vm1, %v2902_v35 }
0x14b4   : > { %5283 = vmatprep.subr.bf16.mxu0 %v5508_v49 }
0x14b7   : > { %5284 = vmatpush3.bf16.msra.mxu0 %v5508_v49 }
0x14ba   : > { %5286 = vmatmul.mubr.msk.bf16.vlgmr.msra.gmra.mrb[28].mxu0 %vm6981_vm1, %v2903_v28 }
0x1585   : > { %v5259_v36 = vpop.f32.mrb[24].mxu0 }
0x1586   : > { %v2416_v41 = vpop.f32.mrb[25].mxu0  ;;  %v2433_v46 = vadd.f32 %v5259_v36, %v6170_v60 }
0x1587   : > { %v2431_v48 = vadd.f32 %v2416_v41, %v6166_v56  ;;  %v5260_v39 = vpop.f32.mrb[26].mxu0  ;;  %v2907_v56 = vrot.slane %v6353_v50, %v6129_v21 }
0x1588   : > { %v2419_v38 = vpop.f32.mrb[27].mxu0  ;;  %v6355_v54 = vadd.f32 %v2438_v31, %v2433_v46  ;;  %v2434_v55 = vadd.f32 %v5260_v39, %v6176_v62  ;;  %v5509_v46 = vld [vmem:[%s6947_s6 + $0x10] sm:$0xff]  }
0x1589   : > { %v6348_v40 = vadd.f32 %v2438_v31, %v2431_v48  ;;  %v2432_v0 = vadd.f32 %v2419_v38, %v6172_v61  ;;  %5261 = vmatprep.subr.bf16.mxu1 %v5509_v46  ;;  %v5510_v48 = vld [vmem:[%s6947_s6 + $0x18] sm:$0xff]  }
0x158a   : > { %v6362_v57 = vadd.f32 %v2438_v31, %v2434_v55  ;;  %v2449_v15 = vsel %vm6981_vm1, %v6355_v54, 0.0  ;;  %5262 = vmatpush3.bf16.msra.mxu1 %v5509_v46 }
0x158b   : > { %v2443_v24 = vsel %vm6981_vm1, %v6348_v40, 0.0  ;;  %v6379_v63 = vadd.f32 %v2438_v31, %v2432_v0  ;;  %5263 = vmatprep.subr.bf16.mxu1 %v5510_v48 }
0x158c   : > { %2444 = vadd.xlane.f32.xlu0 %v2443_v24  ;;  %v2452_v52 = vsel %vm6981_vm1, %v6362_v57, 0.0 }
0x158d   : > { %v5287_v60 = vpop.f32.mrb[28].mxu0  ;;  %v2446_v1 = vsel %vm6981_vm1, %v6379_v63, 0.0 }
0x158e   : > { %v2960_v25 = vpop.f32.mrb[29].mxu0  ;;  %v2969_v62 = vadd.f32 %v5287_v60, %v2907_v56  ;;  %5264 = vmatpush3.bf16.msra.mxu1 %v5510_v48  ;;  %v791_v60 = vadd.s32 16, %v5949_v9 }
0x158f   : > { %v5288_v59 = vpop.f32.mrb[30].mxu0  ;;  %v2961_v37 = vadd.f32 %v2960_v25, %v2907_v56  ;;  %v6421_v25 = vadd.s32 8, %v5949_v9 }
0x1590   : > { %2450 = vadd.xlane.f32.xlu0 %v2449_v15  ;;  %v2963_v34 = vpop.f32.mrb[31].mxu0  ;;  %v6374_v53 = vpack.c.bf16 %v2969_v62, %v2969_v62  ;;  %vm2863_vm11 = vcmp.lt.s32.totalorder %v791_v60, 18  ;;  %vm2880_vm12 = vcmp.ge.s32.totalorder %v791_v60, 18 }
0x1591   : > { %v2964_v4 = vadd.f32 %v2963_v34, %v2907_v56  ;;  %vm6980_vm8 = vcmp.lt.s32.totalorder %v6421_v25, 12  ;;  %vm6431_vm9 = vmand %vm2863_vm11, %vm2867_vm10 }
0x1592   : > { %vm2849_vm11 = vmand %vm6980_vm8, %vm2847_vm13  ;;  %vm2871_vm13 = vcmp.lt.s32.totalorder %v5990_v58, 18  ;;  %vm2891_vm8 = vcmp.lt.s32.totalorder %v5990_v58, 24 }
0x1593   : > { %v6366_v6 = vpack.c.bf16 %v2964_v4, %v2961_v37  ;;  %vm6456_vm15 = vmand %vm2849_vm11, %vm2851_vm3  ;;  %vm3052_vm11 = vcmask 195584  }
0x1594   : > { %2453 = vadd.xlane.f32.xlu0 %v2452_v52  ;;  %vm2890_vm5 = vmand %vm2880_vm12, %vm2887_vm0  ;;  %vm7010_vm12 = vcmask 261120  }
0x1595   : > { %2982 = vrot.lane.b32.xlu1 %v6366_v6, %s6995_s23  ;;  %5293 = vmatprep.mubr.msk.bf16.mxu0 %vm6977_vm2, %v6366_v6  ;;  %vm6471_vm3 = vmand %vm6431_vm9, %vm2871_vm13 }
0x1596   : > { %vm2855_vm0 = vmor %vm6438_vm4, %vm6447_vm7 }
0x1599   : > { %2984 = vrot.lane.b32.xlu1 %v6374_v53, %s6995_s23 }
0x15bd   : > { %2447 = vadd.xlane.f32.xlu1 %v2446_v1 }
0x1607   : > { %v2983_v10 = vpop.permute.xlu1 %2982 }
0x1608   : > { %v2993_v11 = vsel %vm6977_vm2, %v2983_v10, 0  ;;  %5453 = vmatprep.subr.msk.bf16.mxu0 %vm6977_vm2, %v2983_v10 }
0x1609   : > { %5290 = vmatpush3.bf16.xpose.msra.mxu0 %v2993_v11 }
0x160b   : > { %v2985_v12 = vpop.permute.xlu1 %2984 }
0x160c   : > { %5454 = vmatprep.subr.msk.bf16.mxu0 %vm6977_vm2, %v2985_v12  ;;  %v2996_v14 = vsel %vm6977_vm2, %v2985_v12, 0 }
0x1611   : > { %5292 = vmatpush3.bf16.xpose.msra.mxu0 %v2996_v14 }
0x1618   : > { %5294 = vmatmul.mubr.msk.bf16.vlgmr.msra.gmra.mrb[32].mxu0 %vm6977_vm2, %v6374_v53  ;;  %vm6982_vm2 = vcmp.ge.s32.totalorder %v6421_v25, 12 }
0x1619   : > { %v2445_v61 = vpop.xlane.xlu0 %2444  ;;  %vm2869_vm14 = vmand %vm6982_vm2, %vm2867_vm10 }
0x161a   : > { %v2455_v16 = vmul.f32 0.03125, %v2445_v61  ;;  %v2498_v61 = vrot.slane %v6201_v43, %v6129_v21  ;;  %vm6475_vm10 = vmand %vm2890_vm5, %vm2891_vm8 }
0x161b   : > { %vm2897_vm8 = vmor %vm6471_vm3, %vm6475_vm10 }
0x161c   : > { %v6390_v17 = vsub.f32 %v6348_v40, %v2455_v16 }
0x161d   : > { %v2451_v18 = vpop.xlane.xlu0 %2450 }
0x161e   : > { %v2457_v19 = vmul.f32 0.03125, %v2451_v18  ;;  %v2463_v22 = vmul.f32 %v6390_v17, %v6390_v17 }
0x1620   : > { %v6395_v27 = vsub.f32 %v6355_v54, %v2457_v19  ;;  %v2467_v29 = vsel %vm6981_vm1, %v2463_v22, 0.0 }
0x1621   : > { %2468 = vadd.xlane.f32.xlu0 %v2467_v29  ;;  %v2454_v33 = vpop.xlane.xlu0 %2453 }
0x1622   : > { %v2465_v30 = vmul.f32 %v6395_v27, %v6395_v27  ;;  %v2458_v3 = vmul.f32 0.03125, %v2454_v33 }
0x1624   : > { %v2473_v32 = vsel %vm6981_vm1, %v2465_v30, 0.0  ;;  %v6402_v44 = vsub.f32 %v6362_v57, %v2458_v3 }
0x1625   : > { %2474 = vadd.xlane.f32.xlu0 %v2473_v32 }
0x1626   : > { %v2466_v31 = vmul.f32 %v6402_v44, %v6402_v44 }
0x1628   : > { %v2476_v41 = vsel %vm6981_vm1, %v2466_v31, 0.0 }
0x164a   : > { %v2448_v2 = vpop.xlane.xlu1 %2447 }
0x164b   : > { %v2456_v35 = vmul.f32 0.03125, %v2448_v2 }
0x164d   : > { %v6405_v49 = vsub.f32 %v6379_v63, %v2456_v35  ;;  %v2506_v35 = vrot.slane %v6201_v43, %v6134_v23 }
0x164f   : > { %v2464_v28 = vmul.f32 %v6405_v49, %v6405_v49 }
0x1651   : > { %v2470_v36 = vsel %vm6981_vm1, %v2464_v28, 0.0  ;;  %vm6462_vm1 = vmand %vm2869_vm14, %vm2871_vm13  ;;  %vm7014_vm13 = vcmask 523264  }
0x1652   : > { %2471 = vadd.xlane.f32.xlu1 %v2470_v36  ;;  %vm2876_vm9 = vmor %vm6456_vm15, %vm6462_vm1  ;;  %vm7026_vm1 = vcmask 261120   ;;  %vm7030_vm15 = vcmask 1043456  }
0x1653   : > { %vm7011_vm14 = vmmov %vm7010_vm12 }
0x1654   : > { %vm7015_vm5 = vmmov %vm7014_vm13 }
0x1655   : > { %vm7028_vm4 = vmmov %vm7026_vm1 }
0x1656   : > { %2477 = vadd.xlane.f32.xlu1 %v2476_v41  ;;  %vm7029_vm7 = vmmov %vm7026_vm1 }
0x1657   : > { %vm7031_vm3 = vmmov %vm7030_vm15 }
0x16ae   : > { %v2469_v39 = vpop.xlane.xlu0 %2468 }
0x16af   : > { %v2479_v38 = vmul.f32 0.03125, %v2469_v39 }
0x16b1   : > { %v2483_v24 = vadd.f32 1e-05, %v2479_v38 }
0x16b2   : > { %v2475_v55 = vpop.xlane.xlu0 %2474 }
0x16b3   : > { %v2481_v56 = vmul.f32 0.03125, %v2475_v55  ;;  %5629 = vrsqrt.f32 %v2483_v24 }
0x16b5   : > { %v2485_v59 = vadd.f32 1e-05, %v2481_v56 }
0x16b7   : > { %5631 = vrsqrt.f32 %v2485_v59 }
0x16bd   : > { %v5630_v10 = vpop.eup %5629 }
0x16be   : > { %v2491_v14 = vmul.f32 %v5630_v10, %v6390_v17  ;;  %v5514_v10 = vld [vmem:[%s6948_s7 + $0x38] sm:$0xff]  }
0x16c0   : > { %v2499_v2 = vmul.f32 %v2498_v61, %v2491_v14 }
0x16c1   : > { %v5632_v22 = vpop.eup %5631 }
0x16c2   : > { %v2493_v28 = vmul.f32 %v5632_v22, %v6395_v27  ;;  %v2507_v56 = vadd.f32 %v2506_v35, %v2499_v2 }
0x16c4   : > { %v2501_v55 = vmul.f32 %v2498_v61, %v2493_v28 }
0x16c6   : > { %v2509_v37 = vadd.f32 %v2506_v35, %v2501_v55 }
0x16df   : > { %v2472_v15 = vpop.xlane.xlu1 %2471 }
0x16e0   : > { %v2480_v34 = vmul.f32 0.03125, %v2472_v15 }
0x16e2   : > { %v2484_v4 = vadd.f32 1e-05, %v2480_v34 }
0x16e3   : > { %v2478_v62 = vpop.xlane.xlu1 %2477 }
0x16e4   : > { %5633 = vrsqrt.f32 %v2484_v4  ;;  %v2482_v52 = vmul.f32 0.03125, %v2478_v62 }
0x16e6   : > { %v2486_v1 = vadd.f32 1e-05, %v2482_v52  ;;  %v5511_v52 = vld [vmem:[%s6948_s7 + $0x20] sm:$0xff]  }
0x16e7   : > { %5269 = vmatprep.subr.bf16.mxu1 %v5511_v52 }
0x16e8   : > { %5635 = vrsqrt.f32 %v2486_v1  ;;  %v5513_v1 = vld [vmem:[%s6948_s7 + $0x30] sm:$0xff]  }
0x16eb   : > { %v5295_v18 = vpop.f32.mrb[32].mxu0 }
0x16ec   : > { %v3032_v29 = vpop.f32.mrb[33].mxu0  ;;  %v3048_v17 = vmul.f32 0.25, %v5295_v18 }
0x16ed   : > { %v3046_v30 = vmul.f32 0.25, %v3032_v29  ;;  %v5296_v32 = vpop.f32.mrb[34].mxu0 }
0x16ee   : > { %v5634_v33 = vpop.eup %5633  ;;  %v3035_v3 = vpop.f32.mrb[35].mxu0  ;;  %v3051_v27 = vsel %vm2897_vm8, %v3048_v17, -1e+30 }
0x16ef   : > { %v2492_v36 = vmul.f32 %v5634_v33, %v6405_v49  ;;  %v3047_v31 = vmul.f32 0.25, %v3035_v3  ;;  %v3049_v41 = vsel %vm2855_vm0, %v3046_v30, -1e+30  ;;  %v3059_v59 = vsel %vm3052_vm11, %v3051_v27, -inf }
0x16f0   : > { %v3053_v46 = vsel %vm3052_vm11, %v3049_v41, -inf }
0x16f1   : > { %3054 = vmax.xlane.f32.xlu0 %v3053_v46  ;;  %v3050_v48 = vsel %vm2876_vm9, %v3047_v31, -1e+30  ;;  %v2500_v49 = vmul.f32 %v2498_v61, %v2492_v36 }
0x16f2   : > { %v5636_v39 = vpop.eup %5635  ;;  %v3056_v38 = vsel %vm3052_vm11, %v3050_v48, -inf }
0x16f3   : > { %v2494_v24 = vmul.f32 %v5636_v39, %v6402_v44  ;;  %3057 = vmax.xlane.f32.xlu1 %v3056_v38  ;;  %v2508_v60 = vadd.f32 %v2506_v35, %v2500_v49  ;;  %v5512_v44 = vld [vmem:[%s6948_s7 + $0x28] sm:$0xff]  }
0x16f5   : > { %v2502_v15 = vmul.f32 %v2498_v61, %v2494_v24  ;;  %3060 = vmax.xlane.f32.xlu0 %v3059_v59  ;;  %v2516_v34 = vpack.c.bf16 %v2508_v60, %v2507_v56 }
0x16f7   : > { %5265 = vmatprep.mubr.msk.bf16.mxu1 %vm7010_vm12, %v2516_v34  ;;  %v2510_v4 = vadd.f32 %v2506_v35, %v2502_v15  ;;  %vm7016_vm12 = vcmask 1043456  }
0x16f9   : > { %v2517_v62 = vpack.c.bf16 %v2510_v4, %v2509_v37 }
0x16fb   : > { %5266 = vmatmul.mubr.msk.bf16.vlgmr.msra.gmra.mrb[36].mxu1 %vm7011_vm14, %v2517_v62  ;;  %vm7017_vm14 = vmmov %vm7016_vm12 }
0x16fc   : > { %5270 = vmatpush3.bf16.msra.mxu1 %v5511_v52 }
0x16fd   : > { %5271 = vmatprep.subr.bf16.mxu1 %v5512_v44 }
0x1700   : > { %5272 = vmatpush3.bf16.msra.mxu1 %v5512_v44 }
0x1701   : > { %5273 = vmatprep.subr.bf16.mxu1 %v5513_v1 }
0x1704   : > { %5274 = vmatpush3.bf16.msra.mxu1 %v5513_v1 }
0x1705   : > { %5275 = vmatprep.subr.bf16.mxu1 %v5514_v10 }
0x1708   : > { %5276 = vmatpush3.bf16.msra.mxu1 %v5514_v10 }
0x177e   : > { %v3055_v14 = vpop.xlane.xlu0 %3054 }
0x177f   : > { %v3062_v18 = vsub.f32 %v3049_v41, %v3055_v14  ;;  %v2521_v41 = vrot.slane %v6201_v43, %v6153_v47 }
0x1780   : > { %v3058_v61 = vpop.xlane.xlu1 %3057 }
0x1781   : > { %v3063_v22 = vsub.f32 %v3050_v48, %v3058_v61  ;;  %v3065_v32 = vmul.f32 1.442695, %v3062_v18 }
0x1782   : > { %v3061_v29 = vpop.xlane.xlu0 %3060 }
0x1783   : > { %v3067_v17 = vmul.f32 1.442695, %v3063_v22  ;;  %v3064_v30 = vsub.f32 %v3051_v27, %v3061_v29 }
0x1785   : > { %5637 = vpow2.f32 %v3067_v17  ;;  %v3069_v33 = vmul.f32 1.442695, %v3064_v30 }
0x1787   : > { %5639 = vpow2.f32 %v3069_v33 }
0x1788   : > { %5641 = vpow2.f32 %v3065_v32 }
0x178f   : > { %v6528_v3 = vpop.eup %5637 }
0x1790   : > { %v3074_v2 = vsel %vm3052_vm11, %v6528_v3, 0.0 }
0x1791   : > { %v6532_v35 = vpop.eup %5639  ;;  %3075 = vadd.xlane.f32.xlu0 %v3074_v2 }
0x1792   : > { %v3077_v28 = vsel %vm3052_vm11, %v6532_v35, 0.0  ;;  %v6536_v36 = vpop.eup %5641 }
0x1793   : > { %3078 = vadd.xlane.f32.xlu1 %v3077_v28  ;;  %v3071_v31 = vsel %vm3052_vm11, %v6536_v36, 0.0 }
0x1797   : > { %3072 = vadd.xlane.f32.xlu1 %v3071_v31 }
0x17a7   : > { %3088 = vrot.lane.b32.xlu0 %v6366_v6, %s7012_s24 }
0x17a8   : > { %3090 = vrot.lane.b32.xlu1 %v6374_v53, %s7012_s24  ;;  %s5748_s24 = smov 32  }
0x17ab   : > { %3152 = vrot.lane.b32.xlu0 %v6366_v6, %s6992_s28 }
0x17ac   : > { %3156 = vrot.lane.b32.xlu1 %v6366_v6, %s7013_s25 }
0x17b0   : > { %3158 = vrot.lane.b32.xlu1 %v6374_v53, %s7013_s25 }
0x17b4   : > { %3154 = vrot.lane.b32.xlu1 %v6374_v53, %s6992_s28 }
0x17ce   : > { %v5267_v46 = vpop.f32.mrb[36].mxu1 }
0x17cf   : > { %v2583_v48 = vadd.f32 %v5267_v46, %v2521_v41  ;;  %v2574_v27 = vpop.f32.mrb[37].mxu1 }
0x17d0   : > { %v2575_v49 = vadd.f32 %v2574_v27, %v2521_v41  ;;  %v5268_v39 = vpop.f32.mrb[38].mxu1 }
0x17d1   : > { %v2591_v38 = vmul.f32 %v2583_v48, %v2583_v48  ;;  %v2586_v55 = vadd.f32 %v5268_v39, %v2521_v41  ;;  %v2577_v24 = vpop.f32.mrb[39].mxu1 }
0x17d2   : > { %v2589_v56 = vmul.f32 %v2575_v49, %v2575_v49  ;;  %v2578_v60 = vadd.f32 %v2577_v24, %v2521_v41 }
0x17d3   : > { %v2595_v59 = vmul.f32 %v2591_v38, %v2583_v48  ;;  %v2592_v15 = vmul.f32 %v2586_v55, %v2586_v55 }
0x17d4   : > { %v2593_v34 = vmul.f32 %v2589_v56, %v2575_v49  ;;  %v2590_v37 = vmul.f32 %v2578_v60, %v2578_v60 }
0x17d5   : > { %v2599_v4 = vmul.f32 0.044715, %v2595_v59  ;;  %v2596_v62 = vmul.f32 %v2592_v15, %v2586_v55 }
0x17d6   : > { %v2597_v52 = vmul.f32 0.044715, %v2593_v34  ;;  %v2594_v44 = vmul.f32 %v2590_v37, %v2578_v60 }
0x17d7   : > { %v2603_v1 = vadd.f32 %v2599_v4, %v2583_v48  ;;  %v2600_v43 = vmul.f32 0.044715, %v2596_v62 }
0x17d8   : > { %v2601_v10 = vadd.f32 %v2597_v52, %v2575_v49  ;;  %v2598_v14 = vmul.f32 0.044715, %v2594_v44 }
0x17d9   : > { %v2607_v61 = vmul.f32 0.7978846, %v2603_v1  ;;  %v2604_v18 = vadd.f32 %v2600_v43, %v2586_v55 }
0x17da   : > { %v2605_v22 = vmul.f32 0.7978846, %v2601_v10  ;;  %v2602_v29 = vadd.f32 %v2598_v14, %v2578_v60 }
0x17db   : > { %5643 = vtanh.f32 %v2607_v61  ;;  %v2608_v17 = vmul.f32 0.7978846, %v2604_v18 }
0x17dc   : > { %5645 = vtanh.f32 %v2605_v22  ;;  %v2606_v30 = vmul.f32 0.7978846, %v2602_v29 }
0x17dd   : > { %5647 = vtanh.f32 %v2608_v17 }
0x17de   : > { %5649 = vtanh.f32 %v2606_v30 }
0x17e5   : > { %v5644_v32 = vpop.eup %5643 }
0x17e6   : > { %v5646_v33 = vpop.eup %5645  ;;  %v2615_v2 = vadd.f32 1.0, %v5644_v32 }
0x17e7   : > { %v5648_v28 = vpop.eup %5647  ;;  %v2613_v31 = vadd.f32 1.0, %v5646_v33 }
0x17e8   : > { %v5650_v41 = vpop.eup %5649  ;;  %v2619_v46 = vmul.f32 0.5, %v2615_v2  ;;  %v2616_v27 = vadd.f32 1.0, %v5648_v28 }
0x17e9   : > { %v2617_v39 = vmul.f32 0.5, %v2613_v31  ;;  %v2614_v38 = vadd.f32 1.0, %v5650_v41 }
0x17ea   : > { %v2620_v24 = vmul.f32 0.5, %v2616_v27  ;;  %v2623_v59 = vmul.f32 %v2619_v46, %v2583_v48 }
0x17eb   : > { %v2618_v56 = vmul.f32 0.5, %v2614_v38  ;;  %v2621_v34 = vmul.f32 %v2617_v39, %v2575_v49 }
0x17ec   : > { %v2624_v15 = vmul.f32 %v2620_v24, %v2586_v55 }
0x17ed   : > { %v2622_v37 = vmul.f32 %v2618_v56, %v2578_v60 }
0x17ee   : > { %v2635_v4 = vpack.c.bf16 %v2624_v15, %v2623_v59 }
0x17ef   : > { %v2634_v62 = vpack.c.bf16 %v2622_v37, %v2621_v34 }
0x17f1   : > { %5277 = vmatprep.mubr.msk.bf16.mxu1 %vm7014_vm13, %v2634_v62  ;;  %vm7018_vm13 = vcmask 130048  }
0x17f2   : > { %5278 = vmatmul.mubr.msk.bf16.vlgmr.msra.gmra.mrb[40].mxu1 %vm7015_vm5, %v2635_v4  ;;  %vm7019_vm5 = vmmov %vm7018_vm13 }
0x17f3   : > { %vm7023_vm2 = vmmov %vm7019_vm5 }
0x181e   : > { %v3076_v52 = vpop.xlane.xlu0 %3075 }
0x1820   : > { %v3079_v44 = vpop.xlane.xlu1 %3078 }
0x1821   : > { %5651 = vrcp.f32 %v3079_v44 }
0x1822   : > { %v3089_v1 = vpop.permute.xlu0 %3088  ;;  %5653 = vrcp.f32 %v3076_v52 }
0x1823   : > { %5297 = vmatprep.subr.bf16.mxu1 %v3089_v1 }
0x1824   : > { %5298 = vmatpush3.bf16.msra.mxu1 %v3089_v1  ;;  %v3073_v43 = vpop.xlane.xlu1 %3072 }
0x1825   : > { %5655 = vrcp.f32 %v3073_v43 }
0x1826   : > { %v3153_v30 = vpop.permute.xlu0 %3152 }
0x1828   : > { %v3091_v10 = vpop.permute.xlu1 %3090 }
0x1829   : > { %v3100_v48 = vsel %vm7016_vm12, %v3091_v10, 0  ;;  %5455 = vmatprep.subr.msk.bf16.mxu1 %vm7017_vm14, %v3091_v10  ;;  %vm7020_vm12 = vmmov %vm7019_vm5 }
0x182a   : > { %5300 = vmatpush3.bf16.msra.mxu1 %v3100_v48  ;;  %vm7021_vm14 = vmmov %vm7019_vm5 }
0x182b   : > { %v5652_v49 = vpop.eup %5651 }
0x182c   : > { %v3157_v55 = vpop.permute.xlu1 %3156  ;;  %v5654_v60 = vpop.eup %5653  ;;  %v3085_v61 = vmul.f32 %v5652_v49, %v6532_v35 }
0x182d   : > { %5456 = vmatprep.subr.msk.bf16.mxu1 %vm7018_vm13, %v3157_v55  ;;  %v3084_v22 = vmul.f32 %v5654_v60, %v6528_v3  ;;  %v3167_v32 = vsel %vm7019_vm5, %v3157_v55, 0  ;;  %vm7022_vm13 = vmmov %vm7019_vm5  ;;  %v5515_v3 = vld [vmem:[%s6951_s10] sm:$0xff]  }
0x182e   : > { %v3087_v17 = vpack.c.bf16 %v3085_v61, %v3085_v61  ;;  %vm7024_vm5 = vmmov %vm7023_vm2 }
0x182f   : > { %v5656_v14 = vpop.eup %5655  ;;  %vm7032_vm10 = vmmov %vm7024_vm5 }
0x1830   : > { %v3083_v18 = vmul.f32 %v5656_v14, %v6536_v36  ;;  %v3159_v33 = vpop.permute.xlu1 %3158 }
0x1831   : > { %v3170_v35 = vsel %vm7022_vm13, %v3159_v33, 0  ;;  %vm7038_vm13 = vmmov %vm7026_vm1 }
0x1832   : > { %v3086_v29 = vpack.c.bf16 %v3084_v22, %v3083_v18 }
0x1834   : > { %5301 = vmatprep.mubr.msk.bf16.mxu1 %vm3052_vm11, %v3086_v29  ;;  %v3155_v36 = vpop.permute.xlu1 %3154 }
0x1835   : > { %5302 = vmatmul.mubr.msk.bf16.vlgmr.msra.gmra.mrb[44].mxu1 %vm3052_vm11, %v3087_v17 }
0x1836   : > { %5306 = vmatpush3.bf16.xpose.msra.mxu1 %v3167_v32  ;;  %5309 = vmatprep.mubr.msk.bf16.mxu1 %vm7020_vm12, %v3153_v30  ;;  %vm7025_vm12 = vmmov %vm7023_vm2 }
0x1837   : > { %5457 = vmatprep.subr.msk.bf16.mxu1 %vm7021_vm14, %v3159_v33  ;;  %vm7037_vm14 = vmmov %vm7026_vm1 }
0x183e   : > { %5308 = vmatpush3.bf16.xpose.msra.mxu1 %v3170_v35 }
0x183f   : > { %5327 = vmatprep.subr.bf16.mxu1 %v5515_v3 }
0x1845   : > { %5310 = vmatmul.mubr.msk.bf16.vlgmr.msra.gmra.mrb[48].mxu1 %vm7023_vm2, %v3155_v36  ;;  %vm7027_vm2 = vmmov %vm7026_vm1 }
0x1846   : > { %5328 = vmatpush3.bf16.msra.mxu1 %v5515_v3  ;;  %v5731_v3 = vld [vmem:[%s6949_s8 + $0x8] sm:$0xff] }
0x18c5   : > { %v5279_v2 = vpop.f32.mrb[40].mxu1 }
0x18c6   : > { %v2700_v28 = vpop.f32.mrb[41].mxu1 }
0x18c7   : > { %v5280_v31 = vpop.f32.mrb[42].mxu1 }
0x18c8   : > { %v2703_v41 = vpop.f32.mrb[43].mxu1 }
0x1908   : > { %v5303_v46 = vpop.f32.mrb[44].mxu1 }
0x1909   : > { %v3136_v27 = vpop.f32.mrb[45].mxu1  ;;  %v3151_v56 = vpack.c.bf16 %v5303_v46, %v5303_v46  ;;  %v2722_v46 = vrot.slane %v5731_v3, %v6160_v45 }
0x190a   : > { %v5304_v39 = vpop.f32.mrb[46].mxu1 }
0x190b   : > { %v3139_v38 = vpop.f32.mrb[47].mxu1  ;;  %v2716_v39 = vadd.f32 %v2703_v41, %v6379_v63 }
0x190c   : > { %v3150_v24 = vpack.c.bf16 %v3139_v38, %v3136_v27  ;;  %v2715_v27 = vadd.f32 %v2700_v28, %v6348_v40 }
0x190e   : > { %5329 = vmatprep.mubr.msk.bf16.mxu1 %vm7024_vm5, %v3150_v24  ;;  %v6608_v38 = vadd.f32 %v2722_v46, %v2715_v27  ;;  %v6611_v24 = vadd.f32 %v2722_v46, %v2716_v39 }
0x190f   : > { %5330 = vmatmul.mubr.msk.bf16.vlgmr.msra.gmra.mrb[52].mxu1 %vm7025_vm12, %v3151_v56  ;;  %vm7040_vm12 = vmmov %vm7026_vm1 }
0x1910   : > { %v2730_v40 = vsel %vm7027_vm2, %v6611_v24, 0.0  ;;  %vm7041_vm2 = vmmov %vm7026_vm1 }
0x1918   : > { %v5311_v59 = vpop.f32.mrb[48].mxu1 }
0x1919   : > { %v3206_v15 = vpop.f32.mrb[49].mxu1  ;;  %v3222_v34 = vmul.f32 0.25, %v5311_v59 }
0x191a   : > { %v3220_v37 = vmul.f32 0.25, %v3206_v15  ;;  %v5312_v4 = vpop.f32.mrb[50].mxu1  ;;  %v2727_v15 = vsel %vm7026_vm1, %v6608_v38, 0.0 }
0x191b   : > { %v3209_v62 = vpop.f32.mrb[51].mxu1  ;;  %v3225_v43 = vsel %vm2897_vm8, %v3222_v34, -1e+30  ;;  %v5516_v34 = vld [vmem:[%s6951_s10 + $0x8] sm:$0xff]   ;;  %vm7036_vm8 = vmmov %vm7026_vm1 }
0x191c   : > { %v3221_v52 = vmul.f32 0.25, %v3209_v62  ;;  %v3223_v44 = vsel %vm2855_vm0, %v3220_v37, -1e+30  ;;  %v3232_v0 = vsel %vm3052_vm11, %v3225_v43, -inf  ;;  %vm7033_vm0 = vmmov %vm7024_vm5 }
0x191d   : > { %v3226_v1 = vsel %vm3052_vm11, %v3223_v44, -inf  ;;  %vm7039_vm5 = vmmov %vm7026_vm1 }
0x191e   : > { %v3224_v10 = vsel %vm2876_vm9, %v3221_v52, -1e+30  ;;  %3227 = vmax.xlane.f32.xlu0 %v3226_v1  ;;  %vm7035_vm9 = vmmov %vm7026_vm1 }
0x191f   : > { %v3229_v9 = vsel %vm3052_vm11, %v3224_v10, -inf }
0x1920   : > { %3230 = vmax.xlane.f32.xlu1 %v3229_v9 }
0x1922   : > { %3233 = vmax.xlane.f32.xlu0 %v3232_v0 }
0x19ab   : > { %v3228_v48 = vpop.xlane.xlu0 %3227 }
0x19ac   : > { %v3235_v49 = vsub.f32 %v3223_v44, %v3228_v48 }
0x19ad   : > { %v3231_v16 = vpop.xlane.xlu1 %3230 }
0x19ae   : > { %v3238_v55 = vmul.f32 1.442695, %v3235_v49  ;;  %v3236_v19 = vsub.f32 %v3224_v10, %v3231_v16 }
0x19af   : > { %v3234_v60 = vpop.xlane.xlu0 %3233 }
0x19b0   : > { %5657 = vpow2.f32 %v3238_v55  ;;  %v3240_v14 = vmul.f32 1.442695, %v3236_v19  ;;  %v3237_v11 = vsub.f32 %v3225_v43, %v3234_v60 }
0x19b2   : > { %5659 = vpow2.f32 %v3240_v14  ;;  %v3242_v12 = vmul.f32 1.442695, %v3237_v11 }
0x19b4   : > { %5661 = vpow2.f32 %v3242_v12 }
0x19ba   : > { %v5658_v61 = vpop.eup %5657 }
0x19bb   : > { %v3244_v18 = vsel %vm3052_vm11, %v5658_v61, 0.0 }
0x19bc   : > { %v5660_v22 = vpop.eup %5659  ;;  %3245 = vadd.xlane.f32.xlu0 %v3244_v18 }
0x19bd   : > { %v3247_v30 = vsel %vm3052_vm11, %v5660_v22, 0.0 }
0x19be   : > { %v5662_v29 = vpop.eup %5661 }
0x19bf   : > { %v3250_v17 = vsel %vm3052_vm11, %v5662_v29, 0.0 }
0x19c0   : > { %3251 = vadd.xlane.f32.xlu1 %v3250_v17  ;;  %3248 = vadd.xlane.f32.xlu0 %v3247_v30  ;;  %v3451_v17 = vrot.slane %v6353_v50, %v6134_v23 }
0x19d1   : > { %3263 = vrot.lane.b32.xlu1 %v6374_v53, %s6993_s20  ;;  %v2717_v53 = vadd.f32 %v5279_v2, %v6355_v54 }
0x19d3   : > { %v6613_v56 = vadd.f32 %v2722_v46, %v2717_v53 }
0x19d6   : > { %3261 = vrot.lane.b32.xlu0 %v6366_v6, %s6993_s20  ;;  %v2718_v6 = vadd.f32 %v5280_v31, %v6362_v57  ;;  %v2733_v57 = vsel %vm7029_vm7, %v6613_v56, 0.0  ;;  %vm7043_vm7 = vmmov %vm7026_vm1 }
0x19d8   : > { %v6615_v59 = vadd.f32 %v2722_v46, %v2718_v6 }
0x19da   : > { %v2736_v54 = vsel %vm7028_vm4, %v6615_v59, 0.0  ;;  %vm7042_vm4 = vmmov %vm7026_vm1 }
0x19e2   : > { %v5331_v32 = vpop.f32.mrb[52].mxu1 }
0x19e3   : > { %v3431_v33 = vpop.f32.mrb[53].mxu1 }
0x19e4   : > { %v5332_v35 = vpop.f32.mrb[54].mxu1 }
0x19e5   : > { %v6599_v36 = vpop.f32.mrb[55].mxu1 }
0x19f5   : > { %2728 = vadd.xlane.f32.xlu1 %v2727_v15  ;;  %2731 = vadd.xlane.f32.xlu0 %v2730_v40 }
0x19f9   : > { %2737 = vadd.xlane.f32.xlu1 %v2736_v54  ;;  %2734 = vadd.xlane.f32.xlu0 %v2733_v57 }
0x1a49   : > { %v3246_v63 = vpop.xlane.xlu0 %3245 }
0x1a4a   : > { %5663 = vrcp.f32 %v3246_v63 }
0x1a4d   : > { %v3249_v2 = vpop.xlane.xlu0 %3248  ;;  %v3252_v28 = vpop.xlane.xlu1 %3251 }
0x1a4e   : > { %5665 = vrcp.f32 %v3249_v2 }
0x1a4f   : > { %5667 = vrcp.f32 %v3252_v28 }
0x1a51   : > { %v3262_v31 = vpop.permute.xlu0 %3261  ;;  %v3264_v41 = vpop.permute.xlu1 %3263 }
0x1a52   : > { %5313 = vmatprep.subr.bf16.mxu0 %v3262_v31  ;;  %v3273_v4 = vsel %vm7031_vm3, %v3264_v41, 0  ;;  %vm7045_vm3 = vmmov %vm7026_vm1 }
0x1a53   : > { %5314 = vmatpush3.bf16.msra.mxu0 %v3262_v31 }
0x1a54   : > { %5458 = vmatprep.subr.msk.bf16.mxu0 %vm7030_vm15, %v3264_v41  ;;  %v5664_v37 = vpop.eup %5663  ;;  %v5517_v41 = vld [vmem:[%s6953_s12] sm:$0xff]   ;;  %vm7044_vm15 = vmmov %vm7026_vm1 }
0x1a55   : > { %v3256_v44 = vmul.f32 %v5664_v37, %v5658_v61  ;;  %5341 = vmatprep.subr.bf16.mxu1 %v5517_v41 }
0x1a56   : > { %5342 = vmatpush3.bf16.msra.mxu1 %v5517_v41 }
0x1a57   : > { %5316 = vmatpush3.bf16.msra.mxu0 %v3273_v4 }
0x1a58   : > { %v5666_v62 = vpop.eup %5665  ;;  %5321 = vmatprep.subr.bf16.mxu0 %v5516_v34 }
0x1a59   : > { %v5668_v52 = vpop.eup %5667  ;;  %v3257_v1 = vmul.f32 %v5666_v62, %v5660_v22 }
0x1a5a   : > { %v3258_v43 = vmul.f32 %v5668_v52, %v5662_v29 }
0x1a5b   : > { %v3259_v10 = vpack.c.bf16 %v3257_v1, %v3256_v44 }
0x1a5c   : > { %v3260_v9 = vpack.c.bf16 %v3258_v43, %v3258_v43 }
0x1a5d   : > { %5317 = vmatprep.mubr.msk.bf16.mxu0 %vm3052_vm11, %v3259_v10 }
0x1a5e   : > { %5318 = vmatmul.mubr.msk.bf16.vlgmr.msra.gmra.mrb[36].mxu0 %vm3052_vm11, %v3260_v9  ;;  %vm7034_vm11 = vmmov %vm7026_vm1 }
0x1a5f   : > { %5322 = vmatpush3.bf16.msra.mxu0 %v5516_v34  ;;  %v5518_v34 = vld [vmem:[%s6953_s12 + $0x8] sm:$0xff]  }
0x1a60   : > { %5343 = vmatprep.subr.bf16.mxu1 %v5518_v34 }
0x1a61   : > { %5344 = vmatpush3.bf16.msra.mxu1 %v5518_v34 }
0x1a82   : > { %v2732_v60 = vpop.xlane.xlu0 %2731  ;;  %v2729_v14 = vpop.xlane.xlu1 %2728 }
0x1a83   : > { %v2739_v18 = vmul.f32 0.03125, %v2729_v14  ;;  %v2740_v30 = vmul.f32 0.03125, %v2732_v60 }
0x1a85   : > { %v6640_v6 = vsub.f32 %v6608_v38, %v2739_v18  ;;  %v6644_v40 = vsub.f32 %v6611_v24, %v2740_v30 }
0x1a86   : > { %v2735_v35 = vpop.xlane.xlu0 %2734  ;;  %v2738_v53 = vpop.xlane.xlu1 %2737 }
0x1a87   : > { %v2742_v23 = vmul.f32 0.03125, %v2738_v53  ;;  %v2747_v38 = vmul.f32 %v6640_v6, %v6640_v6  ;;  %v2748_v57 = vmul.f32 %v6644_v40, %v6644_v40 }
0x1a89   : > { %v2751_v63 = vsel %vm7037_vm14, %v2747_v38, 0.0  ;;  %v2754_v2 = vsel %vm7038_vm13, %v2748_v57, 0.0  ;;  %vm7050_vm14 = vmmov %vm7033_vm0 }
0x1a8a   : > { %vm7051_vm13 = vmmov %vm7033_vm0 }
0x1b31   : > { %v5319_v0 = vpop.f32.mrb[36].mxu0 }
0x1b32   : > { %v3309_v48 = vpop.f32.mrb[37].mxu0  ;;  %v3324_v19 = vpack.c.bf16 %v5319_v0, %v5319_v0 }
0x1b33   : > { %v5320_v49 = vpop.f32.mrb[38].mxu0 }
0x1b34   : > { %v3312_v16 = vpop.f32.mrb[39].mxu0 }
0x1b35   : > { %v3323_v55 = vpack.c.bf16 %v3312_v16, %v3309_v48 }
0x1b37   : > { %5323 = vmatprep.mubr.msk.bf16.mxu0 %vm7032_vm10, %v3323_v55  ;;  %vm7046_vm10 = vmmov %vm7026_vm1 }
0x1b38   : > { %5324 = vmatmul.mubr.msk.bf16.vlgmr.msra.gmra.mrb[40].mxu0 %vm7033_vm0, %v3324_v19 }
0x1c0b   : > { %v5325_v11 = vpop.f32.mrb[40].mxu0 }
0x1c0c   : > { %v3440_v12 = vadd.f32 %v5331_v32, %v5325_v11  ;;  %v3371_v61 = vpop.f32.mrb[41].mxu0  ;;  %v2741_v32 = vmul.f32 0.03125, %v2735_v35 }
0x1c0d   : > { %v3432_v22 = vadd.f32 %v3431_v33, %v3371_v61  ;;  %v5326_v29 = vpop.f32.mrb[42].mxu0 }
0x1c0e   : > { %v3374_v3 = vpop.f32.mrb[43].mxu0  ;;  %v3447_v46 = vadd.f32 %v3440_v12, %v6339_v51 }
0x1c0f   : > { %v3445_v27 = vadd.f32 %v3432_v22, %v6322_v7  ;;  %v3435_v39 = vadd.f32 %v6599_v36, %v3374_v3  ;;  %v6648_v7 = vsub.f32 %v6613_v56, %v2741_v32 }
0x1c10   : > { %v3454_v51 = vadd.f32 %v3451_v17, %v3447_v46  ;;  %v5732_v46 = vld [vmem:[%s6959_s18] sm:$0xff] }
0x1c11   : > { %v3446_v33 = vadd.f32 %v3435_v39, %v6325_v8  ;;  %v3452_v15 = vadd.f32 %v3451_v17, %v3445_v27  ;;  %v6654_v8 = vsub.f32 %v6615_v59, %v2742_v23  ;;  %v2749_v56 = vmul.f32 %v6648_v7, %v6648_v7 }
0x1c12   : > { %v3461_v24 = vsel %vm7036_vm8, %v3454_v51, 0.0  ;;  %v2782_v27 = vrot.slane %v5732_v46, %v5952_v13  ;;  %v2790_v23 = vrot.slane %v5732_v46, %v5962_v20  ;;  %vm7049_vm8 = vmmov %vm7033_vm0 }
0x1c13   : > { %v3455_v50 = vsel %vm7034_vm11, %v3452_v15, 0.0  ;;  %v3453_v54 = vadd.f32 %v3451_v17, %v3446_v33  ;;  %v2750_v28 = vmul.f32 %v6654_v8, %v6654_v8  ;;  %v2757_v59 = vsel %vm7039_vm5, %v2749_v56, 0.0  ;;  %vm7047_vm11 = vmmov %vm7033_vm0 }
0x1c14   : > { %3456 = vadd.xlane.f32.xlu0 %v3455_v50  ;;  %vm7052_vm5 = vcmp.ge.s32.totalorder %v5990_v58, 16 }
0x1c15   : > { %v3458_v36 = vsel %vm7035_vm9, %v3453_v54, 0.0  ;;  %v2760_v31 = vsel %vm7040_vm12, %v2750_v28, 0.0  ;;  %vm7048_vm9 = vmmov %vm7033_vm0  ;;  %vm7053_vm12 = vcmp.ge.s32.totalorder %v6421_v25, 12 }
0x1c16   : > { %3459 = vadd.xlane.f32.xlu1 %v3458_v36 }
0x1c18   : > { %3462 = vadd.xlane.f32.xlu0 %v3461_v24 }
0x1c1a   : > { %2752 = vadd.xlane.f32.xlu1 %v2751_v63 }
0x1c1c   : > { %2755 = vadd.xlane.f32.xlu0 %v2754_v2 }
0x1c1e   : > { %2758 = vadd.xlane.f32.xlu1 %v2757_v59 }
0x1c20   : > { %2761 = vadd.xlane.f32.xlu0 %v2760_v31 }
0x1ca1   : > { %v3457_v37 = vpop.xlane.xlu0 %3456 }
0x1ca2   : > { %v3464_v4 = vmul.f32 0.03125, %v3457_v37 }
0x1ca3   : > { %v3460_v62 = vpop.xlane.xlu1 %3459 }
0x1ca4   : > { %v6673_v52 = vsub.f32 %v3452_v15, %v3464_v4  ;;  %v3465_v44 = vmul.f32 0.03125, %v3460_v62 }
0x1ca5   : > { %v3463_v1 = vpop.xlane.xlu0 %3462 }
0x1ca6   : > { %v6675_v43 = vsub.f32 %v3453_v54, %v3465_v44  ;;  %v3466_v10 = vmul.f32 0.03125, %v3463_v1  ;;  %v3470_v9 = vmul.f32 %v6673_v52, %v6673_v52 }
0x1ca7   : > { %v2753_v0 = vpop.xlane.xlu1 %2752 }
0x1ca8   : > { %v6679_v48 = vsub.f32 %v3454_v51, %v3466_v10  ;;  %v2763_v49 = vmul.f32 0.03125, %v2753_v0  ;;  %v3473_v16 = vsel %vm7026_vm1, %v3470_v9, 0.0  ;;  %v3471_v55 = vmul.f32 %v6675_v43, %v6675_v43  ;;  %vm3521_vm1 = vmand %vm7053_vm12, %vm7052_vm5 }
0x1ca9   : > { %v2756_v19 = vpop.xlane.xlu0 %2755  ;;  %3474 = vadd.xlane.f32.xlu1 %v3473_v16  ;;  %v3497_v10 = vrot.slane %v5732_v46, %v6153_v47  ;;  %vm7068_vm12 = vcmask 130048  }
0x1caa   : > { %v2767_v60 = vadd.f32 1e-05, %v2763_v49  ;;  %v2764_v14 = vmul.f32 0.03125, %v2756_v19  ;;  %v3476_v11 = vsel %vm7041_vm2, %v3471_v55, 0.0  ;;  %v3472_v12 = vmul.f32 %v6679_v48, %v6679_v48 }
0x1cab   : > { %3477 = vadd.xlane.f32.xlu0 %v3476_v11  ;;  %v2759_v61 = vpop.xlane.xlu1 %2758  ;;  %v3504_v19 = vrot.slane %v5732_v46, %v6160_v45  ;;  %vm7054_vm2 = vcmp.lt.s32.totalorder %v5990_v58, 16 }
0x1cac   : > { %5669 = vrsqrt.f32 %v2767_v60  ;;  %v2768_v18 = vadd.f32 1e-05, %v2764_v14  ;;  %v2765_v22 = vmul.f32 0.03125, %v2759_v61  ;;  %v3479_v29 = vsel %vm7042_vm4, %v3472_v12, 0.0 }
0x1cad   : > { %3480 = vadd.xlane.f32.xlu1 %v3479_v29  ;;  %v2762_v17 = vpop.xlane.xlu0 %2761  ;;  %vm7055_vm4 = vcmp.lt.s32.totalorder %v6421_v25, 12 }
0x1cae   : > { %5671 = vrsqrt.f32 %v2768_v18  ;;  %v2769_v30 = vadd.f32 1e-05, %v2765_v22  ;;  %v2766_v35 = vmul.f32 0.03125, %v2762_v17 }
0x1cb0   : > { %5673 = vrsqrt.f32 %v2769_v30  ;;  %v2770_v3 = vadd.f32 1e-05, %v2766_v35 }
0x1cb2   : > { %5675 = vrsqrt.f32 %v2770_v3 }
0x1cb6   : > { %v5670_v39 = vpop.eup %5669 }
0x1cb7   : > { %v2775_v53 = vmul.f32 %v5670_v39, %v6640_v6 }
0x1cb8   : > { %v5672_v32 = vpop.eup %5671 }
0x1cb9   : > { %v2776_v33 = vmul.f32 %v5672_v32, %v6644_v40  ;;  %v2783_v15 = vmul.f32 %v2782_v27, %v2775_v53 }
0x1cba   : > { %v5674_v50 = vpop.eup %5673 }
0x1cbb   : > { %v2777_v54 = vmul.f32 %v5674_v50, %v6648_v7  ;;  %v2784_v51 = vmul.f32 %v2782_v27, %v2776_v33  ;;  %v2791_v57 = vadd.f32 %v2790_v23, %v2783_v15  ;;  %v5519_v7 = vld [vmem:[%s6952_s11] sm:$0xff]  }
0x1cbc   : > { %v5676_v36 = vpop.eup %5675  ;;  %5333 = vmatprep.subr.bf16.mxu0 %v5519_v7 }
0x1cbd   : > { %v2785_v38 = vmul.f32 %v2782_v27, %v2777_v54  ;;  %v2778_v24 = vmul.f32 %v5676_v36, %v6654_v8  ;;  %v2792_v63 = vadd.f32 %v2790_v23, %v2784_v51  ;;  %5334 = vmatpush3.bf16.msra.mxu0 %v5519_v7  ;;  %v5520_v8 = vld [vmem:[%s6952_s11 + $0x8] sm:$0xff]  }
0x1cbe   : > { %5335 = vmatprep.subr.bf16.mxu0 %v5520_v8 }
0x1cbf   : > { %v2786_v56 = vmul.f32 %v2782_v27, %v2778_v24  ;;  %v6697_v2 = vpack.c.bf16 %v2792_v63, %v2791_v57  ;;  %v2793_v6 = vadd.f32 %v2790_v23, %v2785_v38 }
0x1cc1   : > { %5345 = vmatprep.mubr.msk.bf16.mxu1 %vm7043_vm7, %v6697_v2  ;;  %v2794_v40 = vadd.f32 %v2790_v23, %v2786_v56  ;;  %5336 = vmatpush3.bf16.msra.mxu0 %v5520_v8  ;;  %vm6759_vm7 = vmand %vm7055_vm4, %vm7054_vm2 }
0x1cc3   : > { %v6701_v28 = vpack.c.bf16 %v2794_v40, %v2793_v6 }
0x1cc5   : > { %5346 = vmatmul.mubr.msk.bf16.vlgmr.msra.gmra.mrb[56].mxu1 %vm7044_vm15, %v6701_v28  ;;  %vm7058_vm15 = vcmp.lt.s32.totalorder %v5990_v58, 32 }
0x1d36   : > { %v3475_v59 = vpop.xlane.xlu1 %3474 }
0x1d37   : > { %v3482_v31 = vmul.f32 0.03125, %v3475_v59 }
0x1d38   : > { %v3478_v41 = vpop.xlane.xlu0 %3477 }
0x1d39   : > { %v3485_v34 = vadd.f32 1e-05, %v3482_v31  ;;  %v3483_v37 = vmul.f32 0.03125, %v3478_v41 }
0x1d3a   : > { %v3481_v4 = vpop.xlane.xlu1 %3480 }
0x1d3b   : > { %5677 = vrsqrt.f32 %v3485_v34  ;;  %v3486_v62 = vadd.f32 1e-05, %v3483_v37  ;;  %v3484_v44 = vmul.f32 0.03125, %v3481_v4 }
0x1d3d   : > { %5679 = vrsqrt.f32 %v3486_v62  ;;  %v3487_v1 = vadd.f32 1e-05, %v3484_v44 }
0x1d3f   : > { %5681 = vrsqrt.f32 %v3487_v1 }
0x1d45   : > { %v5678_v9 = vpop.eup %5677 }
0x1d46   : > { %v3491_v0 = vmul.f32 %v5678_v9, %v6673_v52 }
0x1d47   : > { %v5680_v49 = vpop.eup %5679 }
0x1d48   : > { %v3492_v16 = vmul.f32 %v5680_v49, %v6675_v43  ;;  %v3498_v55 = vmul.f32 %v3497_v10, %v3491_v0  ;;  %v6731_v43 = vld [vmem:[%s6959_s18 + $0x8] sm:$0xff] }
0x1d49   : > { %v5682_v60 = vpop.eup %5681  ;;  %v3538_v23 = vrot.slane %v6731_v43, %v6153_v47 }
0x1d4a   : > { %v3493_v14 = vmul.f32 %v5682_v60, %v6679_v48  ;;  %v3499_v11 = vmul.f32 %v3497_v10, %v3492_v16  ;;  %v6716_v61 = vadd.f32 %v3504_v19, %v3498_v55  ;;  %v3614_v48 = vrot.slane %v6731_v43, %v6160_v45 }
0x1d4c   : > { %v3500_v12 = vmul.f32 %v3497_v10, %v3493_v14  ;;  %v6718_v18 = vadd.f32 %v3504_v19, %v3499_v11 }
0x1d4e   : > { %v3533_v22 = vpack.c.bf16 %v6718_v18, %v6716_v61  ;;  %v6722_v29 = vadd.f32 %v3504_v19, %v3500_v12 }
0x1d50   : > { %5337 = vmatprep.mubr.msk.bf16.mxu0 %vm7045_vm3, %v3533_v22  ;;  %v3534_v52 = vpack.c.bf16 %v6722_v29, %v6722_v29  ;;  %vm6765_vm3 = vmand %vm3521_vm1, %vm7058_vm15 }
0x1d52   : > { %5338 = vmatmul.mubr.msk.bf16.vlgmr.msra.gmra.mrb[44].mxu0 %vm7046_vm10, %v3534_v52  ;;  %vm3527_vm10 = vmor %vm6759_vm7, %vm6765_vm3 }
0x1d98   : > { %v5347_v17 = vpop.f32.mrb[56].mxu1 }
0x1d99   : > { %v3667_v30 = vpop.f32.mrb[57].mxu1  ;;  %v3676_v3 = vadd.f32 %v5347_v17, %v3614_v48 }
0x1d9a   : > { %v5348_v35 = vpop.f32.mrb[58].mxu1  ;;  %v3668_v39 = vadd.f32 %v3667_v30, %v3614_v48 }
0x1d9b   : > { %v3679_v46 = vadd.f32 %v5348_v35, %v3614_v48  ;;  %v3670_v27 = vpop.f32.mrb[59].mxu1 }
0x1d9c   : > { %v3671_v53 = vadd.f32 %v3670_v27, %v3614_v48 }
0x1d9d   : > { %v6735_v32 = vpack.c.bf16 %v3679_v46, %v3676_v3 }
0x1d9e   : > { %v6737_v33 = vpack.c.bf16 %v3671_v53, %v3668_v39 }
0x1d9f   : > { %v3700_v45 = vsel %vm7049_vm8, %v6735_v32, 0 }
0x1da0   : > { %5459 = vmatprep.subr.msk.bf16.mxu0 %vm7033_vm0, %v6737_v33  ;;  %v3697_v15 = vsel %vm7047_vm11, %v6737_v33, 0  ;;  %vm7061_vm0 = vmmov %vm7054_vm2  ;;  %vm7062_vm11 = vcmask 261120  }
0x1da1   : > { %5350 = vmatpush3.bf16.xpose.msra.mxu0 %v3697_v15  ;;  %vm7070_vm2 = vmmov %vm7068_vm12 }
0x1da2   : > { %5460 = vmatprep.subr.msk.bf16.mxu0 %vm7048_vm9, %v6735_v32  ;;  %vm7063_vm9 = vmmov %vm7062_vm11 }
0x1da3   : > { %vm7064_vm8 = vmmov %vm7063_vm9 }
0x1da4   : > { %vm7067_vm5 = vmmov %vm7064_vm8 }
0x1da5   : > { %vm7069_vm1 = vmmov %vm7067_vm5 }
0x1da6   : > { %vm7071_vm4 = vmmov %vm7069_vm1 }
0x1da7   : > { %vm7072_vm15 = vmmov %vm7070_vm2 }
0x1da8   : > { %vm7083_vm7 = vmmov %vm7069_vm1 }
0x1da9   : > { %5352 = vmatpush3.bf16.xpose.msra.mxu0 %v3700_v45  ;;  %vm7084_vm3 = vmmov %vm7069_vm1 }
0x1e25   : > { %v5339_v50 = vpop.f32.mrb[44].mxu0 }
0x1e26   : > { %v3591_v54 = vpop.f32.mrb[45].mxu0  ;;  %v3600_v36 = vadd.f32 %v5339_v50, %v3538_v23 }
0x1e27   : > { %v5340_v51 = vpop.f32.mrb[46].mxu0  ;;  %v3592_v24 = vadd.f32 %v3591_v54, %v3538_v23 }
0x1e28   : > { %v3594_v38 = vpop.f32.mrb[47].mxu0  ;;  %v3687_v56 = vpack.c.bf16 %v3600_v36, %v3600_v36 }
0x1e29   : > { %v3595_v57 = vadd.f32 %v3594_v38, %v3538_v23 }
0x1e2b   : > { %v3686_v63 = vpack.c.bf16 %v3595_v57, %v3592_v24 }
0x1e2d   : > { %5353 = vmatprep.mubr.msk.bf16.mxu0 %vm7050_vm14, %v3686_v63  ;;  %vm7065_vm14 = vmmov %vm7064_vm8 }
0x1e2e   : > { %5354 = vmatmul.mubr.msk.bf16.vlgmr.msra.gmra.mrb[48].mxu0 %vm7051_vm13, %v3687_v56  ;;  %vm7066_vm13 = vmmov %vm7064_vm8 }
0x1f01   : > { %v5355_v6 = vpop.f32.mrb[48].mxu0 }
0x1f02   : > { %v3736_v7 = vpop.f32.mrb[49].mxu0  ;;  %v3752_v8 = vmul.f32 0.25, %v5355_v6  ;;  %v5521_v6 = vld [vmem:[%s6954_s13] sm:$0xff]  }
0x1f03   : > { %v3750_v59 = vmul.f32 0.25, %v3736_v7  ;;  %v5356_v31 = vpop.f32.mrb[50].mxu0  ;;  %v5522_v7 = vld [vmem:[%s6956_s15] sm:$0xff]  }
0x1f04   : > { %v3739_v25 = vpop.f32.mrb[51].mxu0  ;;  %v3755_v4 = vsel %vm6002_vm6, %v3752_v8, -1e+30 }
0x1f05   : > { %v3753_v41 = vsel %vm7061_vm0, %v3750_v59, -1e+30  ;;  %v3751_v34 = vmul.f32 0.25, %v3739_v25  ;;  %v3762_v1 = vsel %vm7064_vm8, %v3755_v4, -inf  ;;  %vm7073_vm0 = vmmov %vm7070_vm2 }
0x1f06   : > { %v3756_v37 = vsel %vm7062_vm11, %v3753_v41, -inf  ;;  %vm7074_vm11 = vmmov %vm7073_vm0 }
0x1f07   : > { %v3754_v62 = vsel %vm3527_vm10, %v3751_v34, -1e+30  ;;  %3757 = vmax.xlane.f32.xlu0 %v3756_v37  ;;  %v5523_v37 = vld [vmem:[%s6956_s15 + $0x8] sm:$0xff]   ;;  %vm7076_vm8 = vmmov %vm7073_vm0 }
0x1f08   : > { %v3759_v44 = vsel %vm7063_vm9, %v3754_v62, -inf  ;;  %vm7075_vm9 = vmmov %vm7073_vm0 }
0x1f09   : > { %3760 = vmax.xlane.f32.xlu1 %v3759_v44 }
0x1f0b   : > { %3763 = vmax.xlane.f32.xlu0 %v3762_v1 }
0x1f94   : > { %v3758_v10 = vpop.xlane.xlu0 %3757 }
0x1f95   : > { %v3765_v0 = vsub.f32 %v3753_v41, %v3758_v10 }
0x1f96   : > { %v3761_v9 = vpop.xlane.xlu1 %3760 }
0x1f97   : > { %v3766_v49 = vsub.f32 %v3754_v62, %v3761_v9  ;;  %v3768_v60 = vmul.f32 1.442695, %v3765_v0  ;;  %v5525_v62 = vld [vmem:[%s6956_s15 + $0x18] sm:$0xff]  }
0x1f98   : > { %v3764_v16 = vpop.xlane.xlu0 %3763 }
0x1f99   : > { %v3770_v55 = vmul.f32 1.442695, %v3766_v49  ;;  %v3767_v19 = vsub.f32 %v3755_v4, %v3764_v16  ;;  %v5524_v4 = vld [vmem:[%s6956_s15 + $0x10] sm:$0xff]  }
0x1f9b   : > { %5683 = vpow2.f32 %v3770_v55  ;;  %v3772_v14 = vmul.f32 1.442695, %v3767_v19 }
0x1f9d   : > { %5685 = vpow2.f32 %v3772_v14 }
0x1f9e   : > { %5687 = vpow2.f32 %v3768_v60 }
0x1fa5   : > { %v5684_v11 = vpop.eup %5683 }
0x1fa6   : > { %v3777_v12 = vsel %vm7065_vm14, %v5684_v11, 0.0  ;;  %vm7077_vm14 = vmmov %vm7073_vm0 }
0x1fa7   : > { %v5686_v22 = vpop.eup %5685  ;;  %3778 = vadd.xlane.f32.xlu0 %v3777_v12 }
0x1fa8   : > { %v3780_v52 = vsel %vm7066_vm13, %v5686_v22, 0.0  ;;  %v5688_v48 = vpop.eup %5687  ;;  %vm7078_vm13 = vcmp.lt.s32.totalorder %v5990_v58, 16 }
0x1fa9   : > { %3781 = vadd.xlane.f32.xlu1 %v3780_v52  ;;  %v3774_v17 = vsel %vm7067_vm5, %v5688_v48, 0.0  ;;  %vm7079_vm5 = vmmov %vm7069_vm1 }
0x1fad   : > { %3775 = vadd.xlane.f32.xlu1 %v3774_v17 }
0x1fbd   : > { %3793 = vrot.lane.b32.xlu0 %v6737_v33, %s6995_s23 }
0x1fbe   : > { %3795 = vrot.lane.b32.xlu1 %v6735_v32, %s6995_s23 }
0x1fc1   : > { %3857 = vrot.lane.b32.xlu0 %v3686_v63, %s6992_s28 }
0x1fc2   : > { %3861 = vrot.lane.b32.xlu1 %v6737_v33, %s6992_s28 }
0x1fc6   : > { %3863 = vrot.lane.b32.xlu1 %v6735_v32, %s6992_s28 }
0x1fca   : > { %3859 = vrot.lane.b32.xlu1 %v3687_v56, %s6992_s28 }
0x2034   : > { %v3779_v30 = vpop.xlane.xlu0 %3778 }
0x2036   : > { %v3782_v35 = vpop.xlane.xlu1 %3781 }
0x2037   : > { %5689 = vrcp.f32 %v3782_v35 }
0x2038   : > { %v3794_v3 = vpop.permute.xlu0 %3793  ;;  %5691 = vrcp.f32 %v3779_v30 }
0x2039   : > { %5357 = vmatprep.subr.bf16.mxu1 %v3794_v3 }
0x203a   : > { %5358 = vmatpush3.bf16.msra.mxu1 %v3794_v3  ;;  %v3776_v46 = vpop.xlane.xlu1 %3775 }
0x203b   : > { %5693 = vrcp.f32 %v3776_v46 }
0x203c   : > { %v3858_v38 = vpop.permute.xlu0 %3857 }
0x203e   : > { %v3796_v27 = vpop.permute.xlu1 %3795 }
0x203f   : > { %5359 = vmatprep.subr.bf16.mxu1 %v3796_v27 }
0x2040   : > { %5360 = vmatpush3.bf16.msra.mxu1 %v3796_v27 }
0x2041   : > { %v5690_v39 = vpop.eup %5689 }
0x2042   : > { %v3862_v53 = vpop.permute.xlu1 %3861  ;;  %v5692_v15 = vpop.eup %5691  ;;  %v3788_v23 = vmul.f32 %v5690_v39, %v5686_v22 }
0x2043   : > { %5461 = vmatprep.subr.msk.bf16.mxu1 %vm7068_vm12, %v3862_v53  ;;  %v3787_v54 = vmul.f32 %v5692_v15, %v5684_v11  ;;  %v3872_v24 = vsel %vm7070_vm2, %v3862_v53, 0  ;;  %vm7080_vm12 = vmmov %vm7069_vm1 }
0x2044   : > { %v3790_v36 = vpack.c.bf16 %v3788_v23, %v3788_v23  ;;  %vm7081_vm2 = vmmov %vm7069_vm1 }
0x2045   : > { %v5694_v45 = vpop.eup %5693 }
0x2046   : > { %v3786_v50 = vmul.f32 %v5694_v45, %v5688_v48  ;;  %v3864_v57 = vpop.permute.xlu1 %3863 }
0x2047   : > { %v3875_v63 = vsel %vm7074_vm11, %v3864_v57, 0  ;;  %vm7088_vm11 = vmmov %vm7069_vm1 }
0x2048   : > { %v3789_v51 = vpack.c.bf16 %v3787_v54, %v3786_v50 }
0x204a   : > { %5361 = vmatprep.mubr.msk.bf16.mxu1 %vm7069_vm1, %v3789_v51  ;;  %v3860_v56 = vpop.permute.xlu1 %3859 }
0x204b   : > { %5362 = vmatmul.mubr.msk.bf16.vlgmr.msra.gmra.mrb[60].mxu1 %vm7071_vm4, %v3790_v36  ;;  %vm7086_vm4 = vmmov %vm7069_vm1 }
0x204c   : > { %5366 = vmatpush3.bf16.xpose.msra.mxu1 %v3872_v24  ;;  %5369 = vmatprep.mubr.msk.bf16.mxu1 %vm7072_vm15, %v3858_v38  ;;  %vm7087_vm15 = vmmov %vm7073_vm0 }
0x204d   : > { %5462 = vmatprep.subr.msk.bf16.mxu1 %vm7073_vm0, %v3864_v57 }
0x2054   : > { %5368 = vmatpush3.bf16.xpose.msra.mxu1 %v3875_v63 }
0x2055   : > { %5387 = vmatprep.subr.bf16.mxu1 %v5521_v6 }
0x205b   : > { %5370 = vmatmul.mubr.msk.bf16.vlgmr.msra.gmra.mrb[64].mxu1 %vm7075_vm9, %v3860_v56  ;;  %vm7089_vm9 = vmmov %vm7069_vm1 }
0x205c   : > { %5388 = vmatpush3.bf16.msra.mxu1 %v5521_v6 }
0x205d   : > { %5401 = vmatprep.subr.bf16.mxu1 %v5522_v7 }
0x211e   : > { %v5363_v8 = vpop.f32.mrb[60].mxu1 }
0x211f   : > { %v3839_v59 = vpop.f32.mrb[61].mxu1  ;;  %v3854_v34 = vpack.c.bf16 %v5363_v8, %v5363_v8 }
0x2120   : > { %v5364_v31 = vpop.f32.mrb[62].mxu1 }
0x2121   : > { %v3842_v25 = vpop.f32.mrb[63].mxu1 }
0x2122   : > { %v3853_v41 = vpack.c.bf16 %v3842_v25, %v3839_v59 }
0x2124   : > { %5389 = vmatprep.mubr.msk.bf16.mxu1 %vm7076_vm8, %v3853_v41  ;;  %vm7090_vm8 = vmmov %vm7069_vm1 }
0x2125   : > { %5390 = vmatmul.mubr.msk.bf16.vlgmr.msra.gmra.mrb[68].mxu1 %vm7077_vm14, %v3854_v34  ;;  %vm7091_vm14 = vmmov %vm7069_vm1 }
0x2126   : > { %5402 = vmatpush3.bf16.msra.mxu1 %v5522_v7 }
0x2127   : > { %5403 = vmatprep.subr.bf16.mxu1 %v5523_v37 }
0x212a   : > { %5404 = vmatpush3.bf16.msra.mxu1 %v5523_v37 }
0x212b   : > { %5405 = vmatprep.subr.bf16.mxu1 %v5524_v4 }
0x212e   : > { %v5371_v44 = vpop.f32.mrb[64].mxu1  ;;  %5406 = vmatpush3.bf16.msra.mxu1 %v5524_v4 }
0x212f   : > { %v3911_v1 = vpop.f32.mrb[65].mxu1  ;;  %5407 = vmatprep.subr.bf16.mxu1 %v5525_v62  ;;  %v3927_v10 = vmul.f32 0.25, %v5371_v44 }
0x2130   : > { %v3925_v9 = vmul.f32 0.25, %v3911_v1  ;;  %v5372_v0 = vpop.f32.mrb[66].mxu1 }
0x2131   : > { %v3914_v49 = vpop.f32.mrb[67].mxu1  ;;  %v3930_v60 = vsel %vm6002_vm6, %v3927_v10, -1e+30  ;;  %vm7082_vm6 = vmmov %vm7069_vm1 }
0x2132   : > { %v3928_v16 = vsel %vm7078_vm13, %v3925_v9, -1e+30  ;;  %v3926_v55 = vmul.f32 0.25, %v3914_v49  ;;  %5408 = vmatpush3.bf16.msra.mxu1 %v5525_v62  ;;  %v3937_v11 = vsel %vm7081_vm2, %v3930_v60, -inf  ;;  %v6854_v62 = vld [vmem:[%s6959_s18 + $0x10] sm:$0x1f]  ;;  %vm7092_vm13 = vmmov %vm7069_vm1 }
0x2133   : > { %5463 = vmatprep.subr.msk.bf16.mxu1 %vm7079_vm5, %v6697_v2  ;;  %v3931_v19 = vsel %vm7080_vm12, %v3928_v16, -inf  ;;  %v4154_v49 = vrot.slane %v6854_v62, %v5952_v13  ;;  %vm7093_vm5 = vmmov %vm7069_vm1  ;;  %vm7095_vm2 = vcmask 523264  }
0x2134   : > { %v3929_v14 = vsel %vm3527_vm10, %v3926_v55, -1e+30  ;;  %3932 = vmax.xlane.f32.xlu0 %v3931_v19  ;;  %vm7085_vm10 = vmmov %vm7069_vm1 }
0x2135   : > { %v3934_v58 = vsel %vm7069_vm1, %v3929_v14, -inf  ;;  %vm7094_vm12 = vmmov %vm7069_vm1 }
0x2136   : > { %3935 = vmax.xlane.f32.xlu1 %v3934_v58 }
0x2138   : > { %3938 = vmax.xlane.f32.xlu0 %v3937_v11 }
0x21c1   : > { %v3933_v12 = vpop.xlane.xlu0 %3932 }
0x21c2   : > { %v3940_v22 = vsub.f32 %v3928_v16, %v3933_v12 }
0x21c3   : > { %v3936_v52 = vpop.xlane.xlu1 %3935 }
0x21c4   : > { %v3943_v48 = vmul.f32 1.442695, %v3940_v22  ;;  %v3941_v17 = vsub.f32 %v3929_v14, %v3936_v52 }
0x21c5   : > { %v3939_v5 = vpop.xlane.xlu0 %3938 }
0x21c6   : > { %5695 = vpow2.f32 %v3943_v48  ;;  %v3945_v30 = vmul.f32 1.442695, %v3941_v17  ;;  %v3942_v47 = vsub.f32 %v3930_v60, %v3939_v5 }
0x21c8   : > { %5697 = vpow2.f32 %v3945_v30  ;;  %v3947_v40 = vmul.f32 1.442695, %v3942_v47 }
0x21ca   : > { %5699 = vpow2.f32 %v3947_v40 }
0x21d0   : > { %v5696_v35 = vpop.eup %5695 }
0x21d1   : > { %v3949_v3 = vsel %vm7082_vm6, %v5696_v35, 0.0  ;;  %vm7096_vm6 = vmmov %vm7095_vm2 }
0x21d2   : > { %v5698_v46 = vpop.eup %5697  ;;  %3950 = vadd.xlane.f32.xlu0 %v3949_v3 }
0x21d3   : > { %v3952_v53 = vsel %vm7084_vm3, %v5698_v46, 0.0  ;;  %vm7098_vm3 = vmmov %vm7069_vm1 }
0x21d4   : > { %v5700_v27 = vpop.eup %5699 }
0x21d5   : > { %v3955_v39 = vsel %vm7083_vm7, %v5700_v27, 0.0  ;;  %vm7097_vm7 = vmmov %vm7069_vm1 }
0x21d6   : > { %3956 = vadd.xlane.f32.xlu1 %v3955_v39  ;;  %3953 = vadd.xlane.f32.xlu0 %v3952_v53 }
0x21e7   : > { %3968 = vrot.lane.b32.xlu1 %v6735_v32, %s7013_s25  ;;  %v5526_v32 = vld [vmem:[%s6954_s13 + $0x8] sm:$0xff]  }
0x21ec   : > { %3966 = vrot.lane.b32.xlu0 %v6737_v33, %s7013_s25 }
0x21f8   : > { %v5391_v15 = vpop.f32.mrb[68].mxu1 }
0x21f9   : > { %v4134_v45 = vpop.f32.mrb[69].mxu1 }
0x21fa   : > { %v5392_v23 = vpop.f32.mrb[70].mxu1 }
0x21fb   : > { %v4137_v50 = vpop.f32.mrb[71].mxu1  ;;  %v5528_v23 = vld [vmem:[%s6955_s14 + $0x8] sm:$0xff]  }
0x225f   : > { %v3951_v54 = vpop.xlane.xlu0 %3950 }
0x2260   : > { %5701 = vrcp.f32 %v3951_v54 }
0x2263   : > { %v3954_v51 = vpop.xlane.xlu0 %3953  ;;  %v3957_v36 = vpop.xlane.xlu1 %3956 }
0x2264   : > { %5703 = vrcp.f32 %v3954_v51 }
0x2265   : > { %5705 = vrcp.f32 %v3957_v36 }
0x2267   : > { %v3967_v38 = vpop.permute.xlu0 %3966  ;;  %v3969_v24 = vpop.permute.xlu1 %3968 }
0x2268   : > { %5373 = vmatprep.subr.bf16.mxu0 %v3967_v38 }
0x2269   : > { %5374 = vmatpush3.bf16.msra.mxu0 %v3967_v38 }
0x226a   : > { %5375 = vmatprep.subr.bf16.mxu0 %v3969_v24  ;;  %v5702_v33 = vpop.eup %5701 }
0x226b   : > { %v3961_v56 = vmul.f32 %v5702_v33, %v5696_v35 }
0x226d   : > { %5376 = vmatpush3.bf16.msra.mxu0 %v3969_v24 }
0x226e   : > { %v5704_v57 = vpop.eup %5703  ;;  %5381 = vmatprep.subr.bf16.mxu0 %v5526_v32 }
0x226f   : > { %v5706_v63 = vpop.eup %5705  ;;  %v3962_v6 = vmul.f32 %v5704_v57, %v5698_v46 }
0x2270   : > { %v3963_v7 = vmul.f32 %v5706_v63, %v5700_v27  ;;  %v4200_v63 = vrot.slane %v6731_v43, %v5952_v13  ;;  %v4220_v13 = vrot.slane %v6854_v62, %v5962_v20 }
0x2271   : > { %v3964_v8 = vpack.c.bf16 %v3962_v6, %v3961_v56 }
0x2272   : > { %v3965_v59 = vpack.c.bf16 %v3963_v7, %v3963_v7 }
0x2273   : > { %5377 = vmatprep.mubr.msk.bf16.mxu0 %vm7085_vm10, %v3964_v8  ;;  %vm7099_vm10 = vmmov %vm7069_vm1 }
0x2274   : > { %5378 = vmatmul.mubr.msk.bf16.vlgmr.msra.gmra.mrb[52].mxu0 %vm7086_vm4, %v3965_v59  ;;  %vm7100_vm4 = vmmov %vm7069_vm1 }
0x2275   : > { %5382 = vmatpush3.bf16.msra.mxu0 %v5526_v32 }
0x2347   : > { %v5379_v31 = vpop.f32.mrb[52].mxu0 }
0x2348   : > { %v4012_v25 = vpop.f32.mrb[53].mxu0  ;;  %v4027_v4 = vpack.c.bf16 %v5379_v31, %v5379_v31  ;;  %v4207_v31 = vrot.slane %v6731_v43, %v5962_v20 }
0x2349   : > { %v5380_v41 = vpop.f32.mrb[54].mxu0 }
0x234a   : > { %v4015_v34 = vpop.f32.mrb[55].mxu0 }
0x234b   : > { %v4026_v37 = vpack.c.bf16 %v4015_v34, %v4012_v25 }
0x234d   : > { %5383 = vmatprep.mubr.msk.bf16.mxu0 %vm7087_vm15, %v4026_v37  ;;  %vm7101_vm15 = vmmov %vm7069_vm1 }
0x234e   : > { %5384 = vmatmul.mubr.msk.bf16.vlgmr.msra.gmra.mrb[56].mxu0 %vm7073_vm0, %v4027_v4  ;;  %vm7102_vm0 = vmmov %vm7069_vm1 }
0x2421   : > { %v5385_v44 = vpop.f32.mrb[56].mxu0 }
0x2422   : > { %v4143_v1 = vadd.f32 %v5391_v15, %v5385_v44  ;;  %v4074_v10 = vpop.f32.mrb[57].mxu0 }
0x2423   : > { %v4135_v9 = vadd.f32 %v4134_v45, %v4074_v10  ;;  %v5386_v0 = vpop.f32.mrb[58].mxu0  ;;  %v5527_v45 = vld [vmem:[%s6955_s14] sm:$0xff]  }
0x2424   : > { %v4077_v16 = vpop.f32.mrb[59].mxu0  ;;  %v4150_v60 = vadd.f32 %v4143_v1, %v6722_v29  ;;  %5393 = vmatprep.subr.bf16.mxu0 %v5527_v45 }
0x2425   : > { %v4148_v55 = vadd.f32 %v4135_v9, %v6716_v61  ;;  %v4138_v19 = vadd.f32 %v4137_v50, %v4077_v16  ;;  %5394 = vmatpush3.bf16.msra.mxu0 %v5527_v45 }
0x2426   : > { %v4157_v52 = vadd.f32 %v4154_v49, %v4150_v60  ;;  %5395 = vmatprep.subr.bf16.mxu0 %v5528_v23 }
0x2427   : > { %v4149_v14 = vadd.f32 %v4138_v19, %v6718_v18  ;;  %v4155_v58 = vadd.f32 %v4154_v49, %v4148_v55 }
0x2428   : > { %v4164_v48 = vsel %vm7090_vm8, %v4157_v52, 0.0  ;;  %vm7105_vm8 = vmmov %vm7102_vm0 }
0x2429   : > { %v4158_v11 = vsel %vm7088_vm11, %v4155_v58, 0.0  ;;  %v4156_v12 = vadd.f32 %v4154_v49, %v4149_v14  ;;  %5396 = vmatpush3.bf16.msra.mxu0 %v5528_v23  ;;  %vm7103_vm11 = vmmov %vm7102_vm0 }
0x242a   : > { %4159 = vadd.xlane.f32.xlu1 %v4158_v11 }
0x242b   : > { %v4161_v22 = vsel %vm7089_vm9, %v4156_v12, 0.0  ;;  %vm7104_vm9 = vmmov %vm7102_vm0 }
0x242c   : > { %4162 = vadd.xlane.f32.xlu0 %v4161_v22 }
0x2430   : > { %4165 = vadd.xlane.f32.xlu0 %v4164_v48 }
0x24b7   : > { %v4160_v17 = vpop.xlane.xlu1 %4159 }
0x24b8   : > { %v4167_v5 = vmul.f32 0.03125, %v4160_v17 }
0x24b9   : > { %v4163_v61 = vpop.xlane.xlu0 %4162 }
0x24ba   : > { %v4170_v30 = vsub.f32 %v4155_v58, %v4167_v5  ;;  %v4168_v47 = vmul.f32 0.03125, %v4163_v61 }
0x24bc   : > { %v4171_v29 = vsub.f32 %v4156_v12, %v4168_v47  ;;  %v4173_v40 = vmul.f32 %v4170_v30, %v4170_v30 }
0x24bd   : > { %v4166_v18 = vpop.xlane.xlu0 %4165 }
0x24be   : > { %v4169_v35 = vmul.f32 0.03125, %v4166_v18  ;;  %v4176_v3 = vsel %vm7091_vm14, %v4173_v40, 0.0  ;;  %v4174_v46 = vmul.f32 %v4171_v29, %v4171_v29  ;;  %vm7106_vm14 = vmmov %vm7102_vm0 }
0x24bf   : > { %4177 = vadd.xlane.f32.xlu1 %v4176_v3 }
0x24c0   : > { %v4172_v27 = vsub.f32 %v4157_v52, %v4169_v35  ;;  %v4179_v39 = vsel %vm7092_vm13, %v4174_v46, 0.0  ;;  %vm7107_vm13 = vmmov %vm7102_vm0 }
0x24c1   : > { %4180 = vadd.xlane.f32.xlu0 %v4179_v39 }
0x24c2   : > { %v4175_v53 = vmul.f32 %v4172_v27, %v4172_v27 }
0x24c4   : > { %v4182_v15 = vsel %vm7093_vm5, %v4175_v53, 0.0  ;;  %vm7108_vm5 = vmmov %vm7102_vm0 }
0x24c5   : > { %4183 = vadd.xlane.f32.xlu1 %v4182_v15 }
0x254c   : > { %v4178_v50 = vpop.xlane.xlu1 %4177 }
0x254d   : > { %v4185_v54 = vmul.f32 0.03125, %v4178_v50 }
0x254e   : > { %v4181_v51 = vpop.xlane.xlu0 %4180 }
0x254f   : > { %v4188_v36 = vadd.f32 1e-05, %v4185_v54  ;;  %v4186_v38 = vmul.f32 0.03125, %v4181_v51 }
0x2551   : > { %5707 = vrsqrt.f32 %v4188_v36  ;;  %v4189_v24 = vadd.f32 1e-05, %v4186_v38 }
0x2552   : > { %v4184_v32 = vpop.xlane.xlu1 %4183 }
0x2553   : > { %5709 = vrsqrt.f32 %v4189_v24  ;;  %v4187_v33 = vmul.f32 0.03125, %v4184_v32  ;;  %v3628_v24 = vsel %vm7097_vm7, %v6697_v2, 0  ;;  %v3631_v32 = vsel %vm7099_vm10, %v6701_v28, 0  ;;  %vm7115_vm10 = vmmov %vm7102_vm0 }
0x2555   : > { %v4190_v57 = vadd.f32 1e-05, %v4187_v33 }
0x2557   : > { %5711 = vrsqrt.f32 %v4190_v57  ;;  %v4408_v57 = vrot.slane %v6854_v62, %v5969_v42 }
0x255b   : > { %v5708_v56 = vpop.eup %5707 }
0x255c   : > { %v4194_v6 = vmul.f32 %v5708_v56, %v4170_v30 }
0x255d   : > { %v5710_v7 = vpop.eup %5709 }
0x255e   : > { %v4195_v8 = vmul.f32 %v5710_v7, %v4171_v29  ;;  %v4201_v59 = vmul.f32 %v4200_v63, %v4194_v6 }
0x2560   : > { %v4202_v25 = vmul.f32 %v4200_v63, %v4195_v8  ;;  %v4208_v37 = vadd.f32 %v4207_v31, %v4201_v59 }
0x2561   : > { %v5712_v41 = vpop.eup %5711 }
0x2562   : > { %v4196_v34 = vmul.f32 %v5712_v41, %v4172_v27  ;;  %v4209_v4 = vadd.f32 %v4207_v31, %v4202_v25 }
0x2564   : > { %v4203_v44 = vmul.f32 %v4200_v63, %v4196_v34  ;;  %v4215_v1 = vpack.c.bf16 %v4209_v4, %v4208_v37 }
0x2566   : > { %5397 = vmatprep.mubr.msk.bf16.mxu0 %vm7094_vm12, %v4215_v1  ;;  %v4210_v10 = vadd.f32 %v4207_v31, %v4203_v44  ;;  %vm7109_vm12 = vmmov %vm7102_vm0 }
0x2568   : > { %v4216_v9 = vpack.c.bf16 %v4210_v10, %v4210_v10 }
0x256a   : > { %5398 = vmatmul.mubr.msk.bf16.vlgmr.msra.gmra.mrb[60].mxu0 %vm7069_vm1, %v4216_v9  ;;  %vm7110_vm1 = vmmov %vm7102_vm0 }
0x263d   : > { %v5399_v0 = vpop.f32.mrb[60].mxu0 }
0x263e   : > { %v4282_v49 = vadd.f32 %v5399_v0, %v4220_v13  ;;  %v4273_v16 = vpop.f32.mrb[61].mxu0 }
0x263f   : > { %v4274_v55 = vadd.f32 %v4273_v16, %v4220_v13  ;;  %v5400_v19 = vpop.f32.mrb[62].mxu0 }
0x2640   : > { %v4289_v60 = vmul.f32 %v4282_v49, %v4282_v49  ;;  %v4276_v14 = vpop.f32.mrb[63].mxu0 }
0x2641   : > { %v4287_v58 = vmul.f32 %v4274_v55, %v4274_v55  ;;  %v4277_v11 = vadd.f32 %v4276_v14, %v4220_v13 }
0x2642   : > { %v4292_v12 = vmul.f32 %v4289_v60, %v4282_v49 }
0x2643   : > { %v4290_v22 = vmul.f32 %v4287_v58, %v4274_v55  ;;  %v4288_v52 = vmul.f32 %v4277_v11, %v4277_v11 }
0x2644   : > { %v4295_v48 = vmul.f32 0.044715, %v4292_v12  ;;  %v5530_v12 = vld [vmem:[%s6957_s16 + $0x8] sm:$0xff]  }
0x2645   : > { %v4293_v17 = vmul.f32 0.044715, %v4290_v22  ;;  %v4291_v5 = vmul.f32 %v4288_v52, %v4277_v11 }
0x2646   : > { %v4298_v61 = vadd.f32 %v4295_v48, %v4282_v49 }
0x2647   : > { %v4296_v30 = vadd.f32 %v4293_v17, %v4274_v55  ;;  %v4294_v47 = vmul.f32 0.044715, %v4291_v5 }
0x2648   : > { %v4301_v29 = vmul.f32 0.7978846, %v4298_v61 }
0x2649   : > { %v4299_v20 = vmul.f32 0.7978846, %v4296_v30  ;;  %v4297_v40 = vadd.f32 %v4294_v47, %v4277_v11 }
0x264a   : > { %5713 = vtanh.f32 %v4301_v29 }
0x264b   : > { %5715 = vtanh.f32 %v4299_v20  ;;  %v4300_v18 = vmul.f32 0.7978846, %v4297_v40  ;;  %v4454_v20 = vrot.slane %v6731_v43, %v5969_v42  ;;  %v5531_v42 = vld [vmem:[%s6958_s17] sm:$0xff]  }
0x264d   : > { %5717 = vtanh.f32 %v4300_v18 }
0x2654   : > { %v5714_v35 = vpop.eup %5713 }
0x2655   : > { %v5716_v3 = vpop.eup %5715  ;;  %v4307_v46 = vadd.f32 1.0, %v5714_v35 }
0x2656   : > { %v4305_v27 = vadd.f32 1.0, %v5716_v3 }
0x2657   : > { %v5718_v39 = vpop.eup %5717  ;;  %v4310_v53 = vmul.f32 0.5, %v4307_v46 }
0x2658   : > { %v4308_v15 = vmul.f32 0.5, %v4305_v27  ;;  %v4306_v45 = vadd.f32 1.0, %v5718_v39  ;;  %v4461_v27 = vrot.slane %v6731_v43, %v6090_v26  ;;  %v5532_v43 = vld [vmem:[%s6958_s17 + $0x8] sm:$0xff]  }
0x2659   : > { %v4313_v50 = vmul.f32 %v4310_v53, %v4282_v49 }
0x265a   : > { %v4309_v23 = vmul.f32 0.5, %v4306_v45  ;;  %v4311_v54 = vmul.f32 %v4308_v15, %v4274_v55 }
0x265b   : > { %v4323_v38 = vpack.c.bf16 %v4313_v50, %v4313_v50 }
0x265c   : > { %v4312_v51 = vmul.f32 %v4309_v23, %v4277_v11  ;;  %v5529_v11 = vld [vmem:[%s6957_s16] sm:$0xff]  }
0x265d   : > { %5413 = vmatprep.subr.bf16.mxu0 %v5529_v11 }
0x265e   : > { %v4322_v36 = vpack.c.bf16 %v4312_v51, %v4311_v54  ;;  %5414 = vmatpush3.bf16.msra.mxu0 %v5529_v11 }
0x265f   : > { %5415 = vmatprep.subr.bf16.mxu0 %v5530_v12 }
0x2660   : > { %5409 = vmatprep.mubr.msk.bf16.mxu1 %vm7095_vm2, %v4322_v36  ;;  %vm7111_vm2 = vmmov %vm7102_vm0 }
0x2661   : > { %5410 = vmatmul.mubr.msk.bf16.vlgmr.msra.gmra.mrb[72].mxu1 %vm7096_vm6, %v4323_v38  ;;  %v4474_v38 = vrot.slane %v6854_v62, %v6090_v26  ;;  %vm7112_vm6 = vcmask 130048  }
0x2662   : > { %5430 = vmatpush3.bf16.xpose.msra.mxu1 %v3628_v24  ;;  %5416 = vmatpush3.bf16.msra.mxu0 %v5530_v12  ;;  %vm7113_vm7 = vmmov %vm7112_vm6 }
0x2663   : > { %5464 = vmatprep.subr.msk.bf16.mxu1 %vm7098_vm3, %v6701_v28  ;;  %5421 = vmatprep.subr.bf16.mxu0 %v5531_v42  ;;  %vm7114_vm3 = vmmov %vm7102_vm0 }
0x266a   : > { %5432 = vmatpush3.bf16.xpose.msra.mxu1 %v3631_v32 }
0x2734   : > { %v5411_v33 = vpop.f32.mrb[72].mxu1 }
0x2735   : > { %v4388_v63 = vpop.f32.mrb[73].mxu1  ;;  %v4404_v56 = vadd.f32 %v5411_v33, %v4210_v10 }
0x2736   : > { %v4402_v6 = vadd.f32 %v4388_v63, %v4208_v37  ;;  %v5412_v7 = vpop.f32.mrb[74].mxu1 }
0x2737   : > { %v4391_v8 = vpop.f32.mrb[75].mxu1  ;;  %v4411_v2 = vadd.f32 %v4408_v57, %v4404_v56 }
0x2738   : > { %v4409_v59 = vadd.f32 %v4408_v57, %v4402_v6  ;;  %v4403_v31 = vadd.f32 %v4391_v8, %v4209_v4 }
0x2739   : > { %v4418_v28 = vsel %vm7102_vm0, %v4411_v2, 0.0 }
0x273a   : > { %v4410_v25 = vadd.f32 %v4408_v57, %v4403_v31  ;;  %v4412_v41 = vsel %vm7100_vm4, %v4409_v59, 0.0  ;;  %vm7116_vm4 = vmmov %vm7112_vm6 }
0x273b   : > { %4413 = vadd.xlane.f32.xlu0 %v4412_v41 }
0x273c   : > { %v4415_v34 = vsel %vm7101_vm15, %v4410_v25, 0.0  ;;  %vm4752_vm15 = vcmask 1040384  }
0x273d   : > { %4416 = vadd.xlane.f32.xlu1 %v4415_v34 }
0x273f   : > { %4419 = vadd.xlane.f32.xlu0 %v4418_v28 }
0x27c8   : > { %v4414_v44 = vpop.xlane.xlu0 %4413 }
0x27c9   : > { %v4421_v1 = vmul.f32 0.03125, %v4414_v44 }
0x27ca   : > { %v4417_v9 = vpop.xlane.xlu1 %4416 }
0x27cb   : > { %v4424_v10 = vsub.f32 %v4409_v59, %v4421_v1  ;;  %v4422_v37 = vmul.f32 0.03125, %v4417_v9 }
0x27cc   : > { %v4420_v13 = vpop.xlane.xlu0 %4419 }
0x27cd   : > { %v4425_v0 = vsub.f32 %v4410_v25, %v4422_v37  ;;  %v4423_v49 = vmul.f32 0.03125, %v4420_v13  ;;  %v4427_v4 = vmul.f32 %v4424_v10, %v4424_v10 }
0x27cf   : > { %v4426_v16 = vsub.f32 %v4411_v2, %v4423_v49  ;;  %v4430_v55 = vsel %vm7103_vm11, %v4427_v4, 0.0  ;;  %v4428_v19 = vmul.f32 %v4425_v0, %v4425_v0  ;;  %vm4755_vm11 = vcmask 1042432  }
0x27d0   : > { %4431 = vadd.xlane.f32.xlu1 %v4430_v55 }
0x27d1   : > { %v4433_v60 = vsel %vm7104_vm9, %v4428_v19, 0.0  ;;  %v4429_v14 = vmul.f32 %v4426_v16, %v4426_v16  ;;  %vm7117_vm9 = vmmov %vm7116_vm4 }
0x27d2   : > { %4434 = vadd.xlane.f32.xlu0 %v4433_v60 }
0x27d3   : > { %v4436_v58 = vsel %vm7105_vm8, %v4429_v14, 0.0  ;;  %vm4757_vm8 = vcmask 388096  }
0x27d4   : > { %4437 = vadd.xlane.f32.xlu1 %v4436_v58 }
0x285d   : > { %v4432_v22 = vpop.xlane.xlu1 %4431 }
0x285e   : > { %v4439_v52 = vmul.f32 0.03125, %v4432_v22 }
0x285f   : > { %v4435_v48 = vpop.xlane.xlu0 %4434 }
0x2860   : > { %v4442_v17 = vadd.f32 1e-05, %v4439_v52  ;;  %v4440_v5 = vmul.f32 0.03125, %v4435_v48  ;;  %v4577_v48 = vrot.slane %v6854_v62, %v6129_v21 }
0x2861   : > { %v4438_v61 = vpop.xlane.xlu1 %4437 }
0x2862   : > { %5719 = vrsqrt.f32 %v4442_v17  ;;  %v4443_v30 = vadd.f32 1e-05, %v4440_v5  ;;  %v4441_v47 = vmul.f32 0.03125, %v4438_v61 }
0x2864   : > { %5721 = vrsqrt.f32 %v4443_v30  ;;  %v4444_v29 = vadd.f32 1e-05, %v4441_v47 }
0x2866   : > { %5723 = vrsqrt.f32 %v4444_v29 }
0x286c   : > { %v5720_v40 = vpop.eup %5719 }
0x286d   : > { %v4448_v18 = vmul.f32 %v5720_v40, %v4424_v10 }
0x286e   : > { %v5722_v35 = vpop.eup %5721 }
0x286f   : > { %v4449_v3 = vmul.f32 %v5722_v35, %v4425_v0  ;;  %v4455_v46 = vmul.f32 %v4454_v20, %v4448_v18 }
0x2870   : > { %v5724_v39 = vpop.eup %5723 }
0x2871   : > { %v4450_v53 = vmul.f32 %v5724_v39, %v4426_v16  ;;  %v4456_v15 = vmul.f32 %v4454_v20, %v4449_v3  ;;  %v4462_v45 = vadd.f32 %v4461_v27, %v4455_v46 }
0x2873   : > { %v4463_v23 = vadd.f32 %v4461_v27, %v4456_v15  ;;  %v4457_v50 = vmul.f32 %v4454_v20, %v4450_v53 }
0x2875   : > { %v4469_v54 = vpack.c.bf16 %v4463_v23, %v4462_v45  ;;  %v4464_v51 = vadd.f32 %v4461_v27, %v4457_v50 }
0x2877   : > { %5417 = vmatprep.mubr.msk.bf16.mxu0 %vm7106_vm14, %v4469_v54  ;;  %v4470_v36 = vpack.c.bf16 %v4464_v51, %v4464_v51  ;;  %vm7118_vm14 = vcmask 1041408  }
0x2879   : > { %5418 = vmatmul.mubr.msk.bf16.vlgmr.msra.gmra.mrb[64].mxu0 %vm7107_vm13, %v4470_v36  ;;  %vm7119_vm13 = vmmov %vm7102_vm0 }
0x287a   : > { %5422 = vmatpush3.bf16.msra.mxu0 %v5531_v42 }
0x287b   : > { %5423 = vmatprep.subr.bf16.mxu0 %v5532_v43 }
0x287e   : > { %5424 = vmatpush3.bf16.msra.mxu0 %v5532_v43 }
0x294c   : > { %v5419_v24 = vpop.f32.mrb[64].mxu0 }
0x294d   : > { %v4536_v32 = vadd.f32 %v5419_v24, %v4474_v38  ;;  %v4527_v33 = vpop.f32.mrb[65].mxu0 }
0x294e   : > { %v4528_v57 = vadd.f32 %v4527_v33, %v4474_v38  ;;  %v5420_v63 = vpop.f32.mrb[66].mxu0 }
0x294f   : > { %v4543_v56 = vmul.f32 %v4536_v32, %v4536_v32  ;;  %v4530_v6 = vpop.f32.mrb[67].mxu0 }
0x2950   : > { %v4541_v7 = vmul.f32 %v4528_v57, %v4528_v57  ;;  %v4531_v8 = vadd.f32 %v4530_v6, %v4474_v38 }
0x2951   : > { %v4546_v59 = vmul.f32 %v4543_v56, %v4536_v32 }
0x2952   : > { %v4544_v31 = vmul.f32 %v4541_v7, %v4528_v57  ;;  %v4542_v2 = vmul.f32 %v4531_v8, %v4531_v8 }
0x2953   : > { %v4549_v25 = vmul.f32 0.044715, %v4546_v59 }
0x2954   : > { %v4547_v41 = vmul.f32 0.044715, %v4544_v31  ;;  %v4545_v34 = vmul.f32 %v4542_v2, %v4531_v8 }
0x2955   : > { %v4552_v28 = vadd.f32 %v4549_v25, %v4536_v32 }
0x2956   : > { %v4550_v44 = vadd.f32 %v4547_v41, %v4528_v57  ;;  %v4548_v1 = vmul.f32 0.044715, %v4545_v34 }
0x2957   : > { %v4555_v9 = vmul.f32 0.7978846, %v4552_v28 }
0x2958   : > { %v4553_v26 = vmul.f32 0.7978846, %v4550_v44  ;;  %v4551_v10 = vadd.f32 %v4548_v1, %v4531_v8 }
0x2959   : > { %5725 = vtanh.f32 %v4555_v9 }
0x295a   : > { %5727 = vtanh.f32 %v4553_v26  ;;  %v4554_v37 = vmul.f32 0.7978846, %v4551_v10 }
0x295c   : > { %5729 = vtanh.f32 %v4554_v37 }
0x2963   : > { %v5726_v13 = vpop.eup %5725 }
0x2964   : > { %v5728_v0 = vpop.eup %5727  ;;  %v4561_v49 = vadd.f32 1.0, %v5726_v13 }
0x2965   : > { %v4559_v4 = vadd.f32 1.0, %v5728_v0 }
0x2966   : > { %v5730_v16 = vpop.eup %5729  ;;  %v4564_v55 = vmul.f32 0.5, %v4561_v49 }
0x2967   : > { %v4562_v19 = vmul.f32 0.5, %v4559_v4  ;;  %v4560_v60 = vadd.f32 1.0, %v5730_v16 }
0x2968   : > { %v4567_v58 = vmul.f32 %v4564_v55, %v4536_v32 }
0x2969   : > { %v4563_v14 = vmul.f32 0.5, %v4560_v60  ;;  %v4565_v11 = vmul.f32 %v4562_v19, %v4528_v57 }
0x296a   : > { %v4573_v52 = vpack.c.bf16 %v4567_v58, %v4567_v58 }
0x296b   : > { %v4566_v12 = vmul.f32 %v4563_v14, %v4531_v8 }
0x296d   : > { %v4572_v22 = vpack.c.bf16 %v4566_v12, %v4565_v11 }
0x296f   : > { %5425 = vmatprep.mubr.msk.bf16.mxu0 %vm7108_vm5, %v4572_v22 }
0x2970   : > { %5426 = vmatmul.mubr.msk.bf16.vlgmr.msra.gmra.mrb[68].mxu0 %vm7109_vm12, %v4573_v52 }
0x2a43   : > { %v5427_v17 = vpop.f32.mrb[68].mxu0 }
0x2a44   : > { %v4630_v5 = vpop.f32.mrb[69].mxu0  ;;  %v4639_v30 = vadd.f32 %v5427_v17, %v4577_v48 }
0x2a45   : > { %v5428_v61 = vpop.f32.mrb[70].mxu0  ;;  %v4631_v29 = vadd.f32 %v4630_v5, %v4577_v48 }
0x2a46   : > { %v4633_v47 = vpop.f32.mrb[71].mxu0  ;;  %v4645_v18 = vpack.c.bf16 %v4639_v30, %v4639_v30 }
0x2a47   : > { %v4634_v20 = vadd.f32 %v4633_v47, %v4577_v48 }
0x2a49   : > { %v4644_v40 = vpack.c.bf16 %v4634_v20, %v4631_v29 }
0x2a4b   : > { %5433 = vmatprep.mubr.msk.bf16.mxu1 %vm7110_vm1, %v4644_v40 }
0x2a4c   : > { %5434 = vmatmul.mubr.msk.bf16.vlgmr.msra.gmra.mrb[76].mxu1 %vm7111_vm2, %v4645_v18 }
0x2b1f   : > { %v5435_v35 = vpop.f32.mrb[76].mxu1 }
0x2b20   : > { %v4686_v3 = vpop.f32.mrb[77].mxu1  ;;  %v4737_v15 = vrot.slane %v5435_v35, 2  ;;  %v4735_v6 = vrot.slane %v5435_v35, 1 }
0x2b21   : > { %v4701_v46 = vrot.slane %v4686_v3, 1  ;;  %v4705_v27 = vrot.slane %v4686_v3, 2  ;;  %v5436_v39 = vpop.f32.mrb[78].mxu1 }
0x2b22   : > { %v4689_v53 = vpop.f32.mrb[79].mxu1 }
0x2b23   : > { %4706 = vrot.lane.b32.xlu1 %v4705_v27, %s5748_s24  ;;  %4702 = vrot.lane.b32.xlu0 %v4701_v46, %s5749_s3  ;;  %v4712_v21 = vrot.slane %v4689_v53, 1  ;;  %v4716_v62 = vrot.slane %v4689_v53, 2 }
0x2b27   : > { %4722 = vrot.lane.b32.xlu0 %v4689_v53, %s6992_s28  ;;  %4713 = vrot.lane.b32.xlu1 %v4712_v21, %s5749_s3 }
0x2b2b   : > { %4732 = vrot.lane.b32.xlu0 %v5435_v35, %s6992_s28  ;;  %4717 = vrot.lane.b32.xlu1 %v4716_v62, %s5748_s24  ;;  %s4832_s28 = sshll.u32 %s7121_s30, 2 }
0x2b2c   : > { %s617_s27 = scalar_lea.vmem %s6960_s19, %s4832_s28 }
0x2b2f   : > { %4726 = vrot.lane.b32.xlu1 %v4716_v62, %s5749_s3 }
0x2b33   : > { %4738 = vrot.lane.b32.xlu1 %v4737_v15, %s5749_s3 }
0x2b95   : > { %v4707_v45 = vpop.permute.xlu1 %4706  ;;  %v4703_v23 = vpop.permute.xlu0 %4702 }
0x2b96   : > { %v4709_v54 = vsel %vm7112_vm6, %v4686_v3, %v4703_v23 }
0x2b97   : > { %v4710_v38 = vsel %vm7115_vm10, %v4709_v54, %v4707_v45 }
0x2b98   : > { %v4744_v57 = vrot.slane %v4710_v38, 1 }
0x2b99   : > { %v4714_v50 = vpop.permute.xlu1 %4713  ;;  %v4723_v51 = vpop.permute.xlu0 %4722 }
0x2b9a   : > { %v4720_v36 = vsel %vm7113_vm7, %v4686_v3, %v4714_v50  ;;  %v4729_v32 = vsel %vm7116_vm4, %v4723_v51, %v4712_v21 }
0x2b9d   : > { %v4718_v42 = vpop.permute.xlu1 %4717  ;;  %v4733_v63 = vpop.permute.xlu0 %4732 }
0x2b9e   : > { %v4721_v43 = vsel %vm7114_vm3, %v4720_v36, %v4718_v42  ;;  %v4741_v59 = vsel %vm7117_vm9, %v4733_v63, %v4735_v6 }
0x2b9f   : > { %v4747_v24 = vrot.slane %v4721_v43, 6 }
0x2ba1   : > { %v4727_v33 = vpop.permute.xlu1 %4726  ;;  %v4753_v8 = vsel %vm4752_vm15, %v4744_v57, %v4747_v24 }
0x2ba2   : > { %v4730_v56 = vsel %vm7102_vm0, %v4729_v32, %v4727_v33 }
0x2ba3   : > { %v4750_v7 = vrot.slane %v4730_v56, 3 }
0x2ba5   : > { %v4739_v31 = vpop.permute.xlu1 %4738  ;;  %v4754_v2 = vsel %vm7118_vm14, %v4753_v8, %v4750_v7 }
0x2ba6   : > { %v4742_v25 = vsel %vm7119_vm13, %v4741_v59, %v4739_v31 }
0x2ba7   : > { %v4756_v41 = vsel %vm4755_vm11, %v4754_v2, %v4742_v25 }
0x2ba8   : > { %4758 = vst.msk [vmem:[%s617_s27] sm:$0xf] %vm4757_vm8, %v4756_v41 }
0x2ba9 PF: > { %s29_s0 = sadd.s32 1, %s5740_s0  }
0x2baa   : > { %p26_p4 = scmp.ge.s32.totalorder %s29_s0, 4  }
0x2bac   :  { %28 = sbr.rel (!%p26_p4) target bundleno = 5 (0x5), region = 134 }

</bundles_post_ra>
